<compile_context>
chip_gen: v6e
topology: v6e:2x2x1
jax: 0.10.0
libtpu: 0.0.40
codegen_flags: <defaults>
</compile_context>

<pallas_src>
import functools

import jax
import jax.numpy as jnp
from jax.experimental import pallas as pl
from jax.experimental.pallas import tpu as pltpu

_EPS = 1e-5
_LANE = 128


def _round_up(x, m):
    return (x + m - 1) // m * m


# ----------------------------------------------------------------------------
# Fused BasicBlock kernel: one batch element per grid step.
#   conv1(3x3, stride, pad 1) + bias1 + ReLU      (bf16 matmul, f32 acc)
#   conv2(3x3, 1,      pad 1) + bias2             (bf16 matmul, f32 acc)
#   + shortcut (identity add or bf16 1x1 proj)    -> ReLU -> lane-dense store
# ----------------------------------------------------------------------------
def _basic_block_kernel(x_ref, w1_ref, b1_ref, w2_ref, b2_ref, *rest,
                        H, W, Cinp, Cp, stride, Ho, Wo, has_proj):
    if has_proj:
        ws_ref, bs_ref, o_ref, xpad_ref, hpad_ref = rest
    else:
        o_ref, xpad_ref, hpad_ref = rest
    s = stride
    bf16 = jnp.bfloat16

    # ---- stage the bf16 input into the zero-halo VMEM scratch --------------
    # Only the 1-wide halo border is zeroed; the interior is fully overwritten
    # each grid step (no full-buffer clears).
    if s == 1:
        xpad_ref[0:1, :, :] = jnp.zeros((1, W + 2, Cinp), bf16)
        xpad_ref[H + 1:H + 2, :, :] = jnp.zeros((1, W + 2, Cinp), bf16)
        xpad_ref[:, 0:1, :] = jnp.zeros((H + 2, 1, Cinp), bf16)
        xpad_ref[:, W + 1:W + 2, :] = jnp.zeros((H + 2, 1, Cinp), bf16)
        xpad_ref[1:H + 1, 1:W + 1, :] = x_ref[0]
        xp = xpad_ref[...]                                   # (H+2, W+2, Cinp)

        def tap(dy, dx):                                     # (Ho, Wo, Cinp)
            return xp[dy:dy + Ho, dx:dx + Wo, :]
    else:
        # x_ref holds the W-packed input (1, H, W//s, s*Cinp):
        #   x_packed[r, p, slot*Cinp + c] == x[r, s*p + slot, c]
        Hp, Wp, Ck = s * (Ho + 1), Wo + 1, s * Cinp
        xpad_ref[0:1, :, :] = jnp.zeros((1, Wp, Ck), bf16)
        xpad_ref[H + 1:Hp, :, :] = jnp.zeros((Hp - H - 1, Wp, Ck), bf16)
        xpad_ref[:, 0:1, :] = jnp.zeros((Hp, 1, Ck), bf16)
        xpad_ref[1:H + 1, 1:Wp, :] = x_ref[0]
        # leading-dim split (layout no-op): padded row s*a + b  ->  [a, b]
        xp = xpad_ref[...].reshape(Ho + 1, s, Wo + 1, Ck)

        def tap(dy, dx):                                     # (Ho, Wo, Cinp)
            # padded row for output i is s*i + dy -> block i + dy//s, slot dy%s;
            # padded col s*j + dx -> packed col / channel slot (lane aligned).
            rows = xp[dy // s:dy // s + Ho, dy % s]          # (Ho, Wo+1, Ck)
            c0, slot = (0, s - 1) if dx == 0 else (1, dx - 1)
            return rows[:, c0:c0 + Wo, slot * Cinp:(slot + 1) * Cinp]

    # ---- conv1: im2col + ONE bf16 MXU matmul, K = 9*Cinp (lane aligned) ----
    col1 = jnp.concatenate(
        [tap(dy, dx).reshape(Ho * Wo, Cinp)
         for dy in range(3) for dx in range(3)], axis=-1)    # (Ho*Wo, 9*Cinp)
    h = jnp.dot(col1, w1_ref[...], preferred_element_type=jnp.float32)
    h = jnp.maximum(h + b1_ref[...], 0.0)                    # folded BN + ReLU

    # ---- re-pad h1 (bf16) in VMEM for conv2; h1 never touches HBM ----------
    hpad_ref[0:1, :, :] = jnp.zeros((1, Wo + 2, Cp), bf16)
    hpad_ref[Ho + 1:Ho + 2, :, :] = jnp.zeros((1, Wo + 2, Cp), bf16)
    hpad_ref[:, 0:1, :] = jnp.zeros((Ho + 2, 1, Cp), bf16)
    hpad_ref[:, Wo + 1:Wo + 2, :] = jnp.zeros((Ho + 2, 1, Cp), bf16)
    hpad_ref[1:Ho + 1, 1:Wo + 1, :] = h.reshape(Ho, Wo, Cp).astype(bf16)
    hp = hpad_ref[...]                                       # (Ho+2, Wo+2, Cp)

    # ---- conv2 (stride 1): im2col + ONE bf16 MXU matmul, K = 9*Cp -----------
    col2 = jnp.concatenate(
        [hp[dy:dy + Ho, dx:dx + Wo, :].reshape(Ho * Wo, Cp)
         for dy in range(3) for dx in range(3)], axis=-1)    # (Ho*Wo, 9*Cp)
    r = jnp.dot(col2, w2_ref[...], preferred_element_type=jnp.float32)
    r = r + b2_ref[...]                                      # folded BN

    # ---- shortcut ------------------------------------------------------------
    if has_proj:
        if s == 1:
            xs = x_ref[0].reshape(Ho * Wo, Cinp)
        else:
            # 1x1 stride-s conv reads x[s*i, s*j]: packed row s*i, slot 0.
            xs = x_ref[0].reshape(Ho, s, Wo, s * Cinp)[:, 0, :, :Cinp]
            xs = xs.reshape(Ho * Wo, Cinp)
        r = r + jnp.dot(xs, ws_ref[...],
                        preferred_element_type=jnp.float32)  # bf16 MXU, f32 acc
        r = r + bs_ref[...]
    else:
        # identity shortcut: plain VPU add, no MXU work.  Cinp == Cp here and
        # the channel padding of x is zero, so adding the full slab is fine.
        r = r + x_ref[0].reshape(Ho * Wo, Cp).astype(jnp.float32)

    # ---- ReLU + lane-dense (Cp = k*128) store --------------------------------
    o_ref[0] = jnp.maximum(r, 0.0).reshape(Ho, Wo, Cp)


# ----------------------------------------------------------------------------
# Weight preparation: fold BN scale into weights, pad in/out channels to lane
# multiples, reshape to the (9*C, Cp) im2col-matmul layout, cast to bf16.
# ----------------------------------------------------------------------------
def _prep_weights(p, Cin, Cout, has_proj):
    Cinp = _round_up(Cin, _LANE)
    Cp = _round_up(Cout, _LANE)
    pci, pco = Cinp - Cin, Cp - Cout

    w1 = p["w1"] * p["scale1"]                               # (3,3,Cin,Cout)
    w1 = jnp.pad(w1, ((0, 0), (0, 0), (0, pci), (0, pco)))
    w1 = w1.reshape(9 * Cinp, Cp).astype(jnp.bfloat16)
    b1 = jnp.pad(p["bias1"], (0, pco)).reshape(1, Cp).astype(jnp.float32)

    w2 = p["w2"] * p["scale2"]                               # (3,3,Cout,Cout)
    w2 = jnp.pad(w2, ((0, 0), (0, 0), (0, pco), (0, pco)))
    w2 = w2.reshape(9 * Cp, Cp).astype(jnp.bfloat16)
    b2 = jnp.pad(p["bias2"], (0, pco)).reshape(1, Cp).astype(jnp.float32)

    if has_proj:
        ws = p["ws"] * p["scale_s"]                          # (Cin, Cout)
        ws = jnp.pad(ws, ((0, pci), (0, pco))).astype(jnp.bfloat16)
        bs = jnp.pad(p["bias_s"], (0, pco)).reshape(1, Cp).astype(jnp.float32)
        return w1, b1, w2, b2, ws, bs, Cinp, Cp
    return w1, b1, w2, b2, None, None, Cinp, Cp


# ----------------------------------------------------------------------------
# BasicBlock forward (NCHW in / NCHW out, matching the PyTorch module).
# ----------------------------------------------------------------------------
@functools.partial(jax.jit, static_argnums=(2, 3, 4))
def basic_block_forward(x_nchw, params, in_channels, out_channels, stride=1):
    x = jnp.transpose(x_nchw, (0, 2, 3, 1))                  # -> NHWC
    N, H, W, Cin = x.shape
    assert Cin == in_channels
    has_proj = (stride != 1) or (in_channels != out_channels)
    w1, b1, w2, b2, ws, bs, Cinp, Cp = _prep_weights(params, Cin, out_channels,
                                                     has_proj)

    # bf16 input DMA; channels zero-padded to a 128-lane multiple so every
    # im2col concat boundary / stride-slot slice is a lane boundary.
    x = jnp.pad(x, ((0, 0), (0, 0), (0, 0), (0, Cinp - Cin))).astype(jnp.bfloat16)

    if stride == 1:
        Ho, Wo = H, W
        x_in = x
        xpad_shape = (H + 2, W + 2, Cinp)
    else:
        assert H % stride == 0 and W % stride == 0
        Ho, Wo = H // stride, W // stride
        # Free re-interpretation: pack the W axis into channel slots so the
        # in-kernel W-subsample is a contiguous, lane-aligned channel slice.
        x_in = x.reshape(N, H, Wo, stride * Cinp)
        xpad_shape = (stride * (Ho + 1), Wo + 1, stride * Cinp)

    kernel = functools.partial(_basic_block_kernel, H=H, W=W, Cinp=Cinp, Cp=Cp,
                               stride=stride, Ho=Ho, Wo=Wo, has_proj=has_proj)
    inputs = [x_in, w1, b1, w2, b2] + ([ws, bs] if has_proj else [])
    in_specs = [
        pl.BlockSpec((1,) + x_in.shape[1:], lambda n: (n, 0, 0, 0)),
        pl.BlockSpec(w1.shape, lambda n: (0, 0)),
        pl.BlockSpec(b1.shape, lambda n: (0, 0)),
        pl.BlockSpec(w2.shape, lambda n: (0, 0)),
        pl.BlockSpec(b2.shape, lambda n: (0, 0)),
    ]
    if has_proj:
        in_specs += [pl.BlockSpec(ws.shape, lambda n: (0, 0)),
                     pl.BlockSpec(bs.shape, lambda n: (0, 0))]

    out = pl.pallas_call(
        kernel,
        out_shape=jax.ShapeDtypeStruct((N, Ho, Wo, Cp), jnp.float32),
        grid=(N,),
        in_specs=in_specs,
        out_specs=pl.BlockSpec((1, Ho, Wo, Cp), lambda n: (n, 0, 0, 0)),
        scratch_shapes=[pltpu.VMEM(xpad_shape, jnp.bfloat16),
                        pltpu.VMEM((Ho + 2, Wo + 2, Cp), jnp.bfloat16)],
        compiler_params=pltpu.CompilerParams(
            dimension_semantics=("parallel",),
            vmem_limit_bytes=32 * 1024 * 1024),
    )(*inputs)
    out = out[..., :out_channels]                    # drop lane padding
    return jnp.transpose(out, (0, 3, 1, 2))          # NHWC -> NCHW


# ----------------------------------------------------------------------------
# Parameter init (deterministic; inference-mode BN folded to scale/bias).
# ----------------------------------------------------------------------------
def _fold_bn(gamma, beta, mean, var):
    scale = gamma / jnp.sqrt(var + _EPS)
    bias = beta - mean * scale
    return scale, bias


def init_basic_block_params(key, in_channels, out_channels, stride):
    ks = jax.random.split(key, 14)
    p = {}
    p["w1"] = 0.1 * jax.random.normal(
        ks[0], (3, 3, in_channels, out_channels), jnp.float32)
    p["scale1"], p["bias1"] = _fold_bn(
        jax.random.uniform(ks[1], (out_channels,), minval=0.5, maxval=1.5),
        0.1 * jax.random.normal(ks[2], (out_channels,)),
        0.1 * jax.random.normal(ks[3], (out_channels,)),
        jax.random.uniform(ks[4], (out_channels,), minval=0.5, maxval=1.5))
    p["w2"] = 0.1 * jax.random.normal(
        ks[5], (3, 3, out_channels, out_channels), jnp.float32)
    p["scale2"], p["bias2"] = _fold_bn(
        jax.random.uniform(ks[6], (out_channels,), minval=0.5, maxval=1.5),
        0.1 * jax.random.normal(ks[7], (out_channels,)),
        0.1 * jax.random.normal(ks[8], (out_channels,)),
        jax.random.uniform(ks[9], (out_channels,), minval=0.5, maxval=1.5))
    if stride != 1 or in_channels != out_channels:
        p["ws"] = 0.1 * jax.random.normal(
            ks[10], (in_channels, out_channels), jnp.float32)
        p["scale_s"], p["bias_s"] = _fold_bn(
            jax.random.uniform(ks[11], (out_channels,), minval=0.5, maxval=1.5),
            0.1 * jax.random.normal(ks[12], (out_channels,)),
            0.1 * jax.random.normal(ks[13], (out_channels,)),
            jnp.ones((out_channels,), jnp.float32))
    return p


# ----------------------------------------------------------------------------
# Plain-JAX reference (lax.conv) for correctness.
# ----------------------------------------------------------------------------
def _ref_forward(x_nchw, p, in_channels, out_channels, stride):
    x = jnp.transpose(x_nchw, (0, 2, 3, 1)).astype(jnp.float32)
    dn = ("NHWC", "HWIO", "NHWC")

    def conv(inp, w, s, pad):
        return jax.lax.conv_general_dilated(inp, w, (s, s), pad,
                                            dimension_numbers=dn)

    h = conv(x, p["w1"], stride, [(1, 1), (1, 1)])
    h = jnp.maximum(h * p["scale1"] + p["bias1"], 0.0)
    r = conv(h, p["w2"], 1, [(1, 1), (1, 1)]) * p["scale2"] + p["bias2"]
    if stride != 1 or in_channels != out_channels:
        sc = conv(x, p["ws"].reshape(1, 1, in_channels, out_channels),
                  stride, [(0, 0), (0, 0)])
        sc = sc * p["scale_s"] + p["bias_s"]
    else:
        sc = x
    out = jnp.maximum(r + sc, 0.0)
    return jnp.transpose(out, (0, 3, 1, 2))


if __name__ == "__main__":
    configs = [
        # (N, Cin, Cout, H, W, stride)
        (2, 4, 8, 16, 16, 1),     # channel change -> 1x1 projection shortcut
        (2, 8, 8, 16, 16, 1),     # identity shortcut (plain add, no matmul)
        (2, 8, 16, 16, 16, 2),    # stride-2 downsample + projection shortcut
    ]
    key = jax.random.PRNGKey(0)
    for (N, Cin, Cout, H, W, stride) in configs:
        key, kx, kp = jax.random.split(key, 3)
        x = jax.random.normal(kx, (N, Cin, H, W), jnp.float32)    # NCHW input
        params = init_basic_block_params(kp, Cin, Cout, stride)

        out = jax.block_until_ready(
            basic_block_forward(x, params, Cin, Cout, stride))
        ref = jax.block_until_ready(
            _ref_forward(x, params, Cin, Cout, stride))

        assert out.shape == (N, Cout, H // stride, W // stride), out.shape
        # bf16 matmul inputs / bf16 activation DMA (f32 accumulation)
        # -> loose tolerance vs f32 reference.
        assert jnp.allclose(out, ref, rtol=5e-2, atol=5e-2), (
            f"mismatch for config {(N, Cin, Cout, H, W, stride)}: "
            f"max abs err {jnp.max(jnp.abs(out - ref))}")

    print("KERNEL_OK")
</pallas_src>

<mosaic_0001>
module attributes {stable_mosaic.version = 11 : i64} {
  func.func @_basic_block_kernel(%arg0: i32, %arg1: memref<1x16x16x128xbf16, #tpu.memory_space<vmem>>, %arg2: memref<1152x128xbf16, #tpu.memory_space<vmem>>, %arg3: memref<1x128xf32, #tpu.memory_space<vmem>>, %arg4: memref<1152x128xbf16, #tpu.memory_space<vmem>>, %arg5: memref<1x128xf32, #tpu.memory_space<vmem>>, %arg6: memref<128x128xbf16, #tpu.memory_space<vmem>>, %arg7: memref<1x128xf32, #tpu.memory_space<vmem>>, %arg8: memref<1x16x16x128xf32, #tpu.memory_space<vmem>>, %arg9: memref<18x18x128xbf16, #tpu.memory_space<vmem>>, %arg10: memref<18x18x128xbf16, #tpu.memory_space<vmem>>) attributes {dimension_semantics = [#tpu.dimension_semantics<parallel>], iteration_bounds = array<i64: 2>, scalar_prefetch = 0 : i64, scratch_operands = 2 : i64, tpu.core_type = #tpu.core_type<tc>, window_params = [{transform_indices = @transform_0, window_bounds = array<i64: 1, 16, 16, 128>}, {pipeline_mode = #tpu.pipeline_mode<synchronous>, transform_indices = @transform_1, window_bounds = array<i64: 1152, 128>}, {pipeline_mode = #tpu.pipeline_mode<synchronous>, transform_indices = @transform_2, window_bounds = array<i64: 1, 128>}, {pipeline_mode = #tpu.pipeline_mode<synchronous>, transform_indices = @transform_3, window_bounds = array<i64: 1152, 128>}, {pipeline_mode = #tpu.pipeline_mode<synchronous>, transform_indices = @transform_4, window_bounds = array<i64: 1, 128>}, {pipeline_mode = #tpu.pipeline_mode<synchronous>, transform_indices = @transform_5, window_bounds = array<i64: 128, 128>}, {pipeline_mode = #tpu.pipeline_mode<synchronous>, transform_indices = @transform_6, window_bounds = array<i64: 1, 128>}, {transform_indices = @transform_7, window_bounds = array<i64: 1, 16, 16, 128>}]} {
    %cst = arith.constant 0.000000e+00 : bf16
    %0 = vector.broadcast %cst : bf16 to vector<1x18x128xbf16>
    %c0 = arith.constant 0 : index
    %c0_0 = arith.constant 0 : index
    %c0_1 = arith.constant 0 : index
    %1 = vector.load %arg9[%c0, %c0_0, %c0_1] : memref<18x18x128xbf16, #tpu.memory_space<vmem>>, vector<1x18x128xbf16>
    tpu.vector_store %arg9[%c0, %c0_0, %c0_1], %0 {strides = array<i32>} : memref<18x18x128xbf16, #tpu.memory_space<vmem>>, vector<1x18x128xbf16>,
    %cst_2 = arith.constant 0.000000e+00 : bf16
    %2 = vector.broadcast %cst_2 : bf16 to vector<1x18x128xbf16>
    %c17 = arith.constant 17 : index
    %c0_3 = arith.constant 0 : index
    %c0_4 = arith.constant 0 : index
    %3 = vector.load %arg9[%c17, %c0_3, %c0_4] : memref<18x18x128xbf16, #tpu.memory_space<vmem>>, vector<1x18x128xbf16>
    tpu.vector_store %arg9[%c17, %c0_3, %c0_4], %2 {strides = array<i32>} : memref<18x18x128xbf16, #tpu.memory_space<vmem>>, vector<1x18x128xbf16>,
    %cst_5 = arith.constant 0.000000e+00 : bf16
    %4 = vector.broadcast %cst_5 : bf16 to vector<18x1x128xbf16>
    %c0_6 = arith.constant 0 : index
    %c0_7 = arith.constant 0 : index
    %c0_8 = arith.constant 0 : index
    %5 = vector.load %arg9[%c0_6, %c0_7, %c0_8] : memref<18x18x128xbf16, #tpu.memory_space<vmem>>, vector<18x1x128xbf16>
    tpu.vector_store %arg9[%c0_6, %c0_7, %c0_8], %4 {strides = array<i32>} : memref<18x18x128xbf16, #tpu.memory_space<vmem>>, vector<18x1x128xbf16>,
    %cst_9 = arith.constant 0.000000e+00 : bf16
    %6 = vector.broadcast %cst_9 : bf16 to vector<18x1x128xbf16>
    %c0_10 = arith.constant 0 : index
    %c17_11 = arith.constant 17 : index
    %c0_12 = arith.constant 0 : index
    %7 = vector.load %arg9[%c0_10, %c17_11, %c0_12] : memref<18x18x128xbf16, #tpu.memory_space<vmem>>, vector<18x1x128xbf16>
    tpu.vector_store %arg9[%c0_10, %c17_11, %c0_12], %6 {strides = array<i32>} : memref<18x18x128xbf16, #tpu.memory_space<vmem>>, vector<18x1x128xbf16>,
    %c0_13 = arith.constant 0 : index
    %c0_14 = arith.constant 0 : index
    %c0_15 = arith.constant 0 : index
    %c0_16 = arith.constant 0 : index
    %8 = vector.load %arg1[%c0_13, %c0_14, %c0_15, %c0_16] : memref<1x16x16x128xbf16, #tpu.memory_space<vmem>>, vector<1x16x16x128xbf16>
    %9 = vector.shape_cast %8 : vector<1x16x16x128xbf16> to vector<16x16x128xbf16>
    %c1 = arith.constant 1 : index
    %c1_17 = arith.constant 1 : index
    %c0_18 = arith.constant 0 : index
    %10 = vector.load %arg9[%c1, %c1_17, %c0_18] : memref<18x18x128xbf16, #tpu.memory_space<vmem>>, vector<16x16x128xbf16>
    tpu.vector_store %arg9[%c1, %c1_17, %c0_18], %9 {strides = array<i32>} : memref<18x18x128xbf16, #tpu.memory_space<vmem>>, vector<16x16x128xbf16>,
    %c0_19 = arith.constant 0 : index
    %c0_20 = arith.constant 0 : index
    %c0_21 = arith.constant 0 : index
    %11 = vector.load %arg9[%c0_19, %c0_20, %c0_21] : memref<18x18x128xbf16, #tpu.memory_space<vmem>>, vector<18x18x128xbf16>
    %12 = vector.extract_strided_slice %11 {offsets = [0, 0, 0], sizes = [16, 16, 128], strides = [1, 1, 1]} : vector<18x18x128xbf16> to vector<16x16x128xbf16>
    %13 = vector.shape_cast %12 : vector<16x16x128xbf16> to vector<256x128xbf16>
    %14 = vector.extract_strided_slice %11 {offsets = [0, 1, 0], sizes = [16, 16, 128], strides = [1, 1, 1]} : vector<18x18x128xbf16> to vector<16x16x128xbf16>
    %15 = vector.shape_cast %14 : vector<16x16x128xbf16> to vector<256x128xbf16>
    %16 = vector.extract_strided_slice %11 {offsets = [0, 2, 0], sizes = [16, 16, 128], strides = [1, 1, 1]} : vector<18x18x128xbf16> to vector<16x16x128xbf16>
    %17 = vector.shape_cast %16 : vector<16x16x128xbf16> to vector<256x128xbf16>
    %18 = vector.extract_strided_slice %11 {offsets = [1, 0, 0], sizes = [16, 16, 128], strides = [1, 1, 1]} : vector<18x18x128xbf16> to vector<16x16x128xbf16>
    %19 = vector.shape_cast %18 : vector<16x16x128xbf16> to vector<256x128xbf16>
    %20 = vector.extract_strided_slice %11 {offsets = [1, 1, 0], sizes = [16, 16, 128], strides = [1, 1, 1]} : vector<18x18x128xbf16> to vector<16x16x128xbf16>
    %21 = vector.shape_cast %20 : vector<16x16x128xbf16> to vector<256x128xbf16>
    %22 = vector.extract_strided_slice %11 {offsets = [1, 2, 0], sizes = [16, 16, 128], strides = [1, 1, 1]} : vector<18x18x128xbf16> to vector<16x16x128xbf16>
    %23 = vector.shape_cast %22 : vector<16x16x128xbf16> to vector<256x128xbf16>
    %24 = vector.extract_strided_slice %11 {offsets = [2, 0, 0], sizes = [16, 16, 128], strides = [1, 1, 1]} : vector<18x18x128xbf16> to vector<16x16x128xbf16>
    %25 = vector.shape_cast %24 : vector<16x16x128xbf16> to vector<256x128xbf16>
    %26 = vector.extract_strided_slice %11 {offsets = [2, 1, 0], sizes = [16, 16, 128], strides = [1, 1, 1]} : vector<18x18x128xbf16> to vector<16x16x128xbf16>
    %27 = vector.shape_cast %26 : vector<16x16x128xbf16> to vector<256x128xbf16>
    %28 = vector.extract_strided_slice %11 {offsets = [2, 2, 0], sizes = [16, 16, 128], strides = [1, 1, 1]} : vector<18x18x128xbf16> to vector<16x16x128xbf16>
    %29 = vector.shape_cast %28 : vector<16x16x128xbf16> to vector<256x128xbf16>
    %30 = tpu.concatenate %13, %15, %17, %19, %21, %23, %25, %27, %29 in 1 : vector<256x128xbf16>, vector<256x128xbf16>, vector<256x128xbf16>, vector<256x128xbf16>, vector<256x128xbf16>, vector<256x128xbf16>, vector<256x128xbf16>, vector<256x128xbf16>, vector<256x128xbf16> -> vector<256x1152xbf16>
    %c0_22 = arith.constant 0 : index
    %c0_23 = arith.constant 0 : index
    %31 = vector.load %arg2[%c0_22, %c0_23] : memref<1152x128xbf16, #tpu.memory_space<vmem>>, vector<1152x128xbf16>
    %cst_24 = arith.constant dense<0.000000e+00> : vector<256x128xf32>
    %32 = tpu.matmul %30, %31, %cst_24 {dimension_numbers = #tpu.dot_dimension_numbers<[1], [0], [0], [1], [0, 0, 1, 1], [], []>} : vector<256x1152xbf16>, vector<1152x128xbf16>, vector<256x128xf32> -> vector<256x128xf32>
    %c0_25 = arith.constant 0 : index
    %c0_26 = arith.constant 0 : index
    %33 = vector.load %arg3[%c0_25, %c0_26] : memref<1x128xf32, #tpu.memory_space<vmem>>, vector<1x128xf32>
    %34 = vector.broadcast %33 : vector<1x128xf32> to vector<256x128xf32>
    %35 = arith.addf %32, %34 : vector<256x128xf32>
    %cst_27 = arith.constant 0.000000e+00 : f32
    %36 = vector.broadcast %cst_27 : f32 to vector<256x128xf32>
    %37 = arith.maximumf %35, %36 : vector<256x128xf32>
    %cst_28 = arith.constant 0.000000e+00 : bf16
    %38 = vector.broadcast %cst_28 : bf16 to vector<1x18x128xbf16>
    %c0_29 = arith.constant 0 : index
    %c0_30 = arith.constant 0 : index
    %c0_31 = arith.constant 0 : index
    %39 = vector.load %arg10[%c0_29, %c0_30, %c0_31] : memref<18x18x128xbf16, #tpu.memory_space<vmem>>, vector<1x18x128xbf16>
    tpu.vector_store %arg10[%c0_29, %c0_30, %c0_31], %38 {strides = array<i32>} : memref<18x18x128xbf16, #tpu.memory_space<vmem>>, vector<1x18x128xbf16>,
    %cst_32 = arith.constant 0.000000e+00 : bf16
    %40 = vector.broadcast %cst_32 : bf16 to vector<1x18x128xbf16>
    %c17_33 = arith.constant 17 : index
    %c0_34 = arith.constant 0 : index
    %c0_35 = arith.constant 0 : index
    %41 = vector.load %arg10[%c17_33, %c0_34, %c0_35] : memref<18x18x128xbf16, #tpu.memory_space<vmem>>, vector<1x18x128xbf16>
    tpu.vector_store %arg10[%c17_33, %c0_34, %c0_35], %40 {strides = array<i32>} : memref<18x18x128xbf16, #tpu.memory_space<vmem>>, vector<1x18x128xbf16>,
    %cst_36 = arith.constant 0.000000e+00 : bf16
    %42 = vector.broadcast %cst_36 : bf16 to vector<18x1x128xbf16>
    %c0_37 = arith.constant 0 : index
    %c0_38 = arith.constant 0 : index
    %c0_39 = arith.constant 0 : index
    %43 = vector.load %arg10[%c0_37, %c0_38, %c0_39] : memref<18x18x128xbf16, #tpu.memory_space<vmem>>, vector<18x1x128xbf16>
    tpu.vector_store %arg10[%c0_37, %c0_38, %c0_39], %42 {strides = array<i32>} : memref<18x18x128xbf16, #tpu.memory_space<vmem>>, vector<18x1x128xbf16>,
    %cst_40 = arith.constant 0.000000e+00 : bf16
    %44 = vector.broadcast %cst_40 : bf16 to vector<18x1x128xbf16>
    %c0_41 = arith.constant 0 : index
    %c17_42 = arith.constant 17 : index
    %c0_43 = arith.constant 0 : index
    %45 = vector.load %arg10[%c0_41, %c17_42, %c0_43] : memref<18x18x128xbf16, #tpu.memory_space<vmem>>, vector<18x1x128xbf16>
    tpu.vector_store %arg10[%c0_41, %c17_42, %c0_43], %44 {strides = array<i32>} : memref<18x18x128xbf16, #tpu.memory_space<vmem>>, vector<18x1x128xbf16>,
    %46 = vector.shape_cast %37 : vector<256x128xf32> to vector<16x16x128xf32>
    %47 = arith.truncf %46 : vector<16x16x128xf32> to vector<16x16x128xbf16>
    %c1_44 = arith.constant 1 : index
    %c1_45 = arith.constant 1 : index
    %c0_46 = arith.constant 0 : index
    %48 = vector.load %arg10[%c1_44, %c1_45, %c0_46] : memref<18x18x128xbf16, #tpu.memory_space<vmem>>, vector<16x16x128xbf16>
    tpu.vector_store %arg10[%c1_44, %c1_45, %c0_46], %47 {strides = array<i32>} : memref<18x18x128xbf16, #tpu.memory_space<vmem>>, vector<16x16x128xbf16>,
    %c0_47 = arith.constant 0 : index
    %c0_48 = arith.constant 0 : index
    %c0_49 = arith.constant 0 : index
    %49 = vector.load %arg10[%c0_47, %c0_48, %c0_49] : memref<18x18x128xbf16, #tpu.memory_space<vmem>>, vector<18x18x128xbf16>
    %50 = vector.extract_strided_slice %49 {offsets = [0, 0, 0], sizes = [16, 16, 128], strides = [1, 1, 1]} : vector<18x18x128xbf16> to vector<16x16x128xbf16>
    %51 = vector.shape_cast %50 : vector<16x16x128xbf16> to vector<256x128xbf16>
    %52 = vector.extract_strided_slice %49 {offsets = [0, 1, 0], sizes = [16, 16, 128], strides = [1, 1, 1]} : vector<18x18x128xbf16> to vector<16x16x128xbf16>
    %53 = vector.shape_cast %52 : vector<16x16x128xbf16> to vector<256x128xbf16>
    %54 = vector.extract_strided_slice %49 {offsets = [0, 2, 0], sizes = [16, 16, 128], strides = [1, 1, 1]} : vector<18x18x128xbf16> to vector<16x16x128xbf16>
    %55 = vector.shape_cast %54 : vector<16x16x128xbf16> to vector<256x128xbf16>
    %56 = vector.extract_strided_slice %49 {offsets = [1, 0, 0], sizes = [16, 16, 128], strides = [1, 1, 1]} : vector<18x18x128xbf16> to vector<16x16x128xbf16>
    %57 = vector.shape_cast %56 : vector<16x16x128xbf16> to vector<256x128xbf16>
    %58 = vector.extract_strided_slice %49 {offsets = [1, 1, 0], sizes = [16, 16, 128], strides = [1, 1, 1]} : vector<18x18x128xbf16> to vector<16x16x128xbf16>
    %59 = vector.shape_cast %58 : vector<16x16x128xbf16> to vector<256x128xbf16>
    %60 = vector.extract_strided_slice %49 {offsets = [1, 2, 0], sizes = [16, 16, 128], strides = [1, 1, 1]} : vector<18x18x128xbf16> to vector<16x16x128xbf16>
    %61 = vector.shape_cast %60 : vector<16x16x128xbf16> to vector<256x128xbf16>
    %62 = vector.extract_strided_slice %49 {offsets = [2, 0, 0], sizes = [16, 16, 128], strides = [1, 1, 1]} : vector<18x18x128xbf16> to vector<16x16x128xbf16>
    %63 = vector.shape_cast %62 : vector<16x16x128xbf16> to vector<256x128xbf16>
    %64 = vector.extract_strided_slice %49 {offsets = [2, 1, 0], sizes = [16, 16, 128], strides = [1, 1, 1]} : vector<18x18x128xbf16> to vector<16x16x128xbf16>
    %65 = vector.shape_cast %64 : vector<16x16x128xbf16> to vector<256x128xbf16>
    %66 = vector.extract_strided_slice %49 {offsets = [2, 2, 0], sizes = [16, 16, 128], strides = [1, 1, 1]} : vector<18x18x128xbf16> to vector<16x16x128xbf16>
    %67 = vector.shape_cast %66 : vector<16x16x128xbf16> to vector<256x128xbf16>
    %68 = tpu.concatenate %51, %53, %55, %57, %59, %61, %63, %65, %67 in 1 : vector<256x128xbf16>, vector<256x128xbf16>, vector<256x128xbf16>, vector<256x128xbf16>, vector<256x128xbf16>, vector<256x128xbf16>, vector<256x128xbf16>, vector<256x128xbf16>, vector<256x128xbf16> -> vector<256x1152xbf16>
    %c0_50 = arith.constant 0 : index
    %c0_51 = arith.constant 0 : index
    %69 = vector.load %arg4[%c0_50, %c0_51] : memref<1152x128xbf16, #tpu.memory_space<vmem>>, vector<1152x128xbf16>
    %cst_52 = arith.constant dense<0.000000e+00> : vector<256x128xf32>
    %70 = tpu.matmul %68, %69, %cst_52 {dimension_numbers = #tpu.dot_dimension_numbers<[1], [0], [0], [1], [0, 0, 1, 1], [], []>} : vector<256x1152xbf16>, vector<1152x128xbf16>, vector<256x128xf32> -> vector<256x128xf32>
    %c0_53 = arith.constant 0 : index
    %c0_54 = arith.constant 0 : index
    %71 = vector.load %arg5[%c0_53, %c0_54] : memref<1x128xf32, #tpu.memory_space<vmem>>, vector<1x128xf32>
    %72 = vector.broadcast %71 : vector<1x128xf32> to vector<256x128xf32>
    %73 = arith.addf %70, %72 : vector<256x128xf32>
    %c0_55 = arith.constant 0 : index
    %c0_56 = arith.constant 0 : index
    %c0_57 = arith.constant 0 : index
    %c0_58 = arith.constant 0 : index
    %74 = vector.load %arg1[%c0_55, %c0_56, %c0_57, %c0_58] : memref<1x16x16x128xbf16, #tpu.memory_space<vmem>>, vector<1x16x16x128xbf16>
    %75 = vector.shape_cast %74 : vector<1x16x16x128xbf16> to vector<16x16x128xbf16>
    %76 = vector.shape_cast %75 : vector<16x16x128xbf16> to vector<256x128xbf16>
    %c0_59 = arith.constant 0 : index
    %c0_60 = arith.constant 0 : index
    %77 = vector.load %arg6[%c0_59, %c0_60] : memref<128x128xbf16, #tpu.memory_space<vmem>>, vector<128x128xbf16>
    %cst_61 = arith.constant dense<0.000000e+00> : vector<256x128xf32>
    %78 = tpu.matmul %76, %77, %cst_61 {dimension_numbers = #tpu.dot_dimension_numbers<[1], [0], [0], [1], [0, 0, 1, 1], [], []>} : vector<256x128xbf16>, vector<128x128xbf16>, vector<256x128xf32> -> vector<256x128xf32>
    %79 = arith.addf %73, %78 : vector<256x128xf32>
    %c0_62 = arith.constant 0 : index
    %c0_63 = arith.constant 0 : index
    %80 = vector.load %arg7[%c0_62, %c0_63] : memref<1x128xf32, #tpu.memory_space<vmem>>, vector<1x128xf32>
    %81 = vector.broadcast %80 : vector<1x128xf32> to vector<256x128xf32>
    %82 = arith.addf %79, %81 : vector<256x128xf32>
    %cst_64 = arith.constant 0.000000e+00 : f32
    %83 = vector.broadcast %cst_64 : f32 to vector<256x128xf32>
    %84 = arith.maximumf %82, %83 : vector<256x128xf32>
    %85 = vector.shape_cast %84 : vector<256x128xf32> to vector<16x16x128xf32>
    %c0_65 = arith.constant 0 : index
    %c0_66 = arith.constant 0 : index
    %c0_67 = arith.constant 0 : index
    %c0_68 = arith.constant 0 : index
    %86 = vector.load %arg8[%c0_65, %c0_66, %c0_67, %c0_68] : memref<1x16x16x128xf32, #tpu.memory_space<vmem>>, vector<1x16x16x128xf32>
    %87 = vector.shape_cast %86 : vector<1x16x16x128xf32> to vector<16x16x128xf32>
    %88 = vector.shape_cast %85 : vector<16x16x128xf32> to vector<1x16x16x128xf32>
    tpu.vector_store %arg8[%c0_65, %c0_66, %c0_67, %c0_68], %88 {strides = array<i32>} : memref<1x16x16x128xf32, #tpu.memory_space<vmem>>, vector<1x16x16x128xf32>,
    return
  }
  func.func @transform_0(%arg0: i32) -> (i32, i32, i32, i32) {
    %c0_i32 = arith.constant 0 : i32
    %c0_i32_0 = arith.constant 0 : i32
    %c0_i32_1 = arith.constant 0 : i32
    %c0_i32_2 = arith.constant 0 : i32
    return %arg0, %c0_i32, %c0_i32_0, %c0_i32_1 : i32, i32, i32, i32
  }
  func.func @transform_1(%arg0: i32) -> (i32, i32) {
    %c0_i32 = arith.constant 0 : i32
    %c0_i32_0 = arith.constant 0 : i32
    %c0_i32_1 = arith.constant 0 : i32
    return %c0_i32, %c0_i32_0 : i32, i32
  }
  func.func @transform_2(%arg0: i32) -> (i32, i32) {
    %c0_i32 = arith.constant 0 : i32
    %c0_i32_0 = arith.constant 0 : i32
    %c0_i32_1 = arith.constant 0 : i32
    return %c0_i32, %c0_i32_0 : i32, i32
  }
  func.func @transform_3(%arg0: i32) -> (i32, i32) {
    %c0_i32 = arith.constant 0 : i32
    %c0_i32_0 = arith.constant 0 : i32
    %c0_i32_1 = arith.constant 0 : i32
    return %c0_i32, %c0_i32_0 : i32, i32
  }
  func.func @transform_4(%arg0: i32) -> (i32, i32) {
    %c0_i32 = arith.constant 0 : i32
    %c0_i32_0 = arith.constant 0 : i32
    %c0_i32_1 = arith.constant 0 : i32
    return %c0_i32, %c0_i32_0 : i32, i32
  }
  func.func @transform_5(%arg0: i32) -> (i32, i32) {
    %c0_i32 = arith.constant 0 : i32
    %c0_i32_0 = arith.constant 0 : i32
    %c0_i32_1 = arith.constant 0 : i32
    return %c0_i32, %c0_i32_0 : i32, i32
  }
  func.func @transform_6(%arg0: i32) -> (i32, i32) {
    %c0_i32 = arith.constant 0 : i32
    %c0_i32_0 = arith.constant 0 : i32
    %c0_i32_1 = arith.constant 0 : i32
    return %c0_i32, %c0_i32_0 : i32, i32
  }
  func.func @transform_7(%arg0: i32) -> (i32, i32, i32, i32) {
    %c0_i32 = arith.constant 0 : i32
    %c0_i32_0 = arith.constant 0 : i32
    %c0_i32_1 = arith.constant 0 : i32
    %c0_i32_2 = arith.constant 0 : i32
    return %arg0, %c0_i32, %c0_i32_0, %c0_i32_1 : i32, i32, i32, i32
  }
}

</mosaic_0001>

<bundles_post_ra>
// kernel: basic_block_forward.1
= control target key start
LH: loop header
LB: loop body
LE: loop exit
PB: predicated region body
PF: predicated region fallthrough
CT: control target
= control target key end

     0   :  { %s8431_s24 = smov 0   ;;  %s11591_s0 = inlined_call_operand.vmem [shape: bf16[2,16,16,128], index: 0, kind: input, shape index: {}]   ;;  %s11592_s1 = inlined_call_operand.vmem [shape: bf16[1152,128], index: 1, kind: input, shape index: {}]   ;;  %s11593_s2 = inlined_call_operand.vmem [shape: f32[1,128], index: 2, kind: input, shape index: {}]   ;;  %s11594_s3 = inlined_call_operand.vmem [shape: bf16[1152,128], index: 3, kind: input, shape index: {}]   ;;  %s11595_s4 = inlined_call_operand.vmem [shape: f32[1,128], index: 4, kind: input, shape index: {}]   ;;  %s11596_s5 = inlined_call_operand.vmem [shape: bf16[128,128], index: 5, kind: input, shape index: {}]   ;;  %s11597_s6 = inlined_call_operand.vmem [shape: f32[1,128], index: 6, kind: input, shape index: {}]   ;;  %s11598_s7 = inlined_call_operand.vmem [shape: f32[2,16,16,128], index: 7, kind: output, shape index: {}]  }
   0x1 LB: > { %s6634_s25 = sadd.s32 4294967295, %s8388_s24   ;;  %p6638_p0 = scmp.ge.s32.totalorder %s8388_s24, 1  ;;  %s8388_s24 = sphi %s8431_s24, %s17_s24  }
   0x2   : > { %p237_p1 = scmp.lt.s32.totalorder %s8388_s24, 3 }
   0x4   : > { %p238_p2 = pnand %p6638_p0, %p237_p1 }
   0x6   : > { %241 = sbr.rel (%p238_p2) target bundleno = 1129 (0x469), region = 48 }
   0xb   : > { %v8163_v0 = vld [vmem:[%s11592_s1 + $0x78] sm:$0xff]   ;;  %v8390_v2 = vmov 0   ;;  %v8165_v3 = vld [vmem:[%s11592_s1 + $0x70] sm:$0xff]   ;;  %v8167_v5 = vld [vmem:[%s11592_s1 + $0x68] sm:$0xff]   ;;  %p269_p3 = scmp.lt.s32.totalorder %s6634_s25, 1  ;;  %vm287_vm0 = vcmask 1040384  }
   0xc   : > { %v8164_v1 = vld [vmem:[%s11592_s1 + $0x38] sm:$0xff]   ;;  %280 = vst [vmem:[#allocation2] sm:$0xf] %v8390_v2  ;;  %281 = vst [vmem:[#allocation2 + $0x4] sm:$0xf] %v8390_v2  ;;  %7026 = vmatprep.subr.bf16.mxu0 %v8163_v0  ;;  %8138 = vmatprep.subr.bf16.mxu1 %v8163_v0  ;;  %v8166_v4 = vld [vmem:[%s11592_s1 + $0x30] sm:$0xff]  }
   0xd   : > { %282 = vst [vmem:[#allocation2 + $0x8] sm:$0x1] %v8390_v2  ;;  %284 = vst [vmem:[#allocation2 + $0xcc] sm:$0xf] %v8390_v2  ;;  %7027 = vmatpush3.bf16.msra.mxu0 %v8164_v1  ;;  %8146 = vmatpush3.bf16.msra.mxu1 %v8164_v1  ;;  %v8168_v6 = vld [vmem:[%s11592_s1 + $0x28] sm:$0xff]   ;;  %v8169_v7 = vld [vmem:[%s11592_s1 + $0x60] sm:$0xff]  }
   0xe   : > { %285 = vst [vmem:[#allocation2 + $0xd0] sm:$0xf] %v8390_v2  ;;  %286 = vst [vmem:[#allocation2 + $0xd4] sm:$0x1] %v8390_v2  ;;  %7028 = vmatprep.subr.bf16.mxu0 %v8165_v3  ;;  %8139 = vmatprep.subr.bf16.mxu1 %v8165_v3  ;;  %s11793_s25 = smov (!%p269_p3, %s6634_s25), 1  ;;  %v8170_v8 = vld [vmem:[%s11592_s1 + $0x20] sm:$0xff]  }
   0xf   : > { %3177 = vst [vmem:[#allocation3] sm:$0xf] %v8390_v2  ;;  %3178 = vst [vmem:[#allocation3 + $0x4] sm:$0xf] %v8390_v2  ;;  %v8171_v9 = vld [vmem:[%s11592_s1 + $0x58] sm:$0xff]   ;;  %s6992_s23 = sshll.u32 %s11793_s25, 7 }
  0x10   : > { %3179 = vst [vmem:[#allocation3 + $0x8] sm:$0x1] %v8390_v2  ;;  %3181 = vst [vmem:[#allocation3 + $0xcc] sm:$0xf] %v8390_v2  ;;  %v8172_v10 = vld [vmem:[%s11592_s1 + $0x18] sm:$0xff]   ;;  %v8173_v11 = vld [vmem:[%s11592_s1 + $0x50] sm:$0xff]   ;;  %s8490_s30 = scalar_lea.vmem %s11591_s0, %s6992_s23 }
  0x11   : > { %3182 = vst [vmem:[#allocation3 + $0xd0] sm:$0xf] %v8390_v2  ;;  %3183 = vst [vmem:[#allocation3 + $0xd4] sm:$0x1] %v8390_v2  ;;  %7029 = vmatpush3.bf16.msra.mxu0 %v8166_v4  ;;  %8147 = vmatpush3.bf16.msra.mxu1 %v8166_v4  ;;  %vm288_vm1 = vsmask.f32 256 }
  0x12   : > { %7030 = vmatprep.subr.bf16.mxu0 %v8167_v5  ;;  %8140 = vmatprep.subr.bf16.mxu1 %v8167_v5  ;;  %vm344_vm2 = vsmask.f32 7938  ;;  %vm8481_vm3 = vmand %vm287_vm0, %vm288_vm1  ;;  %vm1358_vm4 = vcmask 1042432   ;;  %vm755_vm5 = vcmask 1043456   ;;  %v8174_v16 = vld [vmem:[%s11592_s1 + $0x10] sm:$0xff]   ;;  %v8175_v21 = vld [vmem:[%s11592_s1 + $0x48] sm:$0xff]  }
  0x13   : > { %v290_v12 = vld [vmem:[#allocation2] sm:$0x1]  ;;  %v8485_v15 = vld [vmem:[#allocation2 + $0x4] sm:$0xf]  ;;  %vm8499_vm6 = vmand %vm287_vm0, %vm344_vm2  ;;  %vm923_vm7 = vsmask.f32 3328 }
  0x14   : > { %v346_v14 = vld [vmem:[#allocation2 + $0x8] sm:$0x1]  ;;  %v291_v17 = vsel %vm8481_vm3, 0, %v290_v12  ;;  %vm924_vm8 = vsmask.f32 7440  ;;  %v936_v19 = vshll.u32 %v8485_v15, 16  ;;  %vm8528_vm11 = vmand %vm755_vm5, %vm344_vm2 }
  0x15   : > { %7031 = vmatpush3.bf16.msra.mxu0 %v8168_v6  ;;  %8148 = vmatpush3.bf16.msra.mxu1 %v8168_v6  ;;  %v940_v20 = vshrl.u32 %v8485_v15, 16  ;;  %292 = vst [vmem:[#allocation2] sm:$0x1] %v291_v17  ;;  %v347_v22 = vsel %vm8499_vm6, 0, %v346_v14  ;;  %v326_v23 = vld [vmem:[#allocation2 + $0x90] sm:$0x1]  ;;  %vm8562_vm14 = vmor %vm923_vm7, %vm924_vm8 }
  0x16   : > { %7032 = vmatprep.subr.bf16.mxu0 %v8169_v7  ;;  %8141 = vmatprep.subr.bf16.mxu1 %v8169_v7  ;;  %v382_v24 = vld [vmem:[#allocation2 + $0x98] sm:$0x1]  ;;  %348 = vst [vmem:[#allocation2 + $0x8] sm:$0x1] %v347_v22  ;;  %v8510_v25 = vrot.slane %v936_v19, 5  ;;  %v327_v27 = vsel %vm8481_vm3, 0, %v326_v23 }
  0x17   : > { %v942_v26 = vrot.slane %v940_v20, 4  ;;  %v383_v28 = vsel %vm8499_vm6, 0, %v382_v24  ;;  %v422_v29 = vld [vmem:[%s8490_s30 + $0x58] sm:$0xf]  ;;  %v1363_v30 = vrot.slane %v8485_v15, 5  ;;  %v8176_v33 = vld [vmem:[%s11592_s1 + $0x8] sm:$0xff]  }
  0x18   : > { %328 = vst [vmem:[#allocation2 + $0x90] sm:$0x1] %v327_v27  ;;  %384 = vst [vmem:[#allocation2 + $0x98] sm:$0x1] %v383_v28  ;;  %v423_v31 = vld [vmem:[%s8490_s30 + $0x5c] sm:$0xf] }
  0x19   : > { %7033 = vmatpush3.bf16.msra.mxu0 %v8170_v8  ;;  %8149 = vmatpush3.bf16.msra.mxu1 %v8170_v8  ;;  %vm432_vm9 = vsmask.f32 4368  ;;  %v622_v32 = vshrl.u32 %v422_v29, 16  ;;  %v625_v34 = vshll.u32 %v422_v29, 16  ;;  %v630_v35 = vshrl.u32 %v423_v31, 16  ;;  %v8177_v37 = vld [vmem:[%s11592_s1 + $0x40] sm:$0xff]  }
  0x1a   : > { %7034 = vmatprep.subr.bf16.mxu0 %v8171_v9  ;;  %8142 = vmatprep.subr.bf16.mxu1 %v8171_v9  ;;  %v633_v36 = vshll.u32 %v423_v31, 16  ;;  %v943_v38 = vor.u32 %v942_v26, %v8510_v25  ;;  %vm1359_vm10 = vcmask 1046532   ;;  %v11662_v41 = vmov 0  ;;  %v8178_v42 = vld [vmem:[%s11592_s1] sm:$0xff]   ;;  %vm8537_vm12 = vmor %vm288_vm1, %vm432_vm9  ;;  %v8181_v50 = vld [vmem:[%s11592_s1 + $0xf8] sm:$0xff]   ;;  %s6993_s21 = sshll.u32 %s11793_s25, 8 }
  0x1b   : > { %v624_v39 = vrot.slane %v622_v32, 7  ;;  %v632_v40 = vrot.slane %v630_v35, 7  ;;  %v11663_v41 = vsel %vm8528_vm11, 4294967295, %v11662_v41  ;;  %v1365_v43 = vrot.slane %v1363_v30, 4  ;;  %v8182_v51 = vld [vmem:[%s11592_s1 + $0x178] sm:$0xff]   ;;  %vm8553_vm13 = vmor %vm1358_vm4, %vm1359_vm10  ;;  %v8336_v13 = vld [vmem:[%s11594_s3 + $0x230] sm:$0xff]   ;;  %s11486_s26 = scalar_lea.vmem %s11598_s7, %s6993_s21 }
  0x1c   : > { %11664 = vst [vmem:[#allocation4_spill] sm:$0xff] %v11663_v41  ;;  %v11665_v44 = vmov 0  ;;  %v8541_v47 = vld [vmem:[#allocation2] sm:$0xf]  ;;  %v944_v55 = vrot.slane %v943_v38, 4  ;;  %v11668_v56 = vmov 0 }
  0x1d   : > { %7035 = vmatpush3.bf16.msra.mxu0 %v8172_v10  ;;  %8150 = vmatpush3.bf16.msra.mxu1 %v8172_v10  ;;  %v11666_v44 = vsel %vm8537_vm12, 4294967295, %v11665_v44  ;;  %v627_v45 = vor.u32 %v625_v34, %v624_v39  ;;  %v628_v46 = vrot.slane %v624_v39, 4  ;;  %v635_v48 = vor.u32 %v633_v36, %v632_v40  ;;  %v871_v52 = vld [vmem:[#allocation2 + $0x8] sm:$0x1]  ;;  %v293_v8 = vld [vmem:[#allocation2 + $0xc] sm:$0x1] }
  0x1e   : > { %7036 = vmatprep.subr.bf16.mxu0 %v8173_v11  ;;  %8143 = vmatprep.subr.bf16.mxu1 %v8173_v11  ;;  %11667 = vst [vmem:[#allocation5_spill] sm:$0xff] %v11666_v44  ;;  %v637_v49 = vrot.slane %v632_v40, 4  ;;  %v927_v53 = vshrl.u32 %v8541_v47, 16  ;;  %v930_v54 = vshll.u32 %v8541_v47, 16  ;;  %v11669_v56 = vsel %vm8553_vm13, 4294967295, %v11668_v56  ;;  %v8184_v32 = vld [vmem:[%s11592_s1 + $0x138] sm:$0xff]  }
  0x1f   : > { %11670 = vst [vmem:[#allocation6_spill] sm:$0xff] %v11669_v56  ;;  %v6643_v57 = vrot.slane %v8541_v47, 9  ;;  %v946_v58 = vshll.u32 %v871_v52, 16  ;;  %v1366_v59 = vrot.slane %v871_v52, 5  ;;  %v636_v60 = vsel %vm8537_vm12, %v628_v46, %v635_v48  ;;  %v834_v61 = vld [vmem:[#allocation2 + $0x90] sm:$0xf] }
  0x20   : > { %v838_v62 = vld [vmem:[#allocation2 + $0x98] sm:$0x1]  ;;  %v11671_v63 = vmov 0  ;;  %v929_v0 = vrot.slane %v927_v53, 4  ;;  %v932_v1 = vrot.slane %v930_v54, 5  ;;  %v835_v2 = vsel %vm8528_vm11, %v627_v45, %v834_v61  ;;  %v8339_v18 = vld [vmem:[%s11596_s5 + $0x28] sm:$0xff]  }
  0x21   : > { %7037 = vmatpush3.bf16.msra.mxu0 %v8174_v16  ;;  %8151 = vmatpush3.bf16.msra.mxu1 %v8174_v16  ;;  %v11672_v63 = vsel %vm8562_vm14, 4294967295, %v11671_v63  ;;  %837 = vst [vmem:[#allocation2 + $0x94] sm:$0xf] %v636_v60  ;;  %v839_v3 = vsel %vm8481_vm3, %v637_v49, %v838_v62  ;;  %v948_v4 = vrot.slane %v946_v58, 5  ;;  %v8572_v5 = vsel %vm8553_vm13, %v1365_v43, %v1366_v59  ;;  %v349_v9 = vld [vmem:[#allocation2 + $0x14] sm:$0x1] }
  0x22   : > { %7038 = vmatprep.subr.bf16.mxu0 %v8175_v21  ;;  %8144 = vmatprep.subr.bf16.mxu1 %v8175_v21  ;;  %11673 = vst [vmem:[#allocation7_spill] sm:$0xff] %v11672_v63  ;;  %836 = vst [vmem:[#allocation2 + $0x90] sm:$0xf] %v835_v2  ;;  %v8576_v6 = vsel %vm8553_vm13, %v6643_v57, %v1363_v30  ;;  %v933_v7 = vor.u32 %v932_v1, %v929_v0  ;;  %v400_v10 = vld [vmem:[%s8490_s30] sm:$0xf]  ;;  %v294_v14 = vsel %vm8481_vm3, 0, %v293_v8 }
  0x23   : > { %840 = vst [vmem:[#allocation2 + $0x98] sm:$0x1] %v839_v3  ;;  %v6693_v11 = vcombine.low %v8576_v6, %v8572_v5  ;;  %v949_v12 = vsel %vm8562_vm14, %v944_v55, %v948_v4  ;;  %v350_v16 = vsel %vm8499_vm6, 0, %v349_v9  ;;  %v401_v17 = vld [vmem:[%s8490_s30 + $0x4] sm:$0xf]  ;;  %v435_v19 = vshrl.u32 %v400_v10, 16 }
  0x24   : > { %v934_v20 = vrot.slane %v933_v7, 4  ;;  %295 = vst [vmem:[#allocation2 + $0xc] sm:$0x1] %v294_v14  ;;  %351 = vst [vmem:[#allocation2 + $0x14] sm:$0x1] %v350_v16  ;;  %v438_v21 = vshll.u32 %v400_v10, 16  ;;  %v6661_v26 = vcombine.low %v8541_v47, %v8485_v15 }
  0x25   : > { %7039 = vmatpush3.bf16.msra.mxu0 %v8176_v33  ;;  %8152 = vmatpush3.bf16.msra.mxu1 %v8176_v33  ;;  %v443_v22 = vshrl.u32 %v401_v17, 16  ;;  %v446_v23 = vshll.u32 %v401_v17, 16  ;;  %v329_v24 = vld [vmem:[#allocation2 + $0x9c] sm:$0x1]  ;;  %v437_v27 = vrot.slane %v435_v19, 7  ;;  %v8194_v10 = vld [vmem:[%s11592_s1 + $0x130] sm:$0xff]  }
  0x26   : > { %7040 = vmatprep.subr.bf16.mxu0 %v8177_v37  ;;  %8145 = vmatprep.subr.bf16.mxu1 %v8177_v37  ;;  %v330_v28 = vsel %vm8481_vm3, 0, %v329_v24  ;;  %v385_v29 = vld [vmem:[#allocation2 + $0xa4] sm:$0x1]  ;;  %v424_v30 = vld [vmem:[%s8490_s30 + $0x60] sm:$0xf]  ;;  %v939_v31 = vsel %vm8562_vm14, %v934_v20, %v8510_v25  ;;  %v8231_v5 = vld [vmem:[%s11592_s1 + $0x1b0] sm:$0xff]  }
  0x27   : > { %v445_v33 = vrot.slane %v443_v22, 7  ;;  %331 = vst [vmem:[#allocation2 + $0x9c] sm:$0x1] %v330_v28  ;;  %v386_v34 = vsel %vm8499_vm6, 0, %v385_v29  ;;  %v639_v15 = vshrl.u32 %v424_v30, 16  ;;  %v6677_v35 = vcombine.low %v939_v31, %v949_v12  ;;  %v8183_v28 = vld [vmem:[%s11592_s1 + $0xb8] sm:$0xff]  }
  0x28   : > { %v906_v36 = vld [vmem:[#allocation2 + $0x94] sm:$0xf]  ;;  %v441_v37 = vrot.slane %v437_v27, 4  ;;  %387 = vst [vmem:[#allocation2 + $0xa4] sm:$0x1] %v386_v34  ;;  %v642_v39 = vshll.u32 %v424_v30, 16  ;;  %v440_v45 = vor.u32 %v438_v21, %v437_v27 }
  0x29   : > { %7041 = vmatpush3.bf16.msra.mxu0 %v8178_v42  ;;  %8153 = vmatpush3.bf16.msra.mxu1 %v8178_v42  ;;  %v425_v38 = vld [vmem:[%s8490_s30 + $0x64] sm:$0xf]  ;;  %v905_v40 = vld [vmem:[#allocation2 + $0x90] sm:$0xf]  ;;  %v1224_v43 = vshll.u32 %v906_v36, 16  ;;  %v1228_v25 = vshrl.u32 %v906_v36, 16  ;;  %v448_v46 = vor.u32 %v446_v23, %v445_v33 }
  0x2a   : > { %7138 = vmatprep.subr.bf16.mxu1 %v8181_v50  ;;  %7250 = vmatprep.subr.bf16.mxu0 %v8182_v51  ;;  %v907_v42 = vld [vmem:[#allocation2 + $0x98] sm:$0x1]  ;;  %v1215_v47 = vshrl.u32 %v905_v40, 16  ;;  %v1218_v48 = vshll.u32 %v905_v40, 16  ;;  %v8192_v50 = vld [vmem:[%s11592_s1 + $0x170] sm:$0xff]   ;;  %v450_v54 = vrot.slane %v445_v33, 4  ;;  %v8620_v24 = vcombine.low %v905_v40, %v906_v36 }
  0x2b   : > { %2372 = vmatprep.mubr.bf16.mxu0 %v6677_v35  ;;  %v1234_v49 = vshll.u32 %v907_v42, 16  ;;  %v1226_v51 = vrot.slane %v1224_v43, 5  ;;  %v1230_v52 = vrot.slane %v1228_v25, 4  ;;  %v449_v53 = vsel %vm8537_vm12, %v441_v37, %v448_v46  ;;  %v757_v59 = vld [vmem:[#allocation2 + $0xc] sm:$0xf]  ;;  %v8185_v34 = vld [vmem:[%s11592_s1 + $0xf0] sm:$0xff]  }
  0x2c   : > { %2373 = vmatmul.mubr.bf16.vlgmr.msra.gmra.mxu0 %v6661_v26  ;;  %v1217_v55 = vrot.slane %v1215_v47, 4  ;;  %v1220_v57 = vrot.slane %v1218_v48, 5  ;;  %760 = vst [vmem:[#allocation2 + $0x10] sm:$0xf] %v449_v53  ;;  %v641_v60 = vrot.slane %v639_v15, 7  ;;  %v758_v62 = vsel %vm8528_vm11, %v440_v45, %v757_v59  ;;  %11674 = vst [vmem:[#allocation8_spill] sm:$0xff] %v8620_v24 }
  0x2d   : > { %v1236_v58 = vrot.slane %v1234_v49, 5  ;;  %7251 = vmatpush3.bf16.msra.mxu0 %v8184_v32  ;;  %v1231_v61 = vor.u32 %v1230_v52, %v1226_v51  ;;  %v761_v0 = vld [vmem:[#allocation2 + $0x14] sm:$0x1]  ;;  %v647_v1 = vshrl.u32 %v425_v38, 16  ;;  %v650_v2 = vshll.u32 %v425_v38, 16 }
  0x2e   : > { %7252 = vmatprep.subr.bf16.mxu0 %v8192_v50  ;;  %v1221_v3 = vor.u32 %v1220_v57, %v1217_v55  ;;  %759 = vst [vmem:[#allocation2 + $0xc] sm:$0xf] %v758_v62  ;;  %v762_v4 = vsel %vm8481_vm3, %v450_v54, %v761_v0  ;;  %v644_v7 = vor.u32 %v642_v39, %v641_v60  ;;  %v645_v8 = vrot.slane %v641_v60, 4  ;;  %v841_v9 = vld [vmem:[#allocation2 + $0x9c] sm:$0xf]  ;;  %v8186_v47 = vld [vmem:[%s11592_s1 + $0xb0] sm:$0xff]  }
  0x2f   : > { %v1232_v12 = vrot.slane %v1231_v61, 4  ;;  %763 = vst [vmem:[#allocation2 + $0x14] sm:$0x1] %v762_v4  ;;  %v649_v14 = vrot.slane %v647_v1, 7  ;;  %v845_v16 = vld [vmem:[#allocation2 + $0xa4] sm:$0x1] }
  0x30   : > { %v1222_v17 = vrot.slane %v1221_v3, 4  ;;  %v842_v19 = vsel %vm8528_vm11, %v644_v7, %v841_v9  ;;  %v296_v26 = vld [vmem:[#allocation2 + $0x18] sm:$0x1]  ;;  %v352_v33 = vld [vmem:[#allocation2 + $0x20] sm:$0x1]  ;;  %v8189_v57 = vld [vmem:[%s11592_s1 + $0xe8] sm:$0xff]  }
  0x31   : > { %7253 = vmatpush3.bf16.msra.mxu0 %v8194_v10  ;;  %v1237_v20 = vsel %vm8562_vm14, %v1232_v12, %v1236_v58  ;;  %v652_v21 = vor.u32 %v650_v2, %v649_v14  ;;  %v654_v22 = vrot.slane %v649_v14, 4  ;;  %843 = vst [vmem:[#allocation2 + $0x9c] sm:$0xf] %v842_v19  ;;  %v297_v32 = vsel %vm8481_vm3, 0, %v296_v26  ;;  %v402_v37 = vld [vmem:[%s8490_s30 + $0x8] sm:$0xf] }
  0x32   : > { %v1227_v23 = vsel %vm8562_vm14, %v1222_v17, %v1226_v51  ;;  %298 = vst [vmem:[#allocation2 + $0x18] sm:$0x1] %v297_v32  ;;  %v353_v36 = vsel %vm8499_vm6, 0, %v352_v33  ;;  %v403_v39 = vld [vmem:[%s8490_s30 + $0xc] sm:$0xf]  ;;  %v452_v40 = vshrl.u32 %v402_v37, 16 }
  0x33   : > { %v8622_v27 = vcombine.low %v1227_v23, %v1237_v20  ;;  %v8627_v29 = vld [vmem:[#allocation2 + $0x10] sm:$0xf]  ;;  %v653_v30 = vsel %vm8537_vm12, %v645_v8, %v652_v21  ;;  %v846_v31 = vsel %vm8481_vm3, %v654_v22, %v845_v16  ;;  %354 = vst [vmem:[#allocation2 + $0x20] sm:$0x1] %v353_v36  ;;  %v455_v50 = vshll.u32 %v402_v37, 16  ;;  %v8204_v58 = vld [vmem:[%s11592_s1 + $0x168] sm:$0xff]  }
  0x34   : > { %v960_v15 = vshll.u32 %v8627_v29, 16  ;;  %v964_v35 = vshrl.u32 %v8627_v29, 16  ;;  %844 = vst [vmem:[#allocation2 + $0xa0] sm:$0xf] %v653_v30  ;;  %847 = vst [vmem:[#allocation2 + $0xa4] sm:$0x1] %v846_v31  ;;  %7254 = vmatprep.subr.bf16.mxu0 %v8204_v58 }
  0x35   : > { %11675 = vst [vmem:[#allocation9_spill] sm:$0xff] %v8622_v27  ;;  %2468 = vmatprep.mubr.bf16.mxu1 %v8622_v27  ;;  %v8644_v38 = vld [vmem:[#allocation2 + $0xc] sm:$0xf]  ;;  %v454_v49 = vrot.slane %v452_v40, 7  ;;  %v460_v51 = vshrl.u32 %v403_v39, 16  ;;  %v463_v62 = vshll.u32 %v403_v39, 16 }
  0x36   : > { %2469 = vmatmul.mubr.bf16.vlgmr.msra.gmra.mxu1 %v8620_v24  ;;  %v8648_v42 = vld [vmem:[#allocation2 + $0x14] sm:$0x1]  ;;  %v951_v43 = vshrl.u32 %v8644_v38, 16  ;;  %v954_v25 = vshll.u32 %v8644_v38, 16  ;;  %v962_v45 = vrot.slane %v960_v15, 5  ;;  %v966_v46 = vrot.slane %v964_v35, 4 }
  0x37   : > { %7139 = vmatpush3.bf16.msra.mxu1 %v8183_v28  ;;  %v970_v48 = vshll.u32 %v8648_v42, 16  ;;  %v8190_v2 = vld [vmem:[%s11592_s1 + $0xa8] sm:$0xff]   ;;  %v458_v3 = vrot.slane %v454_v49, 4  ;;  %v462_v4 = vrot.slane %v460_v51, 7  ;;  %v457_v14 = vor.u32 %v455_v50, %v454_v49  ;;  %v8191_v22 = vld [vmem:[%s11592_s1 + $0xe0] sm:$0xff]  }
  0x38   : > { %7140 = vmatprep.subr.bf16.mxu1 %v8185_v34  ;;  %v953_v52 = vrot.slane %v951_v43, 4  ;;  %v956_v53 = vrot.slane %v954_v25, 5  ;;  %v967_v54 = vor.u32 %v966_v46, %v962_v45  ;;  %v8656_v55 = vld [vmem:[#allocation2 + $0x9c] sm:$0xf]  ;;  %v8206_v7 = vld [vmem:[%s11592_s1 + $0x128] sm:$0xff]   ;;  %v8684_v32 = vcombine.low %v8644_v38, %v8627_v29  ;;  %v8193_v33 = vld [vmem:[%s11592_s1 + $0xa0] sm:$0xff]  }
  0x39   : > { %v972_v59 = vrot.slane %v970_v48, 5  ;;  %v1239_v60 = vshrl.u32 %v8656_v55, 16  ;;  %v1242_v61 = vshll.u32 %v8656_v55, 16  ;;  %v332_v16 = vld [vmem:[#allocation2 + $0xa8] sm:$0x1]  ;;  %7255 = vmatpush3.bf16.msra.mxu0 %v8206_v7  ;;  %v465_v34 = vor.u32 %v463_v62, %v462_v4  ;;  %v8197_v43 = vld [vmem:[%s11592_s1 + $0xd8] sm:$0xff]  }
  0x3a   : > { %v957_v0 = vor.u32 %v956_v53, %v953_v52  ;;  %v968_v1 = vrot.slane %v967_v54, 4  ;;  %v764_v23 = vld [vmem:[#allocation2 + $0x18] sm:$0xf]  ;;  %v388_v26 = vld [vmem:[#allocation2 + $0xb0] sm:$0x1]  ;;  %v467_v40 = vrot.slane %v462_v4, 4 }
  0x3b   : > { %7141 = vmatpush3.bf16.msra.mxu1 %v8186_v47  ;;  %v8672_v8 = vld [vmem:[#allocation2 + $0xa0] sm:$0xf]  ;;  %v910_v9 = vld [vmem:[#allocation2 + $0xa4] sm:$0x1]  ;;  %v1241_v10 = vrot.slane %v1239_v60, 4  ;;  %v1244_v12 = vrot.slane %v1242_v61, 5  ;;  %v466_v49 = vsel %vm8537_vm12, %v458_v3, %v465_v34  ;;  %v765_v50 = vsel %vm8528_vm11, %v457_v14, %v764_v23 }
  0x3c   : > { %v958_v17 = vrot.slane %v957_v0, 4  ;;  %v973_v19 = vsel %vm8562_vm14, %v968_v1, %v972_v59  ;;  %v1248_v20 = vshll.u32 %v8672_v8, 16  ;;  %v1252_v21 = vshrl.u32 %v8672_v8, 16  ;;  %7142 = vmatprep.subr.bf16.mxu1 %v8189_v57  ;;  %v426_v28 = vld [vmem:[%s8490_s30 + $0x68] sm:$0xf]  ;;  %v8210_v25 = vld [vmem:[%s11592_s1 + $0x160] sm:$0xff]  }
  0x3d   : > { %v1245_v30 = vor.u32 %v1244_v12, %v1241_v10  ;;  %v1258_v31 = vshll.u32 %v910_v9, 16  ;;  %v768_v15 = vld [vmem:[#allocation2 + $0x20] sm:$0x1]  ;;  %v427_v35 = vld [vmem:[%s8490_s30 + $0x6c] sm:$0xf]  ;;  %v333_v52 = vsel %vm8481_vm3, 0, %v332_v16  ;;  %7256 = vmatprep.subr.bf16.mxu0 %v8210_v25  ;;  %v8731_v10 = vcombine.low %v8656_v55, %v8672_v8 }
  0x3e   : > { %v963_v36 = vsel %vm8562_vm14, %v958_v17, %v962_v45  ;;  %v1250_v37 = vrot.slane %v1248_v20, 5  ;;  %v1254_v39 = vrot.slane %v1252_v21, 4  ;;  %767 = vst [vmem:[#allocation2 + $0x1c] sm:$0xf] %v466_v49  ;;  %v769_v51 = vsel %vm8481_vm3, %v467_v40, %v768_v15  ;;  %v8211_v53 = vld [vmem:[%s11592_s1 + $0x120] sm:$0xff]   ;;  %v8198_v59 = vld [vmem:[%s11592_s1 + $0x98] sm:$0xff]  }
  0x3f   : > { %v8698_v46 = vcombine.low %v963_v36, %v973_v19  ;;  %v1246_v47 = vrot.slane %v1245_v30, 4  ;;  %v1260_v48 = vrot.slane %v1258_v31, 5  ;;  %7143 = vmatpush3.bf16.msra.mxu1 %v8190_v2  ;;  %766 = vst [vmem:[#allocation2 + $0x18] sm:$0xf] %v765_v50  ;;  %770 = vst [vmem:[#allocation2 + $0x20] sm:$0x1] %v769_v51  ;;  %7257 = vmatpush3.bf16.msra.mxu0 %v8211_v53 }
  0x40   : > { %v1255_v45 = vor.u32 %v1254_v39, %v1250_v37  ;;  %7144 = vmatprep.subr.bf16.mxu1 %v8191_v22  ;;  %334 = vst [vmem:[#allocation2 + $0xa8] sm:$0x1] %v333_v52  ;;  %v389_v54 = vsel %vm8499_vm6, 0, %v388_v26  ;;  %v656_v57 = vshrl.u32 %v426_v28, 16  ;;  %v659_v58 = vshll.u32 %v426_v28, 16  ;;  %v8214_v60 = vld [vmem:[%s11592_s1 + $0x158] sm:$0xff]  }
  0x41   : > { %2380 = vmatprep.mubr.bf16.mxu0 %v8698_v46  ;;  %v1251_v61 = vsel %vm8562_vm14, %v1246_v47, %v1250_v37  ;;  %390 = vst [vmem:[#allocation2 + $0xb0] sm:$0x1] %v389_v54  ;;  %v664_v0 = vshrl.u32 %v427_v35, 16  ;;  %v667_v1 = vshll.u32 %v427_v35, 16  ;;  %v8199_v2 = vld [vmem:[%s11592_s1 + $0xd0] sm:$0xff]   ;;  %v6644_v7 = vrot.slane %v8644_v38, 9  ;;  %7258 = vmatprep.subr.bf16.mxu0 %v8214_v60 }
  0x42   : > { %v1256_v62 = vrot.slane %v1255_v45, 4  ;;  %2381 = vmatmul.mubr.bf16.gmra.mxu0 %v8684_v32  ;;  %v658_v3 = vrot.slane %v656_v57, 7  ;;  %v299_v4 = vld [vmem:[#allocation2 + $0x24] sm:$0x1]  ;;  %11676 = vst [vmem:[#allocation10_spill] sm:$0xff] %v8731_v10  ;;  %v8200_v22 = vld [vmem:[%s11592_s1 + $0x90] sm:$0xff]  }
  0x43   : > { %7145 = vmatpush3.bf16.msra.mxu1 %v8193_v33  ;;  %v666_v12 = vrot.slane %v664_v0, 7  ;;  %v300_v14 = vsel %vm8481_vm3, 0, %v299_v4  ;;  %v355_v16 = vld [vmem:[#allocation2 + $0x2c] sm:$0x1]  ;;  %v404_v17 = vld [vmem:[%s8490_s30 + $0x10] sm:$0xf] }
  0x44   : > { %v1261_v9 = vsel %vm8562_vm14, %v1256_v62, %v1260_v48  ;;  %7146 = vmatprep.subr.bf16.mxu1 %v8197_v43  ;;  %v661_v20 = vor.u32 %v659_v58, %v658_v3  ;;  %v662_v21 = vrot.slane %v658_v3, 4  ;;  %301 = vst [vmem:[#allocation2 + $0x24] sm:$0x1] %v300_v14  ;;  %v356_v55 = vsel %vm8499_vm6, 0, %v355_v16  ;;  %v8744_v8 = vld [vmem:[%s8490_s30 + $0x14] sm:$0xf] }
  0x45   : > { %v8736_v19 = vcombine.low %v1251_v61, %v1261_v9  ;;  %v335_v23 = vld [vmem:[#allocation2 + $0xb4] sm:$0x1]  ;;  %v669_v26 = vor.u32 %v667_v1, %v666_v12  ;;  %v671_v28 = vrot.slane %v666_v12, 4  ;;  %357 = vst [vmem:[#allocation2 + $0x2c] sm:$0x1] %v356_v55  ;;  %v469_v30 = vshrl.u32 %v404_v17, 16 }
  0x46   : > { %v472_v31 = vshll.u32 %v404_v17, 16  ;;  %v391_v33 = vld [vmem:[#allocation2 + $0xbc] sm:$0x1]  ;;  %v8203_v34 = vld [vmem:[%s11592_s1 + $0xc8] sm:$0xff]   ;;  %v477_v36 = vshrl.u32 %v8744_v8, 16  ;;  %v480_v37 = vshll.u32 %v8744_v8, 16 }
  0x47   : > { %11677 = vst [vmem:[#allocation11_spill] sm:$0xff] %v8736_v19  ;;  %v8215_v15 = vld [vmem:[%s11592_s1 + $0x118] sm:$0xff]   ;;  %2476 = vmatprep.mubr.bf16.mxu1 %v8736_v19  ;;  %7147 = vmatpush3.bf16.msra.mxu1 %v8198_v59  ;;  %v336_v39 = vsel %vm8481_vm3, 0, %v335_v23  ;;  %v392_v40 = vsel %vm8499_vm6, 0, %v391_v33  ;;  %v8764_v25 = vld [vmem:[#allocation2 + $0x20] sm:$0x1]  ;;  %v670_v49 = vsel %vm8537_vm12, %v662_v21, %v669_v26 }
  0x48   : > { %v8753_v35 = vld [vmem:[#allocation2 + $0x1c] sm:$0xf]  ;;  %2477 = vmatmul.mubr.bf16.gmra.mxu1 %v8731_v10  ;;  %v8762_v43 = vld [vmem:[#allocation2 + $0x18] sm:$0xf]  ;;  %7148 = vmatprep.subr.bf16.mxu1 %v8199_v2  ;;  %337 = vst [vmem:[#allocation2 + $0xb4] sm:$0x1] %v336_v39 }
  0x49   : > { %v984_v47 = vshll.u32 %v8753_v35, 16  ;;  %v988_v48 = vshrl.u32 %v8753_v35, 16  ;;  %393 = vst [vmem:[#allocation2 + $0xbc] sm:$0x1] %v392_v40  ;;  %v975_v45 = vshrl.u32 %v8762_v43, 16  ;;  %v978_v50 = vshll.u32 %v8762_v43, 16  ;;  %7259 = vmatpush3.bf16.msra.mxu0 %v8215_v15 }
  0x4a   : > { %v994_v51 = vshll.u32 %v8764_v25, 16  ;;  %v848_v52 = vld [vmem:[#allocation2 + $0xa8] sm:$0xf]  ;;  %851 = vst [vmem:[#allocation2 + $0xac] sm:$0xf] %v670_v49  ;;  %v8217_v54 = vld [vmem:[%s11592_s1 + $0x150] sm:$0xff]  }
  0x4b   : > { %v8205_v53 = vld [vmem:[%s11592_s1 + $0x88] sm:$0xff]   ;;  %v986_v57 = vrot.slane %v984_v47, 5  ;;  %v990_v58 = vrot.slane %v988_v48, 4  ;;  %v849_v59 = vsel %vm8528_vm11, %v661_v20, %v848_v52  ;;  %v852_v60 = vld [vmem:[#allocation2 + $0xb0] sm:$0x1]  ;;  %v471_v61 = vrot.slane %v469_v30, 7  ;;  %7149 = vmatpush3.bf16.msra.mxu1 %v8200_v22  ;;  %7260 = vmatprep.subr.bf16.mxu0 %v8217_v54 }
  0x4c   : > { %v8207_v62 = vld [vmem:[%s11592_s1 + $0xc0] sm:$0xff]   ;;  %v8218_v0 = vld [vmem:[%s11592_s1 + $0x110] sm:$0xff]   ;;  %v977_v1 = vrot.slane %v975_v45, 4  ;;  %v980_v2 = vrot.slane %v978_v50, 5  ;;  %v996_v3 = vrot.slane %v994_v51, 5  ;;  %v853_v4 = vsel %vm8481_vm3, %v671_v28, %v852_v60  ;;  %v8221_v12 = vld [vmem:[%s11592_s1 + $0x148] sm:$0xff]   ;;  %7150 = vmatprep.subr.bf16.mxu1 %v8203_v34 }
  0x4d   : > { %850 = vst [vmem:[#allocation2 + $0xa8] sm:$0xf] %v849_v59  ;;  %v428_v9 = vld [vmem:[%s8490_s30 + $0x70] sm:$0xf]  ;;  %v991_v14 = vor.u32 %v990_v58, %v986_v57  ;;  %854 = vst [vmem:[#allocation2 + $0xb0] sm:$0x1] %v853_v4  ;;  %v474_v16 = vor.u32 %v472_v31, %v471_v61  ;;  %7261 = vmatpush3.bf16.msra.mxu0 %v8218_v0  ;;  %v8806_v51 = vcombine.low %v8762_v43, %v8753_v35 }
  0x4e   : > { %v475_v17 = vrot.slane %v471_v61, 4  ;;  %v479_v20 = vrot.slane %v477_v36, 7  ;;  %v771_v21 = vld [vmem:[#allocation2 + $0x24] sm:$0xf]  ;;  %v429_v55 = vld [vmem:[%s8490_s30 + $0x74] sm:$0xf]  ;;  %v981_v8 = vor.u32 %v980_v2, %v977_v1  ;;  %7262 = vmatprep.subr.bf16.mxu0 %v8221_v12 }
  0x4f   : > { %v775_v23 = vld [vmem:[#allocation2 + $0x2c] sm:$0x1]  ;;  %v673_v26 = vshrl.u32 %v428_v9, 16  ;;  %v676_v30 = vshll.u32 %v428_v9, 16  ;;  %v681_v28 = vshrl.u32 %v429_v55, 16  ;;  %v8208_v22 = vld [vmem:[%s11592_s1 + $0x80] sm:$0xff]   ;;  %v772_v34 = vsel %vm8528_vm11, %v474_v16, %v771_v21  ;;  %7151 = vmatpush3.bf16.msra.mxu1 %v8205_v53 }
  0x50   : > { %v8222_v33 = vld [vmem:[%s11592_s1 + $0x108] sm:$0xff]   ;;  %v992_v31 = vrot.slane %v991_v14, 4  ;;  %v482_v15 = vor.u32 %v480_v37, %v479_v20  ;;  %v484_v36 = vrot.slane %v479_v20, 4  ;;  %v982_v39 = vrot.slane %v981_v8, 4  ;;  %773 = vst [vmem:[#allocation2 + $0x24] sm:$0xf] %v772_v34  ;;  %7152 = vmatprep.subr.bf16.mxu1 %v8207_v62 }
  0x51   : > { %v675_v40 = vrot.slane %v673_v26, 7  ;;  %v683_v47 = vrot.slane %v681_v28, 7  ;;  %v684_v48 = vshll.u32 %v429_v55, 16  ;;  %v855_v49 = vld [vmem:[#allocation2 + $0xb4] sm:$0xf]  ;;  %7263 = vmatpush3.bf16.msra.mxu0 %v8222_v33  ;;  %v8224_v20 = vld [vmem:[%s11592_s1 + $0x140] sm:$0xff]  }
  0x52   : > { %v997_v45 = vsel %vm8562_vm14, %v992_v31, %v996_v3  ;;  %v912_v50 = vld [vmem:[#allocation2 + $0xac] sm:$0xf]  ;;  %v483_v37 = vsel %vm8537_vm12, %v475_v17, %v482_v15  ;;  %v776_v52 = vsel %vm8481_vm3, %v484_v36, %v775_v23  ;;  %v859_v54 = vld [vmem:[#allocation2 + $0xbc] sm:$0x1]  ;;  %v987_v58 = vsel %vm8562_vm14, %v982_v39, %v986_v57  ;;  %7264 = vmatprep.subr.bf16.mxu0 %v8224_v20  ;;  %v8225_v36 = vld [vmem:[%s11592_s1 + $0x100] sm:$0xff]  }
  0x53   : > { %v1272_v53 = vshll.u32 %v912_v50, 16  ;;  %v1276_v59 = vshrl.u32 %v912_v50, 16  ;;  %774 = vst [vmem:[#allocation2 + $0x28] sm:$0xf] %v483_v37  ;;  %777 = vst [vmem:[#allocation2 + $0x2c] sm:$0x1] %v776_v52  ;;  %v678_v60 = vor.u32 %v676_v30, %v675_v40  ;;  %v8814_v61 = vcombine.low %v987_v58, %v997_v45  ;;  %7153 = vmatpush3.bf16.msra.mxu1 %v8208_v22 }
  0x54   : > { %v911_v0 = vld [vmem:[#allocation2 + $0xa8] sm:$0xf]  ;;  %v679_v1 = vrot.slane %v675_v40, 4  ;;  %v686_v2 = vor.u32 %v684_v48, %v683_v47  ;;  %v688_v3 = vrot.slane %v683_v47, 4  ;;  %v913_v4 = vld [vmem:[#allocation2 + $0xb0] sm:$0x1] }
  0x55   : > { %v1263_v9 = vshrl.u32 %v911_v0, 16  ;;  %v1266_v12 = vshll.u32 %v911_v0, 16  ;;  %v1274_v14 = vrot.slane %v1272_v53, 5  ;;  %v1278_v62 = vrot.slane %v1276_v59, 4  ;;  %2388 = vmatprep.mubr.bf16.mxu0 %v8814_v61  ;;  %v302_v40 = vld [vmem:[#allocation2 + $0x30] sm:$0x1]  ;;  %7265 = vmatpush3.bf16.msra.mxu0 %v8225_v36 }
  0x56   : > { %v1282_v57 = vshll.u32 %v913_v4, 16  ;;  %v687_v16 = vsel %vm8537_vm12, %v679_v1, %v686_v2  ;;  %v856_v17 = vsel %vm8528_vm11, %v678_v60, %v855_v49  ;;  %2389 = vmatmul.mubr.bf16.gmra.mxu0 %v8806_v51  ;;  %v860_v23 = vsel %vm8481_vm3, %v688_v3, %v859_v54  ;;  %v358_v37 = vld [vmem:[#allocation2 + $0x38] sm:$0x1]  ;;  %v3274_v56 = vld [vmem:[#allocation3 + $0x98] sm:$0x1] }
  0x57   : > { %v1265_v21 = vrot.slane %v1263_v9, 4  ;;  %v1268_v55 = vrot.slane %v1266_v12, 5  ;;  %v1279_v8 = vor.u32 %v1278_v62, %v1274_v14  ;;  %857 = vst [vmem:[#allocation2 + $0xb4] sm:$0xf] %v856_v17  ;;  %858 = vst [vmem:[#allocation2 + $0xb8] sm:$0xf] %v687_v16  ;;  %v8844_v54 = vcombine.low %v911_v0, %v912_v50 }
  0x58   : > { %v1284_v26 = vrot.slane %v1282_v57, 5  ;;  %v8827_v30 = vld [vmem:[#allocation2 + $0x24] sm:$0xf]  ;;  %861 = vst [vmem:[#allocation2 + $0xbc] sm:$0x1] %v860_v23  ;;  %v1370_v28 = vrot.slane %v8627_v29, 5 }
  0x59   : > { %v1269_v22 = vor.u32 %v1268_v55, %v1265_v21  ;;  %v1280_v33 = vrot.slane %v1279_v8, 4  ;;  %v999_v31 = vshrl.u32 %v8827_v30, 16  ;;  %v1002_v15 = vshll.u32 %v8827_v30, 16  ;;  %v8227_v52 = vld [vmem:[%s11592_s1 + $0x1f8] sm:$0xff]  }
  0x5a   : > { %v8835_v34 = vld [vmem:[#allocation2 + $0x28] sm:$0xf]  ;;  %v8837_v39 = vld [vmem:[#allocation2 + $0x2c] sm:$0x1]  ;;  %v303_v2 = vsel %vm8481_vm3, 0, %v302_v40  ;;  %v359_v3 = vsel %vm8499_vm6, 0, %v358_v37  ;;  %7362 = vmatprep.subr.bf16.mxu1 %v8227_v52 }
  0x5b   : > { %v1270_v47 = vrot.slane %v1269_v22, 4  ;;  %v1285_v48 = vsel %vm8562_vm14, %v1280_v33, %v1284_v26  ;;  %v1001_v49 = vrot.slane %v999_v31, 4  ;;  %v1004_v45 = vrot.slane %v1002_v15, 5  ;;  %304 = vst [vmem:[#allocation2 + $0x30] sm:$0x1] %v303_v2 }
  0x5c   : > { %v1008_v58 = vshll.u32 %v8835_v34, 16  ;;  %v1012_v53 = vshrl.u32 %v8835_v34, 16  ;;  %v1018_v59 = vshll.u32 %v8837_v39, 16  ;;  %360 = vst [vmem:[#allocation2 + $0x38] sm:$0x1] %v359_v3  ;;  %v8868_v15 = vcombine.low %v8827_v30, %v8835_v34 }
  0x5d   : > { %v1275_v60 = vsel %vm8562_vm14, %v1270_v47, %v1274_v14  ;;  %v1005_v1 = vor.u32 %v1004_v45, %v1001_v49  ;;  %v406_v62 = vld [vmem:[%s8490_s30 + $0x18] sm:$0xf]  ;;  %v407_v57 = vld [vmem:[%s8490_s30 + $0x1c] sm:$0xf]  ;;  %v408_v3 = vld [vmem:[%s8490_s30 + $0x20] sm:$0xf] }
  0x5e   : > { %v8855_v50 = vcombine.low %v1275_v60, %v1285_v48  ;;  %v1010_v0 = vrot.slane %v1008_v58, 5  ;;  %v1014_v4 = vrot.slane %v1012_v53, 4  ;;  %v1020_v9 = vrot.slane %v1018_v59, 5  ;;  %v914_v12 = vld [vmem:[#allocation2 + $0xb4] sm:$0xf]  ;;  %v8229_v14 = vld [vmem:[%s11592_s1 + $0x238] sm:$0xff]  }
  0x5f   : > { %v1006_v16 = vrot.slane %v1005_v1, 4  ;;  %v915_v17 = vld [vmem:[#allocation2 + $0xb8] sm:$0xf]  ;;  %v916_v20 = vld [vmem:[#allocation2 + $0xbc] sm:$0x1]  ;;  %v1287_v21 = vshrl.u32 %v914_v12, 16  ;;  %7994 = vmatprep.subr.bf16.mxu0 %v8229_v14 }
  0x60   : > { %11678 = vst [vmem:[#allocation12_spill] sm:$0xff] %v8855_v50  ;;  %2484 = vmatprep.mubr.bf16.mxu1 %v8855_v50  ;;  %v1015_v55 = vor.u32 %v1014_v4, %v1010_v0  ;;  %v1290_v8 = vshll.u32 %v914_v12, 16  ;;  %v1296_v23 = vshll.u32 %v915_v17, 16  ;;  %v1300_v26 = vshrl.u32 %v915_v17, 16  ;;  %v305_v49 = vld [vmem:[#allocation2 + $0x3c] sm:$0x1] }
  0x61   : > { %2485 = vmatmul.mubr.bf16.gmra.mxu1 %v8844_v54  ;;  %v1011_v22 = vsel %vm8562_vm14, %v1006_v16, %v1010_v0  ;;  %v1289_v33 = vrot.slane %v1287_v21, 4  ;;  %v1306_v31 = vshll.u32 %v916_v20, 16  ;;  %v486_v37 = vshrl.u32 %v406_v62, 16  ;;  %v361_v53 = vld [vmem:[#allocation2 + $0x44] sm:$0x1] }
  0x62   : > { %v1016_v36 = vrot.slane %v1015_v55, 4  ;;  %v1292_v40 = vrot.slane %v1290_v8, 5  ;;  %v1298_v47 = vrot.slane %v1296_v23, 5  ;;  %v1302_v48 = vrot.slane %v1300_v26, 4  ;;  %v778_v20 = vld [vmem:[#allocation2 + $0x30] sm:$0xf] }
  0x63   : > { %v1308_v45 = vrot.slane %v1306_v31, 5  ;;  %v489_v52 = vshll.u32 %v406_v62, 16  ;;  %v494_v58 = vshrl.u32 %v407_v57, 16  ;;  %v497_v2 = vshll.u32 %v407_v57, 16  ;;  %v409_v21 = vld [vmem:[%s8490_s30 + $0x24] sm:$0xf] }
  0x64   : > { %v1021_v59 = vsel %vm8562_vm14, %v1016_v36, %v1020_v9  ;;  %v1293_v60 = vor.u32 %v1292_v40, %v1289_v33  ;;  %v1303_v1 = vor.u32 %v1302_v48, %v1298_v47  ;;  %v8875_v4 = vcombine.low %v914_v12, %v915_v17  ;;  %v782_v62 = vld [vmem:[#allocation2 + $0x38] sm:$0x1]  ;;  %v364_v33 = vld [vmem:[#allocation2 + $0x50] sm:$0x1]  ;;  %v415_v50 = vld [vmem:[%s8490_s30 + $0x3c] sm:$0xf] }
  0x65   : > { %v8873_v0 = vcombine.low %v1011_v22, %v1021_v59  ;;  %v488_v14 = vrot.slane %v486_v37, 7  ;;  %v496_v16 = vrot.slane %v494_v58, 7  ;;  %v306_v23 = vsel %vm8481_vm3, 0, %v305_v49  ;;  %v308_v22 = vld [vmem:[#allocation2 + $0x48] sm:$0x1] }
  0x66   : > { %v1294_v55 = vrot.slane %v1293_v60, 4  ;;  %v1304_v8 = vrot.slane %v1303_v1, 4  ;;  %v362_v9 = vsel %vm8499_vm6, 0, %v361_v53  ;;  %307 = vst [vmem:[#allocation2 + $0x3c] sm:$0x1] %v306_v23  ;;  %v503_v40 = vshrl.u32 %v408_v3, 16 }
  0x67   : > { %2396 = vmatprep.mubr.bf16.mxu0 %v8873_v0  ;;  %v491_v57 = vor.u32 %v489_v52, %v488_v14  ;;  %v492_v26 = vrot.slane %v488_v14, 4  ;;  %v499_v12 = vor.u32 %v497_v2, %v496_v16  ;;  %v501_v17 = vrot.slane %v496_v16, 4  ;;  %363 = vst [vmem:[#allocation2 + $0x44] sm:$0x1] %v362_v9  ;;  %v410_v49 = vld [vmem:[%s8490_s30 + $0x28] sm:$0xf] }
  0x68   : > { %v1299_v31 = vsel %vm8562_vm14, %v1294_v55, %v1298_v47  ;;  %v1309_v36 = vsel %vm8562_vm14, %v1304_v8, %v1308_v45  ;;  %2397 = vmatmul.mubr.bf16.gmra.mxu0 %v8868_v15  ;;  %v506_v48 = vshll.u32 %v408_v3, 16  ;;  %v505_v45 = vrot.slane %v503_v40, 7  ;;  %v411_v1 = vld [vmem:[%s8490_s30 + $0x2c] sm:$0xf] }
  0x69   : > { %v8889_v37 = vcombine.low %v1299_v31, %v1309_v36  ;;  %v500_v52 = vsel %vm8537_vm12, %v492_v26, %v499_v12  ;;  %v779_v58 = vsel %vm8528_vm11, %v491_v57, %v778_v20  ;;  %v783_v47 = vsel %vm8481_vm3, %v501_v17, %v782_v62 }
  0x6a   : > { %780 = vst [vmem:[#allocation2 + $0x30] sm:$0xf] %v779_v58  ;;  %781 = vst [vmem:[#allocation2 + $0x34] sm:$0xf] %v500_v52  ;;  %v511_v53 = vshrl.u32 %v409_v21, 16  ;;  %v514_v59 = vshll.u32 %v409_v21, 16  ;;  %v508_v20 = vor.u32 %v506_v48, %v505_v45  ;;  %v1371_v17 = vsel %vm8553_vm13, %v6644_v7, %v1370_v28 }
  0x6b   : > { %11679 = vst [vmem:[#allocation13_spill] sm:$0xff] %v8889_v37  ;;  %784 = vst [vmem:[#allocation2 + $0x38] sm:$0x1] %v783_v47  ;;  %v1372_v60 = vrot.slane %v1370_v28, 4  ;;  %2492 = vmatprep.mubr.bf16.mxu1 %v8889_v37  ;;  %v1373_v2 = vrot.slane %v8648_v42, 5  ;;  %v309_v3 = vsel %vm8481_vm3, 0, %v308_v22 }
  0x6c   : > { %v365_v14 = vsel %vm8499_vm6, 0, %v364_v33  ;;  %v520_v16 = vshrl.u32 %v410_v49, 16  ;;  %2493 = vmatmul.mubr.bf16.gmra.mxu1 %v8875_v4  ;;  %v509_v55 = vrot.slane %v505_v45, 4  ;;  %v513_v21 = vrot.slane %v511_v53, 7  ;;  %310 = vst [vmem:[#allocation2 + $0x48] sm:$0x1] %v309_v3 }
  0x6d   : > { %366 = vst [vmem:[#allocation2 + $0x50] sm:$0x1] %v365_v14  ;;  %2533 = vmatprep.mubr.bf16.mxu1 %v8684_v32  ;;  %v523_v62 = vshll.u32 %v410_v49, 16  ;;  %v528_v23 = vshrl.u32 %v411_v1, 16  ;;  %v531_v42 = vshll.u32 %v411_v1, 16  ;;  %v6645_v22 = vrot.slane %v8762_v43, 9 }
  0x6e   : > { %v522_v8 = vrot.slane %v520_v16, 7  ;;  %v516_v9 = vor.u32 %v514_v59, %v513_v21  ;;  %v518_v57 = vrot.slane %v513_v21, 4  ;;  %v785_v26 = vld [vmem:[#allocation2 + $0x3c] sm:$0xf]  ;;  %v789_v12 = vld [vmem:[#allocation2 + $0x44] sm:$0x1]  ;;  %v1374_v33 = vsel %vm8553_vm13, %v1372_v60, %v1373_v2 }
  0x6f   : > { %v786_v32 = vsel %vm8528_vm11, %v508_v20, %v785_v26  ;;  %v530_v36 = vrot.slane %v528_v23, 7  ;;  %v1377_v38 = vrot.slane %v8753_v35, 5  ;;  %v1380_v7 = vrot.slane %v8764_v25, 5  ;;  %v8228_v28 = vld [vmem:[%s11592_s1 + $0x1b8] sm:$0xff]   ;;  %v8230_v48 = vld [vmem:[%s11592_s1 + $0x1f0] sm:$0xff]  }
  0x70   : > { %v526_v31 = vrot.slane %v522_v8, 4  ;;  %v517_v40 = vsel %vm8537_vm12, %v509_v55, %v516_v9  ;;  %787 = vst [vmem:[#allocation2 + $0x3c] sm:$0xf] %v786_v32  ;;  %v790_v29 = vsel %vm8481_vm3, %v518_v57, %v789_v12  ;;  %v525_v35 = vor.u32 %v523_v62, %v522_v8  ;;  %v311_v25 = vld [vmem:[#allocation2 + $0x54] sm:$0x1] }
  0x71   : > { %v8931_v49 = vld [vmem:[#allocation2 + $0x30] sm:$0xf]  ;;  %v8933_v52 = vld [vmem:[#allocation2 + $0x34] sm:$0xf]  ;;  %788 = vst [vmem:[#allocation2 + $0x40] sm:$0xf] %v517_v40  ;;  %v533_v47 = vor.u32 %v531_v42, %v530_v36  ;;  %v8945_v14 = vcombine.low %v1371_v17, %v1374_v33 }
  0x72   : > { %v8935_v58 = vld [vmem:[#allocation2 + $0x38] sm:$0x1]  ;;  %791 = vst [vmem:[#allocation2 + $0x44] sm:$0x1] %v790_v29  ;;  %v1023_v45 = vshrl.u32 %v8931_v49, 16  ;;  %v1026_v53 = vshll.u32 %v8931_v49, 16  ;;  %v8957_v26 = vcombine.low %v8931_v49, %v8933_v52 }
  0x73   : > { %v1032_v59 = vshll.u32 %v8933_v52, 16  ;;  %v1036_v60 = vshrl.u32 %v8933_v52, 16  ;;  %v367_v1 = vld [vmem:[#allocation2 + $0x5c] sm:$0x1]  ;;  %v8942_v2 = vld [vmem:[%s8490_s30 + $0x30] sm:$0xf]  ;;  %v534_v16 = vsel %vm8537_vm12, %v526_v31, %v533_v47 }
  0x74   : > { %v1042_v3 = vshll.u32 %v8935_v58, 16  ;;  %v535_v20 = vrot.slane %v530_v36, 4  ;;  %v792_v55 = vld [vmem:[#allocation2 + $0x48] sm:$0xf]  ;;  %v796_v21 = vld [vmem:[#allocation2 + $0x50] sm:$0x1]  ;;  %2534 = vmatmul.mubr.bf16.vlgmr.msra.gmra.mxu1 %v6693_v11 }
  0x75   : > { %v1025_v8 = vrot.slane %v1023_v45, 4  ;;  %v1028_v62 = vrot.slane %v1026_v53, 5  ;;  %v1034_v23 = vrot.slane %v1032_v59, 5  ;;  %v1038_v42 = vrot.slane %v1036_v60, 4  ;;  %795 = vst [vmem:[#allocation2 + $0x4c] sm:$0xf] %v534_v16  ;;  %2541 = vmatprep.mubr.bf16.mxu1 %v8806_v51  ;;  %7363 = vmatpush3.bf16.msra.mxu1 %v8228_v28 }
  0x76   : > { %v8953_v9 = vld [vmem:[%s8490_s30 + $0x34] sm:$0xf]  ;;  %v1044_v57 = vrot.slane %v1042_v3, 5  ;;  %v793_v12 = vsel %vm8528_vm11, %v525_v35, %v792_v55  ;;  %v797_v17 = vsel %vm8481_vm3, %v535_v20, %v796_v21  ;;  %v1379_v32 = vrot.slane %v1377_v38, 4  ;;  %7364 = vmatprep.subr.bf16.mxu1 %v8230_v48  ;;  %v8233_v31 = vld [vmem:[%s11592_s1 + $0x1e8] sm:$0xff]  }
  0x77   : > { %v1029_v6 = vor.u32 %v1028_v62, %v1025_v8  ;;  %v1039_v11 = vor.u32 %v1038_v42, %v1034_v23  ;;  %794 = vst [vmem:[#allocation2 + $0x48] sm:$0xf] %v793_v12  ;;  %798 = vst [vmem:[#allocation2 + $0x50] sm:$0x1] %v797_v17  ;;  %v312_v33 = vsel %vm8481_vm3, 0, %v311_v25  ;;  %v368_v40 = vsel %vm8499_vm6, 0, %v367_v1 }
  0x78   : > { %v8972_v36 = vld [vmem:[#allocation2 + $0x3c] sm:$0xf]  ;;  %313 = vst [vmem:[#allocation2 + $0x54] sm:$0x1] %v312_v33  ;;  %v537_v29 = vshrl.u32 %v8942_v2, 16  ;;  %v540_v28 = vshll.u32 %v8942_v2, 16  ;;  %v1378_v53 = vsel %vm8553_vm13, %v6645_v22, %v1377_v38  ;;  %v1381_v59 = vsel %vm8553_vm13, %v1379_v32, %v1380_v7 }
  0x79   : > { %v545_v35 = vshrl.u32 %v8953_v9, 16  ;;  %v1030_v47 = vrot.slane %v1029_v6, 4  ;;  %v1040_v45 = vrot.slane %v1039_v11, 4  ;;  %v8979_v25 = vld [vmem:[#allocation2 + $0x40] sm:$0xf]  ;;  %v1047_v60 = vshrl.u32 %v8972_v36, 16  ;;  %7365 = vmatpush3.bf16.msra.mxu1 %v8231_v5 }
  0x7a   : > { %v8981_v48 = vld [vmem:[#allocation2 + $0x44] sm:$0x1]  ;;  %369 = vst [vmem:[#allocation2 + $0x5c] sm:$0x1] %v368_v40  ;;  %v1050_v1 = vshll.u32 %v8972_v36, 16  ;;  %v1056_v2 = vshll.u32 %v8979_v25, 16  ;;  %v9000_v38 = vcombine.low %v8972_v36, %v8979_v25  ;;  %7366 = vmatprep.subr.bf16.mxu1 %v8233_v31  ;;  %v9018_v11 = vcombine.low %v1378_v53, %v1381_v59 }
  0x7b   : > { %v1060_v3 = vshrl.u32 %v8979_v25, 16  ;;  %v1035_v16 = vsel %vm8562_vm14, %v1030_v47, %v1034_v23  ;;  %v1045_v43 = vsel %vm8562_vm14, %v1040_v45, %v1044_v57  ;;  %v1066_v22 = vshll.u32 %v8981_v48, 16  ;;  %v8234_v7 = vld [vmem:[%s11592_s1 + $0x1a8] sm:$0xff]   ;;  %v8237_v59 = vld [vmem:[%s11592_s1 + $0x1a0] sm:$0xff]  }
  0x7c   : > { %11680 = vst [vmem:[#allocation14_spill] sm:$0xff] %v9000_v38  ;;  %v9005_v20 = vcombine.low %v1035_v16, %v1045_v43  ;;  %v1049_v55 = vrot.slane %v1047_v60, 4  ;;  %v1052_v21 = vrot.slane %v1050_v1, 5  ;;  %v1058_v8 = vrot.slane %v1056_v2, 5  ;;  %v9007_v62 = vld [vmem:[#allocation2 + $0x4c] sm:$0xf]  ;;  %2542 = vmatmul.mubr.bf16.gmra.mxu1 %v8945_v14 }
  0x7d   : > { %v1062_v23 = vrot.slane %v1060_v3, 4  ;;  %v1068_v42 = vrot.slane %v1066_v22, 5  ;;  %v1080_v57 = vshll.u32 %v9007_v62, 16  ;;  %v1084_v12 = vshrl.u32 %v9007_v62, 16  ;;  %2549 = vmatprep.mubr.bf16.mxu1 %v8868_v15  ;;  %11681 = vst [vmem:[#allocation15_spill] sm:$0xff] %v9018_v11  ;;  %7367 = vmatpush3.bf16.msra.mxu1 %v8234_v7  ;;  %v8236_v60 = vld [vmem:[%s11592_s1 + $0x1e0] sm:$0xff]  }
  0x7e   : > { %2404 = vmatprep.mubr.bf16.mxu0 %v9005_v20  ;;  %v1053_v17 = vor.u32 %v1052_v21, %v1049_v55  ;;  %v9013_v5 = vld [vmem:[#allocation2 + $0x48] sm:$0xf]  ;;  %v9015_v6 = vld [vmem:[#allocation2 + $0x50] sm:$0x1]  ;;  %v539_v32 = vrot.slane %v537_v29, 7  ;;  %v547_v33 = vrot.slane %v545_v35, 7  ;;  %7368 = vmatprep.subr.bf16.mxu1 %v8236_v60 }
  0x7f   : > { %2405 = vmatmul.mubr.bf16.gmra.mxu0 %v8957_v26  ;;  %v1063_v31 = vor.u32 %v1062_v23, %v1058_v8  ;;  %v1071_v40 = vshrl.u32 %v9013_v5, 16  ;;  %v1074_v47 = vshll.u32 %v9013_v5, 16  ;;  %v1082_v45 = vrot.slane %v1080_v57, 5  ;;  %v799_v35 = vld [vmem:[#allocation2 + $0x54] sm:$0xf]  ;;  %v8238_v55 = vld [vmem:[%s11592_s1 + $0x1d8] sm:$0xff]  }
  0x80   : > { %v1054_v1 = vrot.slane %v1053_v17, 4  ;;  %v1086_v2 = vrot.slane %v1084_v12, 4  ;;  %v1090_v53 = vshll.u32 %v9015_v6, 16  ;;  %v9029_v29 = vcombine.low %v9013_v5, %v9007_v62  ;;  %v314_v7 = vld [vmem:[#allocation2 + $0x60] sm:$0x1] }
  0x81   : > { %v1064_v3 = vrot.slane %v1063_v31, 4  ;;  %v1073_v16 = vrot.slane %v1071_v40, 4  ;;  %v1076_v43 = vrot.slane %v1074_v47, 5  ;;  %v542_v22 = vor.u32 %v540_v28, %v539_v32  ;;  %v803_v17 = vld [vmem:[#allocation2 + $0x5c] sm:$0x1]  ;;  %7369 = vmatpush3.bf16.msra.mxu1 %v8237_v59 }
  0x82   : > { %11682 = vst [vmem:[#allocation16_spill] sm:$0xff] %v9029_v29  ;;  %v1059_v21 = vsel %vm8562_vm14, %v1054_v1, %v1058_v8  ;;  %v1087_v23 = vor.u32 %v1086_v2, %v1082_v45  ;;  %v1092_v57 = vrot.slane %v1090_v53, 5  ;;  %v543_v12 = vrot.slane %v539_v32, 4  ;;  %v370_v37 = vld [vmem:[#allocation2 + $0x68] sm:$0x1]  ;;  %7370 = vmatprep.subr.bf16.mxu1 %v8238_v55 }
  0x83   : > { %v1069_v31 = vsel %vm8562_vm14, %v1064_v3, %v1068_v42  ;;  %v1077_v40 = vor.u32 %v1076_v43, %v1073_v16  ;;  %v548_v28 = vshll.u32 %v8953_v9, 16  ;;  %v552_v47 = vrot.slane %v547_v33, 4  ;;  %v414_v60 = vld [vmem:[%s8490_s30 + $0x38] sm:$0xf]  ;;  %v373_v16 = vld [vmem:[#allocation2 + $0x74] sm:$0x1] }
  0x84   : > { %v9044_v19 = vcombine.low %v1059_v21, %v1069_v31  ;;  %v1088_v27 = vrot.slane %v1087_v23, 4  ;;  %v800_v8 = vsel %vm8528_vm11, %v542_v22, %v799_v35  ;;  %v6646_v32 = vrot.slane %v8827_v30, 9  ;;  %2550 = vmatmul.mubr.bf16.gmra.mxu1 %v9018_v11  ;;  %v9075_v55 = vld [vmem:[%s8490_s30 + $0x40] sm:$0xf]  ;;  %v8241_v21 = vld [vmem:[%s11592_s1 + $0x1d0] sm:$0xff]  }
  0x85   : > { %v1078_v1 = vrot.slane %v1077_v40, 4  ;;  %v550_v42 = vor.u32 %v548_v28, %v547_v33  ;;  %801 = vst [vmem:[#allocation2 + $0x54] sm:$0xf] %v800_v8  ;;  %v804_v9 = vsel %vm8481_vm3, %v552_v47, %v803_v17  ;;  %v1384_v2 = vrot.slane %v8835_v34, 5  ;;  %2557 = vmatprep.mubr.bf16.mxu1 %v8957_v26 }
  0x86   : > { %2412 = vmatprep.mubr.bf16.mxu0 %v9044_v19  ;;  %v1093_v53 = vsel %vm8562_vm14, %v1088_v27, %v1092_v57  ;;  %805 = vst [vmem:[#allocation2 + $0x5c] sm:$0x1] %v804_v9  ;;  %v1387_v30 = vrot.slane %v8837_v39, 5  ;;  %v315_v35 = vsel %vm8481_vm3, 0, %v314_v7  ;;  %v371_v33 = vsel %vm8499_vm6, 0, %v370_v37  ;;  %v8240_v37 = vld [vmem:[%s11592_s1 + $0x198] sm:$0xff]  }
  0x87   : > { %2413 = vmatmul.mubr.bf16.gmra.mxu0 %v9000_v38  ;;  %v1083_v34 = vsel %vm8562_vm14, %v1078_v1, %v1082_v45  ;;  %v551_v27 = vsel %vm8537_vm12, %v543_v12, %v550_v42  ;;  %v1385_v59 = vsel %vm8553_vm13, %v6646_v32, %v1384_v2  ;;  %v1386_v3 = vrot.slane %v1384_v2, 4  ;;  %316 = vst [vmem:[#allocation2 + $0x60] sm:$0x1] %v315_v35  ;;  %v317_v39 = vld [vmem:[#allocation2 + $0x6c] sm:$0x1] }
  0x88   : > { %372 = vst [vmem:[#allocation2 + $0x68] sm:$0x1] %v371_v33  ;;  %v9072_v43 = vcombine.low %v1083_v34, %v1093_v53  ;;  %802 = vst [vmem:[#allocation2 + $0x58] sm:$0xf] %v551_v27  ;;  %v554_v22 = vshrl.u32 %v414_v60, 16  ;;  %v557_v45 = vshll.u32 %v414_v60, 16  ;;  %7371 = vmatpush3.bf16.msra.mxu1 %v8240_v37 }
  0x89   : > { %v562_v7 = vshrl.u32 %v415_v50, 16  ;;  %v1388_v23 = vsel %vm8553_vm13, %v1386_v3, %v1387_v30  ;;  %v565_v57 = vshll.u32 %v415_v50, 16  ;;  %v6647_v12 = vrot.slane %v8931_v49, 9  ;;  %7372 = vmatprep.subr.bf16.mxu1 %v8241_v21  ;;  %v8242_v60 = vld [vmem:[%s11592_s1 + $0x190] sm:$0xff]   ;;  %v8244_v32 = vld [vmem:[%s11592_s1 + $0x1c8] sm:$0xff]   ;;  %v8246_v3 = vld [vmem:[%s11592_s1 + $0x1c0] sm:$0xff]  }
  0x8a   : > { %v1391_v17 = vrot.slane %v8933_v52, 5  ;;  %2420 = vmatprep.mubr.bf16.mxu0 %v9072_v43  ;;  %v9085_v31 = vcombine.low %v1385_v59, %v1388_v23  ;;  %v556_v40 = vrot.slane %v554_v22, 7  ;;  %v1394_v47 = vrot.slane %v8935_v58, 5  ;;  %v417_v53 = vld [vmem:[%s8490_s30 + $0x44] sm:$0xf]  ;;  %v8245_v30 = vld [vmem:[%s11592_s1 + $0x188] sm:$0xff]  }
  0x8b   : > { %v564_v28 = vrot.slane %v562_v7, 7  ;;  %v318_v52 = vsel %vm8481_vm3, 0, %v317_v39  ;;  %v374_v8 = vsel %vm8499_vm6, 0, %v373_v16  ;;  %v571_v59 = vshrl.u32 %v9075_v55, 16 }
  0x8c   : > { %11683 = vst [vmem:[#allocation17_spill] sm:$0xff] %v9085_v31  ;;  %v1392_v50 = vsel %vm8553_vm13, %v6647_v12, %v1391_v17  ;;  %v1393_v49 = vrot.slane %v1391_v17, 4  ;;  %v9100_v58 = vld [vmem:[#allocation2 + $0x54] sm:$0xf]  ;;  %v559_v1 = vor.u32 %v557_v45, %v556_v40  ;;  %v560_v42 = vrot.slane %v556_v40, 4  ;;  %2558 = vmatmul.mubr.bf16.gmra.mxu1 %v9085_v31 }
  0x8d   : > { %v567_v9 = vor.u32 %v565_v57, %v564_v28  ;;  %v569_v2 = vrot.slane %v564_v28, 4  ;;  %319 = vst [vmem:[#allocation2 + $0x6c] sm:$0x1] %v318_v52  ;;  %375 = vst [vmem:[#allocation2 + $0x74] sm:$0x1] %v374_v8  ;;  %v1095_v33 = vshrl.u32 %v9100_v58, 16  ;;  %2565 = vmatprep.mubr.bf16.mxu1 %v9000_v38  ;;  %7373 = vmatpush3.bf16.msra.mxu1 %v8242_v60 }
  0x8e   : > { %v9106_v35 = vld [vmem:[#allocation2 + $0x5c] sm:$0x1]  ;;  %v1098_v34 = vshll.u32 %v9100_v58, 16  ;;  %v1395_v27 = vsel %vm8553_vm13, %v1393_v49, %v1394_v47  ;;  %v806_v37 = vld [vmem:[#allocation2 + $0x60] sm:$0xf]  ;;  %v574_v7 = vshll.u32 %v9075_v55, 16  ;;  %7374 = vmatprep.subr.bf16.mxu1 %v8244_v32 }
  0x8f   : > { %v1114_v39 = vshll.u32 %v9106_v35, 16  ;;  %v568_v16 = vsel %vm8537_vm12, %v560_v42, %v567_v9  ;;  %v810_v22 = vld [vmem:[#allocation2 + $0x68] sm:$0x1]  ;;  %v9121_v45 = vcombine.low %v1392_v50, %v1395_v27  ;;  %2421 = vmatmul.mubr.bf16.gmra.mxu0 %v9029_v29  ;;  %v9125_v21 = vld [vmem:[#allocation2 + $0x58] sm:$0xf]  ;;  %v1097_v23 = vrot.slane %v1095_v33, 4 }
  0x90   : > { %v1100_v57 = vrot.slane %v1098_v34, 5  ;;  %v807_v12 = vsel %vm8528_vm11, %v559_v1, %v806_v37  ;;  %809 = vst [vmem:[#allocation2 + $0x64] sm:$0xf] %v568_v16  ;;  %v811_v17 = vsel %vm8481_vm3, %v569_v2, %v810_v22  ;;  %v1104_v40 = vshll.u32 %v9125_v21, 16  ;;  %v320_v8 = vld [vmem:[#allocation2 + $0x78] sm:$0x1] }
  0x91   : > { %v1108_v28 = vshrl.u32 %v9125_v21, 16  ;;  %v1116_v55 = vrot.slane %v1114_v39, 5  ;;  %v9135_v47 = vcombine.low %v9100_v58, %v9125_v21  ;;  %808 = vst [vmem:[#allocation2 + $0x60] sm:$0xf] %v807_v12  ;;  %812 = vst [vmem:[#allocation2 + $0x68] sm:$0x1] %v811_v17  ;;  %7375 = vmatpush3.bf16.msra.mxu1 %v8245_v30 }
  0x92   : > { %v1101_v60 = vor.u32 %v1100_v57, %v1097_v23  ;;  %v573_v50 = vrot.slane %v571_v59, 7  ;;  %v579_v49 = vshrl.u32 %v417_v53, 16  ;;  %v582_v52 = vshll.u32 %v417_v53, 16  ;;  %v376_v1 = vld [vmem:[#allocation2 + $0x80] sm:$0x1]  ;;  %7376 = vmatprep.subr.bf16.mxu1 %v8246_v3 }
  0x93   : > { %11684 = vst [vmem:[#allocation18_spill] sm:$0xff] %v9135_v47  ;;  %v8247_v32 = vld [vmem:[%s11592_s1 + $0x180] sm:$0xff]   ;;  %v1106_v42 = vrot.slane %v1104_v40, 5  ;;  %v1110_v9 = vrot.slane %v1108_v28, 4  ;;  %v6648_v2 = vrot.slane %v8972_v36, 9  ;;  %v1398_v33 = vrot.slane %v8979_v25, 5 }
  0x94   : > { %v1102_v34 = vrot.slane %v1101_v60, 4  ;;  %v576_v27 = vor.u32 %v574_v7, %v573_v50  ;;  %v577_v39 = vrot.slane %v573_v50, 4  ;;  %v581_v16 = vrot.slane %v579_v49, 7  ;;  %v813_v59 = vld [vmem:[#allocation2 + $0x6c] sm:$0xf]  ;;  %2566 = vmatmul.mubr.bf16.gmra.mxu1 %v9121_v45 }
  0x95   : > { %v1111_v53 = vor.u32 %v1110_v9, %v1106_v42  ;;  %v817_v37 = vld [vmem:[#allocation2 + $0x74] sm:$0x1]  ;;  %v1399_v22 = vsel %vm8553_vm13, %v6648_v2, %v1398_v33  ;;  %v1400_v23 = vrot.slane %v1398_v33, 4  ;;  %v1401_v57 = vrot.slane %v8981_v48, 5  ;;  %2573 = vmatprep.mubr.bf16.mxu1 %v9029_v29  ;;  %v418_v28 = vld [vmem:[%s8490_s30 + $0x48] sm:$0xf]  ;;  %7377 = vmatpush3.bf16.msra.mxu1 %v8247_v32 }
  0x96   : > { %v1107_v36 = vsel %vm8562_vm14, %v1102_v34, %v1106_v42  ;;  %v584_v25 = vor.u32 %v582_v52, %v581_v16  ;;  %v586_v30 = vrot.slane %v581_v16, 4  ;;  %v814_v3 = vsel %vm8528_vm11, %v576_v27, %v813_v59  ;;  %v419_v60 = vld [vmem:[%s8490_s30 + $0x4c] sm:$0xf] }
  0x97   : > { %v1112_v7 = vrot.slane %v1111_v53, 4  ;;  %v9150_v12 = vld [vmem:[#allocation2 + $0x64] sm:$0xf]  ;;  %815 = vst [vmem:[#allocation2 + $0x6c] sm:$0xf] %v814_v3  ;;  %v1402_v17 = vsel %vm8553_vm13, %v1400_v23, %v1401_v57  ;;  %v321_v48 = vsel %vm8481_vm3, 0, %v320_v8 }
  0x98   : > { %v377_v40 = vsel %vm8499_vm6, 0, %v376_v1  ;;  %v9161_v50 = vld [vmem:[#allocation2 + $0x60] sm:$0xf]  ;;  %v9163_v49 = vld [vmem:[#allocation2 + $0x68] sm:$0x1]  ;;  %v1128_v52 = vshll.u32 %v9150_v12, 16  ;;  %v585_v9 = vsel %vm8537_vm12, %v577_v39, %v584_v25  ;;  %v818_v8 = vsel %vm8481_vm3, %v586_v30, %v817_v37 }
  0x99   : > { %v1132_v42 = vshrl.u32 %v9150_v12, 16  ;;  %322 = vst [vmem:[#allocation2 + $0x78] sm:$0x1] %v321_v48  ;;  %378 = vst [vmem:[#allocation2 + $0x80] sm:$0x1] %v377_v40  ;;  %v1117_v1 = vsel %vm8562_vm14, %v1112_v7, %v1116_v55  ;;  %v1119_v32 = vshrl.u32 %v9161_v50, 16  ;;  %v9178_v37 = vcombine.low %v1399_v22, %v1402_v17 }
  0x9a   : > { %v1122_v2 = vshll.u32 %v9161_v50, 16  ;;  %v1138_v33 = vshll.u32 %v9163_v49, 16  ;;  %816 = vst [vmem:[#allocation2 + $0x70] sm:$0xf] %v585_v9  ;;  %819 = vst [vmem:[#allocation2 + $0x74] sm:$0x1] %v818_v8  ;;  %v9176_v34 = vcombine.low %v1107_v36, %v1117_v1  ;;  %v9184_v36 = vcombine.low %v9161_v50, %v9150_v12 }
  0x9b   : > { %v1130_v27 = vrot.slane %v1128_v52, 5  ;;  %v1134_v39 = vrot.slane %v1132_v42, 4  ;;  %v1121_v16 = vrot.slane %v1119_v32, 4  ;;  %v588_v23 = vshrl.u32 %v418_v28, 16 }
  0x9c   : > { %v1124_v59 = vrot.slane %v1122_v2, 5  ;;  %v1140_v53 = vrot.slane %v1138_v33, 5  ;;  %2428 = vmatprep.mubr.bf16.mxu0 %v9176_v34  ;;  %v591_v57 = vshll.u32 %v418_v28, 16  ;;  %v596_v25 = vshrl.u32 %v419_v60, 16  ;;  %2574 = vmatmul.mubr.bf16.gmra.mxu1 %v9178_v37 }
  0x9d   : > { %v1135_v55 = vor.u32 %v1134_v39, %v1130_v27  ;;  %2429 = vmatmul.mubr.bf16.gmra.mxu0 %v9135_v47  ;;  %v599_v3 = vshll.u32 %v419_v60, 16  ;;  %v6649_v7 = vrot.slane %v9013_v5, 9  ;;  %v590_v22 = vrot.slane %v588_v23, 7  ;;  %2581 = vmatprep.mubr.bf16.mxu1 %v9135_v47  ;;  %v323_v39 = vld [vmem:[#allocation2 + $0x84] sm:$0x1] }
  0x9e   : > { %v1125_v30 = vor.u32 %v1124_v59, %v1121_v16  ;;  %v9187_v40 = vld [vmem:[#allocation2 + $0x6c] sm:$0xf]  ;;  %v598_v17 = vrot.slane %v596_v25, 7  ;;  %v1405_v28 = vrot.slane %v9007_v62, 5  ;;  %v1408_v5 = vrot.slane %v9015_v6, 5 }
  0x9f   : > { %v1136_v48 = vrot.slane %v1135_v55, 4  ;;  %v1143_v42 = vshrl.u32 %v9187_v40, 16  ;;  %v1146_v9 = vshll.u32 %v9187_v40, 16  ;;  %v593_v62 = vor.u32 %v591_v57, %v590_v22  ;;  %v379_v16 = vld [vmem:[#allocation2 + $0x8c] sm:$0x1] }
  0xa0   : > { %v1126_v52 = vrot.slane %v1125_v30, 4  ;;  %v820_v8 = vld [vmem:[#allocation2 + $0x78] sm:$0xf]  ;;  %v594_v2 = vrot.slane %v590_v22, 4  ;;  %v601_v33 = vor.u32 %v599_v3, %v598_v17  ;;  %v824_v25 = vld [vmem:[#allocation2 + $0x80] sm:$0x1]  ;;  %v1406_v57 = vsel %vm8553_vm13, %v6649_v7, %v1405_v28 }
  0xa1   : > { %v1141_v60 = vsel %vm8562_vm14, %v1136_v48, %v1140_v53  ;;  %v9197_v1 = vld [vmem:[#allocation2 + $0x70] sm:$0xf]  ;;  %v9199_v32 = vld [vmem:[#allocation2 + $0x74] sm:$0x1]  ;;  %v1145_v55 = vrot.slane %v1143_v42, 4  ;;  %v1148_v23 = vrot.slane %v1146_v9, 5 }
  0xa2   : > { %v1131_v59 = vsel %vm8562_vm14, %v1126_v52, %v1130_v27  ;;  %v1152_v6 = vshll.u32 %v9197_v1, 16  ;;  %v420_v30 = vld [vmem:[%s8490_s30 + $0x50] sm:$0xf]  ;;  %v1156_v48 = vshrl.u32 %v9197_v1, 16  ;;  %v1162_v47 = vshll.u32 %v9199_v32, 16 }
  0xa3   : > { %v9205_v53 = vcombine.low %v1131_v59, %v1141_v60  ;;  %v421_v3 = vld [vmem:[%s8490_s30 + $0x54] sm:$0xf]  ;;  %v1149_v22 = vor.u32 %v1148_v23, %v1145_v55  ;;  %v602_v27 = vsel %vm8537_vm12, %v594_v2, %v601_v33  ;;  %v603_v52 = vrot.slane %v598_v17, 4 }
  0xa4   : > { %v1154_v29 = vrot.slane %v1152_v6, 5  ;;  %v1158_v42 = vrot.slane %v1156_v48, 4  ;;  %v1164_v9 = vrot.slane %v1162_v47, 5  ;;  %v821_v60 = vsel %vm8528_vm11, %v593_v62, %v820_v8  ;;  %823 = vst [vmem:[#allocation2 + $0x7c] sm:$0xf] %v602_v27 }
  0xa5   : > { %2436 = vmatprep.mubr.bf16.mxu0 %v9205_v53  ;;  %v1407_v59 = vrot.slane %v1405_v28, 4  ;;  %v1150_v38 = vrot.slane %v1149_v22, 4  ;;  %822 = vst [vmem:[#allocation2 + $0x78] sm:$0xf] %v821_v60  ;;  %v825_v7 = vsel %vm8481_vm3, %v603_v52, %v824_v25  ;;  %v324_v2 = vsel %vm8481_vm3, 0, %v323_v39 }
  0xa6   : > { %2437 = vmatmul.mubr.bf16.gmra.mxu0 %v9184_v36  ;;  %v380_v17 = vsel %vm8499_vm6, 0, %v379_v16  ;;  %v1159_v33 = vor.u32 %v1158_v42, %v1154_v29  ;;  %826 = vst [vmem:[#allocation2 + $0x80] sm:$0x1] %v825_v7  ;;  %325 = vst [vmem:[#allocation2 + $0x84] sm:$0x1] %v324_v2  ;;  %v605_v28 = vshrl.u32 %v420_v30, 16  ;;  %v9233_v48 = vcombine.low %v9187_v40, %v9197_v1 }
  0xa7   : > { %v1409_v47 = vsel %vm8553_vm13, %v1407_v59, %v1408_v5  ;;  %381 = vst [vmem:[#allocation2 + $0x8c] sm:$0x1] %v380_v17  ;;  %v608_v8 = vshll.u32 %v420_v30, 16  ;;  %v613_v55 = vshrl.u32 %v421_v3, 16  ;;  %v616_v23 = vshll.u32 %v421_v3, 16 }
  0xa8   : > { %v9226_v62 = vcombine.low %v1406_v57, %v1409_v47  ;;  %v1155_v6 = vsel %vm8562_vm14, %v1150_v38, %v1154_v29  ;;  %v1160_v39 = vrot.slane %v1159_v33, 4  ;;  %v607_v25 = vrot.slane %v605_v28, 7  ;;  %11685 = vst [vmem:[#allocation19_spill] sm:$0xff] %v9233_v48 }
  0xa9   : > { %v1412_v16 = vrot.slane %v9125_v21, 5  ;;  %v615_v5 = vrot.slane %v613_v55, 7  ;;  %v6650_v30 = vrot.slane %v9100_v58, 9  ;;  %v1419_v57 = vrot.slane %v9150_v12, 5 }
  0xaa   : > { %2582 = vmatmul.mubr.bf16.gmra.mxu1 %v9226_v62  ;;  %v1165_v3 = vsel %vm8562_vm14, %v1160_v39, %v1164_v9  ;;  %v610_v22 = vor.u32 %v608_v8, %v607_v25  ;;  %v611_v38 = vrot.slane %v607_v25, 4  ;;  %v1415_v29 = vrot.slane %v9106_v35, 5 }
  0xab   : > { %2589 = vmatprep.mubr.bf16.mxu1 %v9184_v36  ;;  %v9242_v21 = vcombine.low %v1155_v6, %v1165_v3  ;;  %v9244_v27 = vld [vmem:[#allocation2 + $0x7c] sm:$0xf]  ;;  %v618_v52 = vor.u32 %v616_v23, %v615_v5  ;;  %v620_v42 = vrot.slane %v615_v5, 4  ;;  %v1414_v60 = vrot.slane %v1412_v16, 4 }
  0xac   : > { %v9246_v59 = vld [vmem:[#allocation2 + $0x78] sm:$0xf]  ;;  %v1176_v58 = vshll.u32 %v9244_v27, 16  ;;  %v1180_v12 = vshrl.u32 %v9244_v27, 16  ;;  %v6651_v9 = vrot.slane %v9161_v50, 9  ;;  %v1421_v7 = vrot.slane %v1419_v57, 4 }
  0xad   : > { %2444 = vmatprep.mubr.bf16.mxu0 %v9242_v21  ;;  %v9252_v2 = vld [vmem:[#allocation2 + $0x80] sm:$0x1]  ;;  %v1167_v35 = vshrl.u32 %v9246_v59, 16  ;;  %v1170_v17 = vshll.u32 %v9246_v59, 16  ;;  %v619_v33 = vsel %vm8537_vm12, %v611_v38, %v618_v52  ;;  %v827_v47 = vld [vmem:[#allocation2 + $0x84] sm:$0xf]  ;;  %v1413_v28 = vsel %vm8553_vm13, %v6650_v30, %v1412_v16 }
  0xae   : > { %2445 = vmatmul.mubr.bf16.gmra.mxu0 %v9233_v48  ;;  %v1178_v8 = vrot.slane %v1176_v58, 5  ;;  %v1182_v50 = vrot.slane %v1180_v12, 4  ;;  %v1186_v55 = vshll.u32 %v9252_v2, 16  ;;  %v828_v23 = vsel %vm8528_vm11, %v610_v22, %v827_v47  ;;  %830 = vst [vmem:[#allocation2 + $0x88] sm:$0xf] %v619_v33 }
  0xaf   : > { %v831_v6 = vld [vmem:[#allocation2 + $0x8c] sm:$0x1]  ;;  %v1169_v39 = vrot.slane %v1167_v35, 4  ;;  %v1172_v25 = vrot.slane %v1170_v17, 5  ;;  %829 = vst [vmem:[#allocation2 + $0x84] sm:$0xf] %v828_v23  ;;  %v1416_v16 = vsel %vm8553_vm13, %v1414_v60, %v1415_v29  ;;  %v9285_v17 = vcombine.low %v9246_v59, %v9244_v27 }
  0xb0   : > { %v832_v5 = vsel %vm8481_vm3, %v620_v42, %v831_v6  ;;  %v1183_v30 = vor.u32 %v1182_v50, %v1178_v8  ;;  %v1188_v3 = vrot.slane %v1186_v55, 5  ;;  %v9268_v38 = vcombine.low %v1413_v28, %v1416_v16 }
  0xb1   : > { %833 = vst [vmem:[#allocation2 + $0x8c] sm:$0x1] %v832_v5  ;;  %v1422_v52 = vrot.slane %v9163_v49, 5  ;;  %v1173_v58 = vor.u32 %v1172_v25, %v1169_v39  ;;  %v1426_v22 = vrot.slane %v9197_v1, 5  ;;  %v1420_v42 = vsel %vm8553_vm13, %v6651_v9, %v1419_v57  ;;  %11686 = vst [vmem:[#allocation20_spill] sm:$0xff] %v9285_v17 }
  0xb2   : > { %v1184_v12 = vrot.slane %v1183_v30, 4  ;;  %2590 = vmatmul.mubr.bf16.gmra.mxu1 %v9268_v38  ;;  %v6652_v49 = vrot.slane %v9187_v40, 9  ;;  %v1429_v57 = vrot.slane %v9199_v32, 5  ;;  %v1433_v25 = vrot.slane %v9244_v27, 5 }
  0xb3   : > { %v1174_v35 = vrot.slane %v1173_v58, 4  ;;  %2597 = vmatprep.mubr.bf16.mxu1 %v9233_v48  ;;  %v1423_v29 = vsel %vm8553_vm13, %v1421_v7, %v1422_v52  ;;  %v1428_v47 = vrot.slane %v1426_v22, 4 }
  0xb4   : > { %v1189_v60 = vsel %vm8562_vm14, %v1184_v12, %v1188_v3  ;;  %v9296_v50 = vcombine.low %v1420_v42, %v1423_v29  ;;  %v1427_v58 = vsel %vm8553_vm13, %v6652_v49, %v1426_v22  ;;  %v430_v42 = vld [vmem:[%s8490_s30 + $0x78] sm:$0xf]  ;;  %v9320_v49 = vld [vmem:[#allocation2 + $0x94] sm:$0xf]  ;;  %v9360_v22 = vld [vmem:[#allocation2 + $0xa8] sm:$0xf] }
  0xb5   : > { %v1179_v1 = vsel %vm8562_vm14, %v1174_v35, %v1178_v8  ;;  %v9287_v33 = vld [vmem:[#allocation2 + $0x88] sm:$0xf]  ;;  %v1430_v12 = vsel %vm8553_vm13, %v1428_v47, %v1429_v57  ;;  %v338_v35 = vld [vmem:[#allocation2 + $0xc0] sm:$0x1]  ;;  %v11610_v47 = vrot.slane %v9320_v49, 5 }
  0xb6   : > { %v9290_v9 = vcombine.low %v1179_v1, %v1189_v60  ;;  %v9292_v7 = vld [vmem:[#allocation2 + $0x84] sm:$0xf]  ;;  %v1200_v28 = vshll.u32 %v9287_v33, 16  ;;  %v1204_v40 = vshrl.u32 %v9287_v33, 16  ;;  %v11611_v27 = vrot.slane %v9287_v33, 5 }
  0xb7   : > { %v1191_v55 = vshrl.u32 %v9292_v7, 16  ;;  %v1194_v23 = vshll.u32 %v9292_v7, 16  ;;  %v6653_v60 = vrot.slane %v9246_v59, 9  ;;  %v1435_v1 = vrot.slane %v1433_v25, 4  ;;  %v431_v57 = vld [vmem:[%s8490_s30 + $0x7c] sm:$0xf] }
  0xb8   : > { %v9298_v8 = vld [vmem:[#allocation2 + $0x8c] sm:$0x1]  ;;  %2452 = vmatprep.mubr.bf16.mxu0 %v9290_v9  ;;  %v1202_v6 = vrot.slane %v1200_v28, 5  ;;  %v1206_v32 = vrot.slane %v1204_v40, 4  ;;  %v1436_v28 = vrot.slane %v9252_v2, 5  ;;  %v9332_v2 = vcombine.low %v9292_v7, %v9287_v33 }
  0xb9   : > { %v1210_v39 = vshll.u32 %v9298_v8, 16  ;;  %2453 = vmatmul.mubr.bf16.gmra.mxu0 %v9285_v17  ;;  %v1193_v5 = vrot.slane %v1191_v55, 4  ;;  %v1196_v16 = vrot.slane %v1194_v23, 5  ;;  %v6654_v55 = vrot.slane %v9292_v7, 9  ;;  %v9317_v23 = vld [vmem:[#allocation2 + $0x90] sm:$0xf] }
  0xba   : > { %v1207_v30 = vor.u32 %v1206_v32, %v1202_v6  ;;  %2598 = vmatmul.mubr.bf16.gmra.mxu1 %v9296_v50  ;;  %11687 = vst [vmem:[#allocation21_spill] sm:$0xff] %v9332_v2  ;;  %v9345_v7 = vld [vmem:[#allocation2 + $0xa0] sm:$0xf] }
  0xbb   : > { %v1212_v3 = vrot.slane %v1210_v39, 5  ;;  %v1197_v52 = vor.u32 %v1196_v16, %v1193_v5  ;;  %2605 = vmatprep.mubr.bf16.mxu1 %v9285_v17  ;;  %v9326_v39 = vcombine.low %v1427_v58, %v1430_v12  ;;  %v1442_v5 = vrot.slane %v11611_v27, 4  ;;  %v394_v58 = vld [vmem:[#allocation2 + $0xc8] sm:$0x1]  ;;  %v9372_v17 = vld [vmem:[#allocation2 + $0xac] sm:$0xf] }
  0xbc   : > { %v1208_v29 = vrot.slane %v1207_v30, 4  ;;  %v1443_v16 = vrot.slane %v9298_v8, 5  ;;  %v1434_v12 = vsel %vm8553_vm13, %v6653_v60, %v1433_v25  ;;  %v1449_v8 = vrot.slane %v11610_v47, 4  ;;  %v8370_v25 = vld [vmem:[#allocation2 + $0x98] sm:$0x1] }
  0xbd   : > { %v1198_v40 = vrot.slane %v1197_v52, 4  ;;  %v339_v52 = vsel %vm8481_vm3, 0, %v338_v35  ;;  %v1450_v60 = vrot.slane %v8370_v25, 5 }
  0xbe   : > { %v1213_v32 = vsel %vm8562_vm14, %v1208_v29, %v1212_v3  ;;  %v690_v3 = vshrl.u32 %v430_v42, 16  ;;  %v11616_v29 = vrot.slane %v9345_v7, 5  ;;  %340 = vst [vmem:[#allocation2 + $0xc0] sm:$0x1] %v339_v52  ;;  %v11615_v52 = vrot.slane %v9372_v17, 5 }
  0xbf   : > { %v1203_v59 = vsel %vm8562_vm14, %v1198_v40, %v1202_v6  ;;  %v1437_v6 = vsel %vm8553_vm13, %v1435_v1, %v1436_v28  ;;  %v693_v40 = vshll.u32 %v430_v42, 16  ;;  %v9354_v1 = vld [vmem:[#allocation2 + $0x9c] sm:$0xf]  ;;  %v9357_v28 = vld [vmem:[#allocation2 + $0xa4] sm:$0x1]  ;;  %v395_v42 = vsel %vm8499_vm6, 0, %v394_v58 }
  0xc0   : > { %v9337_v30 = vcombine.low %v1203_v59, %v1213_v32  ;;  %v692_v35 = vrot.slane %v690_v3, 7  ;;  %v698_v32 = vshrl.u32 %v431_v57, 16  ;;  %v701_v59 = vshll.u32 %v431_v57, 16  ;;  %396 = vst [vmem:[#allocation2 + $0xc8] sm:$0x1] %v395_v42 }
  0xc1   : > { %v9366_v27 = vrot.slane %v11616_v29, 4 }
  0xc2   : > { %2460 = vmatprep.mubr.bf16.mxu0 %v9337_v30  ;;  %2606 = vmatmul.mubr.bf16.gmra.mxu1 %v9326_v39  ;;  %v696_v57 = vrot.slane %v692_v35, 4  ;;  %v700_v47 = vrot.slane %v698_v32, 7  ;;  %v695_v25 = vor.u32 %v693_v40, %v692_v35  ;;  %v8375_v35 = vld [vmem:[%s11592_s1 + $0x238] sm:$0xff]  }
  0xc3   : > { %2461 = vmatmul.mubr.bf16.gmra.mxu0 %v9332_v2  ;;  %2613 = vmatprep.mubr.bf16.mxu1 %v9332_v2  ;;  %v9370_v2 = vcombine.low %v1434_v12, %v1437_v6  ;;  %v8235_v6 = vld [vmem:[%s11592_s1 + $0x228] sm:$0xff]  }
  0xc4   : > { %2694 = vmatprep.mubr.bf16.mxu0 %v8945_v14  ;;  %v703_v48 = vor.u32 %v701_v59, %v700_v47  ;;  %v705_v3 = vrot.slane %v700_v47, 4  ;;  %v8232_v14 = vld [vmem:[%s11592_s1 + $0x230] sm:$0xff]   ;;  %v11688_v47 = vrot.slane %v9287_v33, 5  ;;  %v11690_v59 = vrot.slane %v9317_v23, 9 }
  0xc5   : > { %v862_v40 = vld [vmem:[#allocation2 + $0xc0] sm:$0xf] }
  0xc6   : > { %v704_v32 = vsel %vm8537_vm12, %v696_v57, %v703_v48  ;;  %v863_v58 = vsel %vm8528_vm11, %v695_v25, %v862_v40  ;;  %v1441_v12 = vsel %vm8553_vm13, %v6654_v55, %v11688_v47  ;;  %v1444_v48 = vsel %vm8553_vm13, %v1442_v5, %v1443_v16  ;;  %v8239_v5 = vld [vmem:[%s11592_s1 + $0x220] sm:$0xff]  }
  0xc7   : > { %865 = vst [vmem:[#allocation2 + $0xc4] sm:$0xf] %v704_v32  ;;  %864 = vst [vmem:[#allocation2 + $0xc0] sm:$0xf] %v863_v58  ;;  %v9398_v33 = vcombine.low %v1441_v12, %v1444_v48  ;;  %v11689_v16 = vrot.slane %v9320_v49, 5  ;;  %v1451_v57 = vsel %vm8553_vm13, %v1449_v8, %v1450_v60  ;;  %v1463_v8 = vrot.slane %v11615_v52, 4 }
  0xc8   : > { %v9431_v12 = vld [vmem:[#allocation2 + $0xb8] sm:$0xf] }
  0xc9   : > { %v1448_v42 = vsel %vm8553_vm13, %v11690_v59, %v11689_v16  ;;  %v1468_v48 = vrot.slane %v9431_v12, 5 }
  0xca   : > { %2614 = vmatmul.mubr.bf16.gmra.mxu1 %v9370_v2  ;;  %v9440_v44 = vcombine.low %v1448_v42, %v1451_v57 }
  0xcb   : > { %2695 = vmatmul.mubr.bf16.vlgmr.msra.gmra.mxu0 %v8698_v46  ;;  %2621 = vmatprep.mubr.bf16.mxu1 %v8620_v24  ;;  %v866_v46 = vld [vmem:[#allocation2 + $0xc8] sm:$0x1] }
  0xcc   : > { %7995 = vmatpush3.bf16.msra.mxu0 %v8375_v35  ;;  %2702 = vmatprep.mubr.bf16.mxu0 %v9018_v11  ;;  %v867_v55 = vsel %vm8481_vm3, %v705_v3, %v866_v46  ;;  %v9415_v3 = vld [vmem:[#allocation2 + $0xb0] sm:$0x1]  ;;  %v8248_v35 = vld [vmem:[%s11592_s1 + $0x218] sm:$0xff]  }
  0xcd   : > { %7996 = vmatprep.subr.bf16.mxu0 %v8232_v14  ;;  %868 = vst [vmem:[#allocation2 + $0xc8] sm:$0x1] %v867_v55  ;;  %v8379_v11 = vld [vmem:[#allocation2 + $0xbc] sm:$0x1] }
  0xce   : > { %v9413_v25 = vld [vmem:[#allocation2 + $0xc4] sm:$0xf]  ;;  %v9418_v40 = vld [vmem:[#allocation2 + $0xc0] sm:$0xf] }
  0xcf   : > { %v1502_v49 = vrot.slane %v9413_v25, 5  ;;  %v1483_v23 = vshll.u32 %v9413_v25, 16  ;;  %v1474_v60 = vshrl.u32 %v9418_v40, 16  ;;  %v1477_v58 = vshll.u32 %v9418_v40, 16 }
  0xd0   : > { %7997 = vmatpush3.bf16.msra.mxu0 %v8232_v14  ;;  %v1487_v14 = vshrl.u32 %v9413_v25, 16  ;;  %v6659_v47 = vrot.slane %v9418_v40, 9 }
  0xd1   : > { %7998 = vmatprep.subr.bf16.mxu0 %v8235_v6  ;;  %v1504_v46 = vrot.slane %v1502_v49, 4  ;;  %v1485_v55 = vrot.slane %v1483_v23, 5  ;;  %v1476_v32 = vrot.slane %v1474_v60, 4  ;;  %v1479_v52 = vrot.slane %v1477_v58, 5 }
  0xd2   : > { %2622 = vmatmul.mubr.bf16.gmra.mxu1 %v9398_v33  ;;  %v1489_v16 = vrot.slane %v1487_v14, 4  ;;  %v1503_v59 = vsel %vm8553_vm13, %v6659_v47, %v1502_v49  ;;  %v8249_v14 = vld [vmem:[%s11592_s1 + $0x210] sm:$0xff]   ;;  %v1471_v49 = vrot.slane %v8379_v11, 5  ;;  %v1470_v58 = vrot.slane %v1468_v48, 4  ;;  %v8250_v47 = vld [vmem:[%s11592_s1 + $0x208] sm:$0xff]  }
  0xd3   : > { %2703 = vmatmul.mubr.bf16.gmra.mxu0 %v8814_v61  ;;  %2629 = vmatprep.mubr.bf16.mxu1 %v8731_v10  ;;  %v1480_v41 = vor.u32 %v1479_v52, %v1476_v32  ;;  %v8378_v10 = vld [vmem:[#allocation2 + $0xb4] sm:$0xf]  ;;  %v11691_v11 = vrot.slane %v9345_v7, 5 }
  0xd4   : > { %2710 = vmatprep.mubr.bf16.mxu0 %v9085_v31  ;;  %7999 = vmatpush3.bf16.msra.mxu0 %v8235_v6  ;;  %v1490_v29 = vor.u32 %v1489_v16, %v1485_v55  ;;  %v919_v12 = vld [vmem:[#allocation2 + $0xc8] sm:$0x1]  ;;  %v6658_v24 = vrot.slane %v8378_v10, 9 }
  0xd5   : > { %8000 = vmatprep.subr.bf16.mxu0 %v8239_v5  ;;  %v1505_v23 = vrot.slane %v919_v12, 5  ;;  %v1493_v6 = vshll.u32 %v919_v12, 16  ;;  %v1481_v60 = vrot.slane %v1480_v41, 4  ;;  %v11692_v41 = vrot.slane %v9354_v1, 9 }
  0xd6   : > { %v1491_v31 = vrot.slane %v1490_v29, 4  ;;  %v9496_v12 = vcombine.low %v9418_v40, %v9413_v25 }
  0xd7   : > { %v1506_v42 = vsel %vm8553_vm13, %v1504_v46, %v1505_v23  ;;  %v1495_v57 = vrot.slane %v1493_v6, 5  ;;  %v1486_v52 = vsel %vm8562_vm14, %v1481_v60, %v1485_v55  ;;  %v1455_v29 = vsel %vm8553_vm13, %v11692_v41, %v11691_v11  ;;  %v397_v23 = vld [vmem:[#allocation2 + $0xd4] sm:$0x1] }
  0xd8   : > { %8001 = vmatpush3.bf16.msra.mxu0 %v8239_v5  ;;  %v9448_v10 = vcombine.low %v1503_v59, %v1506_v42  ;;  %v11693_v5 = vrot.slane %v9357_v28, 5  ;;  %v8251_v28 = vld [vmem:[%s11592_s1 + $0x200] sm:$0xff]   ;;  %v11696_v55 = vrot.slane %v9415_v3, 5  ;;  %v341_v3 = vld [vmem:[#allocation2 + $0xcc] sm:$0x1] }
  0xd9   : > { %8002 = vmatprep.subr.bf16.mxu0 %v8248_v35  ;;  %v1496_v46 = vsel %vm8562_vm14, %v1491_v31, %v1495_v57  ;;  %v11694_v31 = vrot.slane %v9372_v17, 5  ;;  %v1469_v17 = vsel %vm8553_vm13, %v6658_v24, %v1468_v48  ;;  %v342_v25 = vsel %vm8481_vm3, 0, %v341_v3 }
  0xda   : > { %2630 = vmatmul.mubr.bf16.gmra.mxu1 %v9440_v44  ;;  %v1458_v32 = vsel %vm8553_vm13, %v9366_v27, %v11693_v5  ;;  %v9471_v7 = vcombine.low %v1486_v52, %v1496_v46  ;;  %v11695_v27 = vrot.slane %v9360_v22, 9  ;;  %v1465_v16 = vsel %vm8553_vm13, %v1463_v8, %v11696_v55  ;;  %343 = vst [vmem:[#allocation2 + $0xcc] sm:$0x1] %v342_v25 }
  0xdb   : > { %2711 = vmatmul.mubr.bf16.gmra.mxu0 %v8873_v0  ;;  %2637 = vmatprep.mubr.bf16.mxu1 %v8844_v54  ;;  %v9473_v1 = vcombine.low %v1455_v29, %v1458_v32  ;;  %v1472_v22 = vsel %vm8553_vm13, %v1470_v58, %v1471_v49  ;;  %v398_v24 = vsel %vm8499_vm6, 0, %v397_v23  ;;  %v11697_v32 = vld [vmem:[#allocation14_spill] sm:$0xff] }
  0xdc   : > { %2718 = vmatprep.mubr.bf16.mxu0 %v9121_v45  ;;  %8003 = vmatpush3.bf16.msra.mxu0 %v8248_v35  ;;  %v1462_v35 = vsel %vm8553_vm13, %v11695_v27, %v11694_v31  ;;  %v9506_v8 = vcombine.low %v1469_v17, %v1472_v22  ;;  %399 = vst [vmem:[#allocation2 + $0xd4] sm:$0x1] %v398_v24  ;;  %v11700_v17 = vld [vmem:[#allocation9_spill] sm:$0xff]  ;;  %v11701_v24 = vld [vmem:[#allocation11_spill] sm:$0xff] }
  0xdd   : > { %8004 = vmatprep.subr.bf16.mxu0 %v8249_v14  ;;  %v9492_v59 = vcombine.low %v1462_v35, %v1465_v16  ;;  %v11699_v16 = vld [vmem:[#allocation18_spill] sm:$0xff] }
  0xe0   : > { %8005 = vmatpush3.bf16.msra.mxu0 %v8249_v14 }
  0xe1   : > { %8006 = vmatprep.subr.bf16.mxu0 %v8250_v47 }
  0xe2   : > { %2638 = vmatmul.mubr.bf16.gmra.mxu1 %v9473_v1 }
  0xe3   : > { %2719 = vmatmul.mubr.bf16.gmra.mxu0 %v9005_v20  ;;  %2645 = vmatprep.mubr.bf16.mxu1 %v8875_v4 }
  0xe4   : > { %2726 = vmatprep.mubr.bf16.mxu0 %v9178_v37  ;;  %8007 = vmatpush3.bf16.msra.mxu0 %v8250_v47 }
  0xe5   : > { %8008 = vmatprep.subr.bf16.mxu0 %v8251_v28 }
  0xe8   : > { %8009 = vmatpush3.bf16.msra.mxu0 %v8251_v28  ;;  %v11698_v28 = vld [vmem:[#allocation16_spill] sm:$0xff] }
  0xea   : > { %2646 = vmatmul.mubr.bf16.gmra.mxu1 %v9492_v59 }
  0xeb   : > { %2727 = vmatmul.mubr.bf16.gmra.mxu0 %v9044_v19  ;;  %2653 = vmatprep.mubr.bf16.mxu1 %v9496_v12 }
  0xec   : > { %2734 = vmatprep.mubr.bf16.mxu0 %v9226_v62  ;;  %v7042_v40 = vpop.f32.mrf.mxu0 }
  0xee   : > { %v7043_v14 = vpop.f32.mrf.mxu0 }
  0xef   : > { %v9511_v6 = vadd.f32 %v7043_v14, %v7042_v40 }
  0xf0   : > { %v9524_v58 = vpop.f32.mrf.mxu0 }
  0xf2   : > { %2654 = vmatmul.mubr.bf16.gmra.mxu1 %v9506_v8  ;;  %v9529_v52 = vpop.f32.mrf.mxu0 }
  0xf3   : > { %2735 = vmatmul.mubr.bf16.gmra.mxu0 %v9072_v43  ;;  %2855 = vmatprep.mubr.bf16.mxu1 %v8814_v61 }
  0xf4   : > { %2742 = vmatprep.mubr.bf16.mxu0 %v9268_v38 }
  0xf6   : > { %v7114_v48 = vpop.f32.mrf.mxu1 }
  0xf8   : > { %v7115_v49 = vpop.f32.mrf.mxu1 }
  0xf9   : > { %v9522_v60 = vadd.f32 %v7115_v49, %v7114_v48  ;;  %v8253_v48 = vld [vmem:[%s11594_s3 + $0x78] sm:$0xff]  }
  0xfa   : > { %2856 = vmatmul.mubr.bf16.vlgmr.msra.gmra.mxu1 %v8806_v51  ;;  %v7117_v42 = vpop.f32.mrf.mxu1  ;;  %v8254_v49 = vld [vmem:[%s11594_s3 + $0x38] sm:$0xff]   ;;  %7498 = vmatprep.subr.bf16.mxu1 %v8253_v48 }
  0xfb   : > { %2743 = vmatmul.mubr.bf16.gmra.mxu0 %v9176_v34  ;;  %2863 = vmatprep.mubr.bf16.mxu1 %v8873_v0 }
  0xfc   : > { %2750 = vmatprep.mubr.bf16.mxu0 %v9296_v50  ;;  %v7118_v57 = vpop.f32.mrf.mxu1  ;;  %7499 = vmatpush3.bf16.msra.mxu1 %v8254_v49 }
  0xfd   : > { %v9526_v61 = vadd.f32 %v7118_v57, %v7117_v42 }
 0x102   : > { %2864 = vmatmul.mubr.bf16.gmra.mxu1 %v8868_v15  ;;  %v7048_v51 = vpop.f32.mrf.mxu0 }
 0x103   : > { %2751 = vmatmul.mubr.bf16.gmra.mxu0 %v9205_v53  ;;  %2871 = vmatprep.mubr.bf16.mxu1 %v9005_v20 }
 0x104   : > { %2758 = vmatprep.mubr.bf16.mxu0 %v9326_v39  ;;  %v7049_v0 = vpop.f32.mrf.mxu0 }
 0x105   : > { %v9534_v11 = vadd.f32 %v7049_v0, %v7048_v51 }
 0x106   : > { %v9542_v20 = vpop.f32.mrf.mxu0 }
 0x108   : > { %v7120_v15 = vpop.f32.mrf.mxu1 }
 0x10a   : > { %2872 = vmatmul.mubr.bf16.gmra.mxu1 %v8957_v26  ;;  %v7121_v41 = vpop.f32.mrf.mxu1 }
 0x10b   : > { %2759 = vmatmul.mubr.bf16.gmra.mxu0 %v9242_v21  ;;  %2879 = vmatprep.mubr.bf16.mxu1 %v9044_v19  ;;  %v9540_v29 = vadd.f32 %v7121_v41, %v7120_v15  ;;  %v9550_v19 = vpop.f32.mrf.mxu0  ;;  %v11702_v41 = vld [vmem:[#allocation19_spill] sm:$0xff] }
 0x10c   : > { %2766 = vmatprep.mubr.bf16.mxu0 %v9370_v2  ;;  %v7123_v5 = vpop.f32.mrf.mxu1 }
 0x10e   : > { %v7124_v47 = vpop.f32.mrf.mxu1 }
 0x10f   : > { %v9547_v26 = vadd.f32 %v7124_v47, %v7123_v5 }
 0x112   : > { %2880 = vmatmul.mubr.bf16.gmra.mxu1 %v11697_v32  ;;  %v11703_v32 = vld [vmem:[#allocation12_spill] sm:$0xff] }
 0x113   : > { %2767 = vmatmul.mubr.bf16.gmra.mxu0 %v9290_v9  ;;  %2887 = vmatprep.mubr.bf16.mxu1 %v9072_v43 }
 0x114   : > { %2774 = vmatprep.mubr.bf16.mxu0 %v9398_v33 }
 0x116   : > { %v7054_v46 = vpop.f32.mrf.mxu0 }
 0x118   : > { %v7055_v31 = vpop.f32.mrf.mxu0 }
 0x119   : > { %v9556_v27 = vadd.f32 %v7055_v31, %v7054_v46 }
 0x11a   : > { %2888 = vmatmul.mubr.bf16.gmra.mxu1 %v11698_v28  ;;  %v7057_v35 = vpop.f32.mrf.mxu0  ;;  %v9593_v28 = vld [vmem:[%s11593_s2] ss:$0 sm:$0xff] }
 0x11b   : > { %2775 = vmatmul.mubr.bf16.gmra.mxu0 %v9337_v30  ;;  %2895 = vmatprep.mubr.bf16.mxu1 %v9176_v34 }
 0x11c   : > { %2782 = vmatprep.mubr.bf16.mxu0 %v9440_v44  ;;  %v7058_v43 = vpop.f32.mrf.mxu0 }
 0x11d   : > { %v9558_v55 = vadd.f32 %v7058_v43, %v7057_v35  ;;  %v2375_v43 = vadd.f32 %v9511_v6, %v9593_v28  ;;  %v8255_v6 = vld [vmem:[%s11594_s3 + $0x70] sm:$0xff]  }
 0x11e   : > { %7500 = vmatprep.subr.bf16.mxu1 %v8255_v6 }
 0x121   : > { %v7126_v22 = vpop.f32.mrf.mxu1 }
 0x122   : > { %2896 = vmatmul.mubr.bf16.gmra.mxu1 %v11699_v16  ;;  %v7047_v16 = vadd.f32 %v9529_v52, %v9524_v58  ;;  %v8256_v58 = vld [vmem:[%s11594_s3 + $0x30] sm:$0xff]  }
 0x123   : > { %2783 = vmatmul.mubr.bf16.gmra.mxu0 %v11700_v17  ;;  %2903 = vmatprep.mubr.bf16.mxu1 %v9205_v53  ;;  %v7127_v3 = vpop.f32.mrf.mxu1 }
 0x124   : > { %2790 = vmatprep.mubr.bf16.mxu0 %v9473_v1  ;;  %v9564_v34 = vadd.f32 %v7127_v3, %v7126_v22  ;;  %v2378_v52 = vadd.f32 %v7047_v16, %v9593_v28  ;;  %7501 = vmatpush3.bf16.msra.mxu1 %v8256_v58 }
 0x125   : > { %v7129_v25 = vpop.f32.mrf.mxu1 }
 0x127   : > { %v7130_v40 = vpop.f32.mrf.mxu1 }
 0x128   : > { %v9567_v14 = vadd.f32 %v7130_v40, %v7129_v25  ;;  %v7060_v23 = vpop.f32.mrf.mxu0  ;;  %v11705_v25 = vld [vmem:[#allocation13_spill] sm:$0xff] }
 0x12a   : > { %2904 = vmatmul.mubr.bf16.gmra.mxu1 %v9184_v36  ;;  %v7061_v53 = vpop.f32.mrf.mxu0 }
 0x12b   : > { %2791 = vmatmul.mubr.bf16.gmra.mxu0 %v11701_v24  ;;  %2911 = vmatprep.mubr.bf16.mxu1 %v9242_v21  ;;  %v9578_v42 = vadd.f32 %v7061_v53, %v7060_v23 }
 0x12c   : > { %2798 = vmatprep.mubr.bf16.mxu0 %v9492_v59  ;;  %v7132_v36 = vpop.f32.mrf.mxu1  ;;  %v7063_v57 = vpop.f32.mrf.mxu0 }
 0x12e   : > { %v7133_v51 = vpop.f32.mrf.mxu1  ;;  %v7064_v0 = vpop.f32.mrf.mxu0 }
 0x12f   : > { %v9580_v21 = vadd.f32 %v7133_v51, %v7132_v36  ;;  %v9582_v15 = vadd.f32 %v7064_v0, %v7063_v57  ;;  %v2383_v57 = vadd.f32 %v9534_v11, %v9593_v28  ;;  %v7053_v51 = vadd.f32 %v9550_v19, %v9542_v20 }
 0x130   : > { %v7135_v5 = vpop.f32.mrf.mxu1 }
 0x132   : > { %2912 = vmatmul.mubr.bf16.gmra.mxu1 %v11702_v41  ;;  %v7136_v47 = vpop.f32.mrf.mxu1 }
 0x133   : > { %2799 = vmatmul.mubr.bf16.gmra.mxu0 %v11703_v32  ;;  %2919 = vmatprep.mubr.bf16.mxu1 %v9290_v9  ;;  %v9588_v46 = vadd.f32 %v7136_v47, %v7135_v5  ;;  %v11704_v9 = vld [vmem:[#allocation20_spill] sm:$0xff]  ;;  %v11706_v5 = vld [vmem:[#allocation21_spill] sm:$0xff] }
 0x134   : > { %2806 = vmatprep.mubr.bf16.mxu0 %v9506_v8  ;;  %v7154_v31 = vpop.f32.mrf.mxu1 }
 0x136   : > { %v7155_v35 = vpop.f32.mrf.mxu1 }
 0x137   : > { %v7156_v22 = vadd.f32 %v7155_v35, %v7154_v31 }
 0x138   : > { %v7157_v3 = vpop.f32.mrf.mxu1 }
 0x139   : > { %v9601_v40 = vadd.f32 %v7156_v22, %v2375_v43  ;;  %v11707_v43 = vld [vmem:[#allocation15_spill] sm:$0xff]  ;;  %v2386_v22 = vadd.f32 %v7053_v51, %v9593_v28 }
 0x13a   : > { %2920 = vmatmul.mubr.bf16.gmra.mxu1 %v11704_v9  ;;  %v7158_v23 = vpop.f32.mrf.mxu1 }
 0x13b   : > { %2807 = vmatmul.mubr.bf16.gmra.mxu0 %v11705_v25  ;;  %2927 = vmatprep.mubr.bf16.mxu1 %v9337_v30  ;;  %v7159_v53 = vadd.f32 %v7158_v23, %v7157_v3 }
 0x13c   : > { %2814 = vmatprep.mubr.bf16.mxu0 %v9448_v10  ;;  %v7160_v48 = vpop.f32.mrf.mxu1 }
 0x13d   : > { %v9612_v49 = vadd.f32 %v7159_v53, %v2378_v52  ;;  %v2391_v52 = vadd.f32 %v9556_v27, %v9593_v28  ;;  %v8257_v27 = vld [vmem:[%s11594_s3 + $0x68] sm:$0xff]  }
 0x13e   : > { %v7161_v36 = vpop.f32.mrf.mxu1  ;;  %7502 = vmatprep.subr.bf16.mxu1 %v8257_v27 }
 0x13f   : > { %v7066_v30 = vpop.f32.mrf.mxu0  ;;  %v7162_v0 = vadd.f32 %v7161_v36, %v7160_v48  ;;  %v11708_v48 = vld [vmem:[#allocation8_spill] sm:$0xff]  ;;  %v11709_v36 = vld [vmem:[#allocation17_spill] sm:$0xff] }
 0x140   : > { %v7163_v47 = vpop.f32.mrf.mxu1 }
 0x141   : > { %v7067_v41 = vpop.f32.mrf.mxu0  ;;  %v9622_v35 = vadd.f32 %v7162_v0, %v2383_v57 }
 0x142   : > { %2928 = vmatmul.mubr.bf16.gmra.mxu1 %v11706_v5  ;;  %v9620_v31 = vadd.f32 %v7067_v41, %v7066_v30  ;;  %v7164_v11 = vpop.f32.mrf.mxu1  ;;  %v8258_v5 = vld [vmem:[%s11594_s3 + $0x28] sm:$0xff]  }
 0x143   : > { %2815 = vmatmul.mubr.bf16.gmra.mxu0 %v9471_v7  ;;  %2935 = vmatprep.mubr.bf16.mxu1 %v11700_v17  ;;  %v7069_v16 = vpop.f32.mrf.mxu0  ;;  %v7165_v20 = vadd.f32 %v7164_v11, %v7163_v47  ;;  %v2394_v47 = vadd.f32 %v9558_v55, %v9593_v28 }
 0x144   : > { %8010 = vmatprep.mubr.bf16.mxu0 %v11707_v43  ;;  %v7166_v9 = vpop.f32.mrf.mxu1  ;;  %7503 = vmatpush3.bf16.msra.mxu1 %v8258_v5 }
 0x145   : > { %v7070_v19 = vpop.f32.mrf.mxu0  ;;  %v9629_v23 = vadd.f32 %v7165_v20, %v2386_v22 }
 0x146   : > { %v9627_v3 = vadd.f32 %v7070_v19, %v7069_v16  ;;  %v7167_v58 = vpop.f32.mrf.mxu1  ;;  %v2399_v19 = vadd.f32 %v9578_v42, %v9593_v28 }
 0x147   : > { %v7072_v6 = vpop.f32.mrf.mxu0  ;;  %v7168_v53 = vadd.f32 %v7167_v58, %v7166_v9  ;;  %v9657_v58 = vld [vmem:[#allocation2 + $0xd0] sm:$0xf] }
 0x148   : > { %v7169_v30 = vpop.f32.mrf.mxu1  ;;  %v1521_v27 = vshrl.u32 %v9657_v58, 16 }
 0x149   : > { %v7073_v17 = vpop.f32.mrf.mxu0  ;;  %v9637_v51 = vadd.f32 %v7168_v53, %v2391_v52  ;;  %v11710_v52 = vld [vmem:[#allocation10_spill] sm:$0xff] }
 0x14a   : > { %2936 = vmatmul.mubr.bf16.gmra.mxu1 %v11708_v48  ;;  %v9635_v57 = vadd.f32 %v7073_v17, %v7072_v6  ;;  %v7170_v41 = vpop.f32.mrf.mxu1  ;;  %v9655_v6 = vld [vmem:[#allocation2 + $0xcc] sm:$0xf] }
 0x14b   : > { %8011 = vmatmul.mubr.bf16.vlgmr.msra.gmra.mxu0 %v11709_v36  ;;  %2943 = vmatprep.mubr.bf16.mxu1 %v11701_v24  ;;  %v7075_v0 = vpop.f32.mrf.mxu0  ;;  %v7171_v43 = vadd.f32 %v7170_v41, %v7169_v30  ;;  %v1508_v36 = vshrl.u32 %v9655_v6, 16  ;;  %v1517_v41 = vshll.u32 %v9657_v58, 16 }
 0x14c   : > { %8014 = vmatprep.mubr.bf16.mxu0 %v9121_v45  ;;  %v7172_v11 = vpop.f32.mrf.mxu1 }
 0x14d   : > { %v7076_v16 = vpop.f32.mrf.mxu0  ;;  %v9651_v45 = vadd.f32 %v7171_v43, %v2394_v47 }
 0x14e   : > { %v9649_v24 = vadd.f32 %v7076_v16, %v7075_v0  ;;  %v7173_v20 = vpop.f32.mrf.mxu1  ;;  %v1511_v0 = vshll.u32 %v9655_v6, 16 }
 0x14f   : > { %v7078_v22 = vpop.f32.mrf.mxu0  ;;  %v7174_v9 = vadd.f32 %v7173_v20, %v7172_v11  ;;  %v1510_v11 = vrot.slane %v1508_v36, 4  ;;  %v1519_v20 = vrot.slane %v1517_v41, 5 }
 0x150   : > { %v7175_v53 = vpop.f32.mrf.mxu1 }
 0x151   : > { %v7079_v55 = vpop.f32.mrf.mxu0  ;;  %v9663_v48 = vadd.f32 %v7174_v9, %v2399_v19  ;;  %v1523_v19 = vrot.slane %v1521_v27, 4  ;;  %v2407_v9 = vadd.f32 %v9620_v31, %v9593_v28  ;;  %v8259_v31 = vld [vmem:[%s11594_s3 + $0x60] sm:$0xff]  }
 0x152   : > { %2944 = vmatmul.mubr.bf16.gmra.mxu1 %v11710_v52  ;;  %v9661_v17 = vadd.f32 %v7079_v55, %v7078_v22  ;;  %v7176_v30 = vpop.f32.mrf.mxu1  ;;  %v1513_v22 = vrot.slane %v1511_v0, 5  ;;  %v9679_v52 = vld [vmem:[#allocation2 + $0xd4] sm:$0x1]  ;;  %7504 = vmatprep.subr.bf16.mxu1 %v8259_v31 }
 0x153   : > { %8015 = vmatmul.mubr.bf16.gmra.mxu0 %v9178_v37  ;;  %2951 = vmatprep.mubr.bf16.mxu1 %v11703_v32  ;;  %v7081_v42 = vpop.f32.mrf.mxu0  ;;  %v2402_v37 = vadd.f32 %v9582_v15, %v9593_v28  ;;  %v7177_v5 = vadd.f32 %v7176_v30, %v7175_v53  ;;  %v1524_v36 = vor.u32 %v1523_v19, %v1519_v20  ;;  %v1527_v0 = vshll.u32 %v9679_v52, 16 }
 0x154   : > { %8018 = vmatprep.mubr.bf16.mxu0 %v9226_v62  ;;  %v7178_v43 = vpop.f32.mrf.mxu1  ;;  %v1514_v30 = vor.u32 %v1513_v22, %v1510_v11  ;;  %v2415_v22 = vadd.f32 %v9635_v57, %v9593_v28 }
 0x155   : > { %v7082_v47 = vpop.f32.mrf.mxu0  ;;  %v9675_v32 = vadd.f32 %v7177_v5, %v2402_v37  ;;  %v1529_v11 = vrot.slane %v1527_v0, 5 }
 0x156   : > { %v9673_v16 = vadd.f32 %v7082_v47, %v7081_v42  ;;  %v7179_v62 = vpop.f32.mrf.mxu1 }
 0x157   : > { %v7180_v55 = vadd.f32 %v7179_v62, %v7178_v43  ;;  %v1515_v43 = vrot.slane %v1514_v30, 4  ;;  %v1525_v62 = vrot.slane %v1524_v36, 4 }
 0x158   : > { %v7181_v15 = vpop.f32.mrf.mxu1 }
 0x159   : > { %v9683_v53 = vadd.f32 %v7180_v55, %v2407_v9  ;;  %v1520_v36 = vsel %vm8562_vm14, %v1515_v43, %v1519_v20  ;;  %v1530_v57 = vsel %vm8562_vm14, %v1525_v62, %v1529_v11  ;;  %v6712_v62 = vcombine.low %v9655_v6, %v9657_v58 }
 0x15a   : > { %2952 = vmatmul.mubr.bf16.gmra.mxu1 %v8844_v54  ;;  %v7182_v42 = vpop.f32.mrf.mxu1  ;;  %v8260_v54 = vld [vmem:[%s11594_s3 + $0x20] sm:$0xff]  }
 0x15b   : > { %8019 = vmatmul.mubr.bf16.gmra.mxu0 %v9268_v38  ;;  %2959 = vmatprep.mubr.bf16.mxu1 %v11705_v25  ;;  %v2410_v38 = vadd.f32 %v9627_v3, %v9593_v28  ;;  %v7183_v25 = vadd.f32 %v7182_v42, %v7181_v15 }
 0x15c   : > { %8022 = vmatprep.mubr.bf16.mxu0 %v9296_v50  ;;  %v7184_v27 = vpop.f32.mrf.mxu1  ;;  %7505 = vmatpush3.bf16.msra.mxu1 %v8260_v54 }
 0x15d   : > { %v7084_v41 = vpop.f32.mrf.mxu0  ;;  %v9696_v37 = vadd.f32 %v7183_v25, %v2410_v38  ;;  %v6713_v38 = vcombine.low %v1520_v36, %v1530_v57 }
 0x15e   : > { %v7185_v47 = vpop.f32.mrf.mxu1 }
 0x15f   : > { %v7085_v50 = vpop.f32.mrf.mxu0  ;;  %v7186_v9 = vadd.f32 %v7185_v47, %v7184_v27  ;;  %v8262_v47 = vld [vmem:[%s11594_s3 + $0x18] sm:$0xff]  }
 0x160   : > { %v7086_v5 = vadd.f32 %v7085_v50, %v7084_v41  ;;  %v7187_v3 = vpop.f32.mrf.mxu1  ;;  %v8261_v50 = vld [vmem:[%s11594_s3 + $0x58] sm:$0xff]  }
 0x161   : > { %v7087_v19 = vpop.f32.mrf.mxu0  ;;  %v9702_v15 = vadd.f32 %v7186_v9, %v2415_v22  ;;  %7506 = vmatprep.subr.bf16.mxu1 %v8261_v50  ;;  %v8264_v9 = vld [vmem:[%s11594_s3 + $0xb8] sm:$0xff]  }
 0x162   : > { %2960 = vmatmul.mubr.bf16.gmra.mxu1 %v8875_v4  ;;  %v7188_v30 = vpop.f32.mrf.mxu1  ;;  %v2418_v4 = vadd.f32 %v9649_v24, %v9593_v28  ;;  %v2423_v24 = vadd.f32 %v9661_v17, %v9593_v28 }
 0x163   : > { %8023 = vmatmul.mubr.bf16.gmra.mxu0 %v9326_v39  ;;  %v7088_v55 = vpop.f32.mrf.mxu0  ;;  %2967 = vmatprep.mubr.bf16.mxu1 %v9471_v7  ;;  %v7189_v39 = vadd.f32 %v7188_v30, %v7187_v3 }
 0x164   : > { %v7089_v42 = vadd.f32 %v7088_v55, %v7087_v19  ;;  %8026 = vmatprep.mubr.bf16.mxu0 %v9370_v2  ;;  %7507 = vmatpush3.bf16.msra.mxu1 %v8262_v47  ;;  %v8263_v19 = vld [vmem:[%s11594_s3 + $0xf8] sm:$0xff]  }
 0x165   : > { %v9712_v54 = vadd.f32 %v7189_v39, %v2418_v4  ;;  %7610 = vmatprep.subr.bf16.mxu0 %v8263_v19  ;;  %v2431_v4 = vadd.f32 %v7086_v5, %v9593_v28 }
 0x166   : > { %v7090_v0 = vpop.f32.mrf.mxu0  ;;  %7611 = vmatpush3.bf16.msra.mxu0 %v8264_v9 }
 0x168   : > { %v7091_v31 = vpop.f32.mrf.mxu0 }
 0x169   : > { %v9714_v7 = vadd.f32 %v7091_v31, %v7090_v0 }
 0x16a   : > { %v9716_v41 = vpop.f32.mrf.mxu0  ;;  %v7190_v2 = vpop.f32.mrf.mxu1  ;;  %2968 = vmatmul.mubr.bf16.gmra.mxu1 %v9496_v12 }
 0x16b   : > { %8027 = vmatmul.mubr.bf16.gmra.mxu0 %v9398_v33  ;;  %2975 = vmatprep.mubr.bf16.mxu1 %v6713_v38 }
 0x16c   : > { %v7094_v20 = vpop.f32.mrf.mxu0  ;;  %v7191_v25 = vpop.f32.mrf.mxu1  ;;  %8030 = vmatprep.mubr.bf16.mxu0 %v9440_v44  ;;  %v2426_v44 = vadd.f32 %v9673_v16, %v9593_v28  ;;  %v1536_v16 = vrot.slane %v9657_v58, 5  ;;  %v2434_v58 = vadd.f32 %v7089_v42, %v9593_v28  ;;  %v8267_v42 = vld [vmem:[%s11594_s3 + $0x50] sm:$0xff]  }
 0x16d   : > { %v7192_v27 = vadd.f32 %v7191_v25, %v7190_v2  ;;  %v1539_v2 = vrot.slane %v9679_v52, 5  ;;  %v6660_v25 = vrot.slane %v9655_v6, 9  ;;  %7508 = vmatprep.subr.bf16.mxu1 %v8267_v42 }
 0x16e   : > { %v7193_v12 = vpop.f32.mrf.mxu1  ;;  %v7096_v43 = vpop.f32.mrf.mxu0 }
 0x16f   : > { %v9729_v33 = vadd.f32 %v7192_v27, %v2423_v24  ;;  %v1538_v24 = vrot.slane %v1536_v16, 4 }
 0x170   : > { %v7194_v17 = vpop.f32.mrf.mxu1  ;;  %v7097_v11 = vpop.f32.mrf.mxu0 }
 0x171   : > { %v7195_v22 = vadd.f32 %v7194_v17, %v7193_v12  ;;  %v7098_v3 = vadd.f32 %v7097_v11, %v7096_v43  ;;  %v1537_v43 = vsel %vm8553_vm13, %v6660_v25, %v1536_v16 }
 0x172   : > { %v7099_v55 = vpop.f32.mrf.mxu0  ;;  %v7196_v36 = vpop.f32.mrf.mxu1  ;;  %2976 = vmatmul.mubr.bf16.gmra.mxu1 %v6712_v62  ;;  %v1540_v62 = vsel %vm8553_vm13, %v1538_v24, %v1539_v2 }
 0x173   : > { %v9741_v30 = vadd.f32 %v7195_v22, %v2426_v44  ;;  %8031 = vmatmul.mubr.bf16.gmra.mxu0 %v9473_v1  ;;  %v8265_v1 = vld [vmem:[%s11594_s3 + $0xf0] sm:$0xff]   ;;  %v2439_v44 = vadd.f32 %v9714_v7, %v9593_v28  ;;  %v8270_v7 = vld [vmem:[%s11594_s3 + $0xa8] sm:$0xff]   ;;  %v2447_v24 = vadd.f32 %v7098_v3, %v9593_v28 }
 0x174   : > { %8034 = vmatprep.mubr.bf16.mxu0 %v9492_v59  ;;  %v7197_v57 = vpop.f32.mrf.mxu1  ;;  %v7100_v0 = vpop.f32.mrf.mxu0  ;;  %v8266_v59 = vld [vmem:[%s11594_s3 + $0xb0] sm:$0xff]   ;;  %7612 = vmatprep.subr.bf16.mxu0 %v8265_v1 }
 0x175   : > { %v7198_v39 = vadd.f32 %v7197_v57, %v7196_v36  ;;  %7613 = vmatpush3.bf16.msra.mxu0 %v8266_v59  ;;  %v6714_v36 = vcombine.low %v1537_v43, %v1540_v62  ;;  %v8271_v43 = vld [vmem:[%s11594_s3 + $0xe0] sm:$0xff]  }
 0x176   : > { %v7199_v31 = vpop.f32.mrf.mxu1  ;;  %v8272_v62 = vld [vmem:[%s11594_s3 + $0xa0] sm:$0xff]  }
 0x177   : > { %v9747_v38 = vadd.f32 %v7198_v39, %v2431_v4  ;;  %v8269_v4 = vld [vmem:[%s11594_s3 + $0xe8] sm:$0xff]  }
 0x178   : > { %v7200_v27 = vpop.f32.mrf.mxu1  ;;  %7614 = vmatprep.subr.bf16.mxu0 %v8269_v4 }
 0x179   : > { %v7102_v5 = vpop.f32.mrf.mxu0  ;;  %v7201_v50 = vadd.f32 %v7200_v27, %v7199_v31  ;;  %7615 = vmatpush3.bf16.msra.mxu0 %v8270_v7  ;;  %v7101_v27 = vadd.f32 %v7100_v0, %v7099_v55  ;;  %v3190_v7 = vld [vmem:[#allocation3 + $0x18] sm:$0x1] }
 0x17a   : > { %v7202_v47 = vpop.f32.mrf.mxu1  ;;  %7616 = vmatprep.subr.bf16.mxu0 %v8271_v43 }
 0x17b   : > { %8035 = vmatmul.mubr.bf16.gmra.mxu0 %v9506_v8  ;;  %v7103_v52 = vpop.f32.mrf.mxu0  ;;  %v9759_v6 = vadd.f32 %v7201_v50, %v2434_v58  ;;  %v8268_v8 = vld [vmem:[%s11594_s3 + $0x10] sm:$0xff]  }
 0x17c   : > { %v7104_v12 = vadd.f32 %v7103_v52, %v7102_v5  ;;  %8038 = vmatprep.mubr.bf16.mxu0 %v9448_v10  ;;  %v7203_v17 = vpop.f32.mrf.mxu1  ;;  %v7095_v10 = vadd.f32 %v7094_v20, %v9716_v41  ;;  %7509 = vmatpush3.bf16.msra.mxu1 %v8268_v8 }
 0x17d   : > { %v7105_v11 = vpop.f32.mrf.mxu0  ;;  %v7204_v22 = vadd.f32 %v7203_v17, %v7202_v47  ;;  %v2450_v17 = vadd.f32 %v7101_v27, %v9593_v28  ;;  %7617 = vmatpush3.bf16.msra.mxu0 %v8272_v62 }
 0x17e   : > { %v7205_v19 = vpop.f32.mrf.mxu1  ;;  %v2442_v41 = vadd.f32 %v7095_v10, %v9593_v28  ;;  %v2455_v10 = vadd.f32 %v7104_v12, %v9593_v28 }
 0x17f   : > { %v7106_v9 = vpop.f32.mrf.mxu0  ;;  %v9775_v16 = vadd.f32 %v7204_v22, %v2439_v44 }
 0x180   : > { %v7206_v57 = vpop.f32.mrf.mxu1  ;;  %v7107_v22 = vadd.f32 %v7106_v9, %v7105_v11 }
 0x181   : > { %v7207_v20 = vadd.f32 %v7206_v57, %v7205_v19 }
 0x182   : > { %v7208_v39 = vpop.f32.mrf.mxu1  ;;  %v2458_v12 = vadd.f32 %v7107_v22, %v9593_v28  ;;  %v3184_v22 = vld [vmem:[#allocation3] sm:$0x1] }
 0x183   : > { %v7108_v31 = vpop.f32.mrf.mxu0  ;;  %8039 = vmatmul.mubr.bf16.gmra.mxu0 %v6714_v36  ;;  %v9784_v2 = vadd.f32 %v7207_v20, %v2442_v41 }
 0x184   : > { %v7209_v25 = vpop.f32.mrf.mxu1 }
 0x185   : > { %v7109_v1 = vpop.f32.mrf.mxu0  ;;  %v7210_v59 = vadd.f32 %v7209_v25, %v7208_v39  ;;  %v3191_v39 = vsel %vm8481_vm3, 0, %v3190_v7 }
 0x186   : > { %v7110_v58 = vadd.f32 %v7109_v1, %v7108_v31  ;;  %v7211_v5 = vpop.f32.mrf.mxu1  ;;  %3192 = vst [vmem:[#allocation3 + $0x18] sm:$0x1] %v3191_v39 }
 0x187   : > { %v7111_v50 = vpop.f32.mrf.mxu0  ;;  %v9787_v47 = vadd.f32 %v7210_v59, %v2447_v24  ;;  %v3187_v24 = vld [vmem:[#allocation3 + $0xc] sm:$0x1] }
 0x188   : > { %v7212_v52 = vpop.f32.mrf.mxu1  ;;  %v3188_v27 = vsel %vm8481_vm3, 0, %v3187_v24 }
 0x189   : > { %v7112_v3 = vpop.f32.mrf.mxu0  ;;  %v7213_v55 = vadd.f32 %v7212_v52, %v7211_v5  ;;  %3189 = vst [vmem:[#allocation3 + $0xc] sm:$0x1] %v3188_v27  ;;  %v3244_v5 = vld [vmem:[#allocation3 + $0x20] sm:$0x1] }
 0x18a   : > { %v7214_v0 = vpop.f32.mrf.mxu1 }
 0x18b   : > { %v7266_v42 = vpop.f32.mrf.mxu0  ;;  %v9796_v8 = vadd.f32 %v7213_v55, %v2450_v17  ;;  %v2463_v55 = vadd.f32 %v7110_v58, %v9593_v28 }
 0x18c   : > { %v7215_v44 = vpop.f32.mrf.mxu1 }
 0x18d   : > { %v7267_v19 = vpop.f32.mrf.mxu0  ;;  %v7216_v36 = vadd.f32 %v7215_v44, %v7214_v0  ;;  %v7113_v0 = vadd.f32 %v7112_v3, %v7111_v50  ;;  %v8275_v3 = vld [vmem:[%s11594_s3 + $0xd8] sm:$0xff]  }
 0x18e   : > { %v7268_v57 = vadd.f32 %v7267_v19, %v7266_v42  ;;  %v7217_v4 = vpop.f32.mrf.mxu1  ;;  %7618 = vmatprep.subr.bf16.mxu0 %v8275_v3 }
 0x18f   : > { %v7269_v41 = vpop.f32.mrf.mxu0  ;;  %v9799_v20 = vadd.f32 %v7216_v36, %v2455_v10  ;;  %v3241_v10 = vld [vmem:[#allocation3 + $0x14] sm:$0x1] }
 0x190   : > { %v9804_v31 = vadd.f32 %v7268_v57, %v9601_v40  ;;  %v7218_v25 = vpop.f32.mrf.mxu1  ;;  %v3245_v40 = vsel %vm8499_vm6, 0, %v3244_v5  ;;  %v3242_v57 = vsel %vm8499_vm6, 0, %v3241_v10  ;;  %v3238_v5 = vld [vmem:[#allocation3 + $0x8] sm:$0x1]  ;;  %v2471_v10 = vadd.f32 %v9522_v60, %v9593_v28  ;;  %v8278_v60 = vld [vmem:[%s11594_s3 + $0x90] sm:$0xff]  }
 0x191   : > { %v7270_v11 = vpop.f32.mrf.mxu0  ;;  %v7219_v9 = vadd.f32 %v7218_v25, %v7217_v4  ;;  %3246 = vst [vmem:[#allocation3 + $0x20] sm:$0x1] %v3245_v40  ;;  %v3185_v4 = vsel %vm8481_vm3, 0, %v3184_v22  ;;  %3243 = vst [vmem:[#allocation3 + $0x14] sm:$0x1] %v3242_v57  ;;  %v2466_v25 = vadd.f32 %v7113_v0, %v9593_v28 }
 0x192   : > { %v7271_v1 = vadd.f32 %v7270_v11, %v7269_v41  ;;  %v7220_v59 = vpop.f32.mrf.mxu1  ;;  %v3196_v41 = vld [vmem:[#allocation3 + $0x30] sm:$0x1]  ;;  %3186 = vst [vmem:[#allocation3] sm:$0x1] %v3185_v4 }
 0x193   : > { %v7272_v52 = vpop.f32.mrf.mxu0  ;;  %v9809_v43 = vadd.f32 %v7219_v9, %v2458_v12  ;;  %v3197_v39 = vsel %vm8481_vm3, 0, %v3196_v41  ;;  %v8273_v11 = vld [vmem:[%s11594_s3 + $0x48] sm:$0xff]  }
 0x194   : > { %v9814_v62 = vadd.f32 %v7271_v1, %v9612_v49  ;;  %v7221_v17 = vpop.f32.mrf.mxu1  ;;  %3198 = vst [vmem:[#allocation3 + $0x30] sm:$0x1] %v3197_v39  ;;  %v8276_v1 = vld [vmem:[%s11594_s3 + $0x98] sm:$0xff]   ;;  %7510 = vmatprep.subr.bf16.mxu1 %v8273_v11 }
 0x195   : > { %v7273_v42 = vpop.f32.mrf.mxu0  ;;  %v7222_v44 = vadd.f32 %v7221_v17, %v7220_v59  ;;  %v3193_v59 = vld [vmem:[#allocation3 + $0x24] sm:$0x1]  ;;  %7619 = vmatpush3.bf16.msra.mxu0 %v8276_v1 }
 0x196   : > { %v7274_v19 = vadd.f32 %v7273_v42, %v7272_v52  ;;  %v7223_v36 = vpop.f32.mrf.mxu1  ;;  %v3194_v17 = vsel %vm8481_vm3, 0, %v3193_v59 }
 0x197   : > { %v7275_v7 = vpop.f32.mrf.mxu0  ;;  %v9821_v49 = vadd.f32 %v7222_v44, %v2463_v55  ;;  %v3239_v55 = vsel %vm8499_vm6, 0, %v3238_v5  ;;  %3195 = vst [vmem:[#allocation3 + $0x24] sm:$0x1] %v3194_v17  ;;  %v3250_v44 = vld [vmem:[#allocation3 + $0x38] sm:$0x1] }
 0x198   : > { %v9824_v58 = vadd.f32 %v7274_v19, %v9622_v35  ;;  %v7224_v50 = vpop.f32.mrf.mxu1  ;;  %v8274_v35 = vld [vmem:[%s11594_s3 + $0x8] sm:$0xff]   ;;  %3240 = vst [vmem:[#allocation3 + $0x8] sm:$0x1] %v3239_v55  ;;  %v3202_v5 = vld [vmem:[#allocation3 + $0x48] sm:$0x1] }
 0x199   : > { %v7276_v24 = vpop.f32.mrf.mxu0  ;;  %v7225_v12 = vadd.f32 %v7224_v50, %v7223_v36  ;;  %7511 = vmatpush3.bf16.msra.mxu1 %v8274_v35  ;;  %v3251_v36 = vsel %vm8499_vm6, 0, %v3250_v44  ;;  %v9864_v39 = vld [vmem:[#allocation3] sm:$0xf]  ;;  %v3203_v55 = vsel %vm8481_vm3, 0, %v3202_v5 }
 0x19a   : > { %v7277_v9 = vadd.f32 %v7276_v24, %v7275_v7  ;;  %v7226_v27 = vpop.f32.mrf.mxu1  ;;  %3252 = vst [vmem:[#allocation3 + $0x38] sm:$0x1] %v3251_v36  ;;  %v3247_v7 = vld [vmem:[#allocation3 + $0x2c] sm:$0x1]  ;;  %v3876_v11 = vshrl.u32 %v9864_v39, 16  ;;  %v3879_v35 = vshll.u32 %v9864_v39, 16 }
 0x19b   : > { %v7278_v52 = vpop.f32.mrf.mxu0  ;;  %v9841_v40 = vadd.f32 %v7225_v12, %v2466_v25  ;;  %v3248_v3 = vsel %vm8499_vm6, 0, %v3247_v7  ;;  %v9866_v25 = vld [vmem:[#allocation3 + $0x4] sm:$0xf]  ;;  %3204 = vst [vmem:[#allocation3 + $0x48] sm:$0x1] %v3203_v55 }
 0x19c   : > { %v9848_v0 = vadd.f32 %v7277_v9, %v9629_v23  ;;  %v7227_v42 = vpop.f32.mrf.mxu1  ;;  %v8277_v23 = vld [vmem:[%s11594_s3 + $0xd0] sm:$0xff]   ;;  %3249 = vst [vmem:[#allocation3 + $0x2c] sm:$0x1] %v3248_v3  ;;  %v3885_v9 = vshll.u32 %v9866_v25, 16  ;;  %v3878_v44 = vrot.slane %v3876_v11, 4 }
 0x19d   : > { %v7279_v22 = vpop.f32.mrf.mxu0  ;;  %v7228_v19 = vadd.f32 %v7227_v42, %v7226_v27  ;;  %7620 = vmatprep.subr.bf16.mxu0 %v8277_v23  ;;  %v2474_v27 = vadd.f32 %v9526_v61, %v9593_v28  ;;  %v8279_v42 = vld [vmem:[%s11594_s3 + $0x40] sm:$0xff]   ;;  %v3199_v36 = vld [vmem:[#allocation3 + $0x3c] sm:$0x1] }
 0x19e   : > { %v7280_v57 = vadd.f32 %v7279_v22, %v7278_v52  ;;  %v7229_v4 = vpop.f32.mrf.mxu1  ;;  %7621 = vmatpush3.bf16.msra.mxu0 %v8278_v60  ;;  %v3889_v52 = vshrl.u32 %v9866_v25, 16  ;;  %v8280_v61 = vld [vmem:[%s11594_s3] sm:$0xff]   ;;  %7512 = vmatprep.subr.bf16.mxu1 %v8279_v42  ;;  %v3200_v7 = vsel %vm8481_vm3, 0, %v3199_v36  ;;  %v8282_v60 = vld [vmem:[%s11594_s3 + $0x88] sm:$0xff]  }
 0x19f   : > { %v7281_v41 = vpop.f32.mrf.mxu0  ;;  %v9857_v50 = vadd.f32 %v7228_v19, %v2471_v10  ;;  %v3881_v10 = vrot.slane %v3879_v35, 5  ;;  %v3823_v3 = vld [vmem:[#allocation3 + $0x8] sm:$0x1]  ;;  %7513 = vmatpush3.bf16.msra.mxu1 %v8280_v61  ;;  %3201 = vst [vmem:[#allocation3 + $0x3c] sm:$0x1] %v3200_v7 }
 0x1a0   : > { %v9869_v24 = vadd.f32 %v7280_v57, %v9637_v51  ;;  %v7230_v12 = vpop.f32.mrf.mxu1  ;;  %v3887_v57 = vrot.slane %v3885_v9, 5  ;;  %v3891_v11 = vrot.slane %v3889_v52, 4 }
 0x1a1   : > { %v7282_v1 = vpop.f32.mrf.mxu0  ;;  %v7231_v59 = vadd.f32 %v7230_v12, %v7229_v4  ;;  %v3882_v12 = vor.u32 %v3881_v10, %v3878_v44 }
 0x1a2   : > { %v7283_v51 = vadd.f32 %v7282_v1, %v7281_v41  ;;  %v7232_v17 = vpop.f32.mrf.mxu1  ;;  %v8281_v41 = vld [vmem:[%s11594_s3 + $0xc8] sm:$0xff]   ;;  %v3895_v1 = vshll.u32 %v3823_v3, 16  ;;  %v3892_v42 = vor.u32 %v3891_v11, %v3887_v57 }
 0x1a3   : > { %v7284_v22 = vpop.f32.mrf.mxu0  ;;  %v9882_v19 = vadd.f32 %v7231_v59, %v2474_v27  ;;  %v3256_v27 = vld [vmem:[#allocation3 + $0x50] sm:$0x1]  ;;  %7622 = vmatprep.subr.bf16.mxu0 %v8281_v41  ;;  %v3883_v55 = vrot.slane %v3882_v12, 4  ;;  %v4309_v41 = vrot.slane %v9866_v25, 5 }
 0x1a4   : > { %v9888_v4 = vadd.f32 %v7283_v51, %v9651_v45  ;;  %v7233_v23 = vpop.f32.mrf.mxu1  ;;  %v2479_v45 = vadd.f32 %v9540_v29, %v9593_v28  ;;  %v3257_v51 = vsel %vm8499_vm6, 0, %v3256_v27  ;;  %7623 = vmatpush3.bf16.msra.mxu0 %v8282_v60  ;;  %v3897_v29 = vrot.slane %v3895_v1, 5  ;;  %v3253_v60 = vld [vmem:[#allocation3 + $0x44] sm:$0x1]  ;;  %v8285_v1 = vld [vmem:[%s11594_s3 + $0x80] sm:$0xff]  }
 0x1a5   : > { %v7285_v35 = vpop.f32.mrf.mxu0  ;;  %v7234_v9 = vadd.f32 %v7233_v23, %v7232_v17  ;;  %3258 = vst [vmem:[#allocation3 + $0x50] sm:$0x1] %v3257_v51  ;;  %v3893_v10 = vrot.slane %v3892_v42, 4  ;;  %v3888_v7 = vsel %vm8562_vm14, %v3883_v55, %v3887_v57  ;;  %v4311_v27 = vrot.slane %v4309_v41, 4  ;;  %v3208_v51 = vld [vmem:[#allocation3 + $0x60] sm:$0x1] }
 0x1a6   : > { %v7286_v59 = vadd.f32 %v7285_v35, %v7284_v22  ;;  %v7235_v5 = vpop.f32.mrf.mxu1  ;;  %v2482_v22 = vadd.f32 %v9547_v26, %v9593_v28  ;;  %v3254_v26 = vsel %vm8499_vm6, 0, %v3253_v60  ;;  %v6838_v57 = vcombine.low %v9864_v39, %v9866_v25 }
 0x1a7   : > { %v7287_v36 = vpop.f32.mrf.mxu0  ;;  %v9902_v44 = vadd.f32 %v7234_v9, %v2479_v45  ;;  %v3898_v45 = vsel %vm8562_vm14, %v3893_v10, %v3897_v29  ;;  %3255 = vst [vmem:[#allocation3 + $0x44] sm:$0x1] %v3254_v26  ;;  %v4312_v55 = vrot.slane %v3823_v3, 5  ;;  %v3209_v25 = vsel %vm8481_vm3, 0, %v3208_v51 }
 0x1a8   : > { %v9905_v52 = vadd.f32 %v7286_v59, %v9663_v48  ;;  %v7236_v17 = vpop.f32.mrf.mxu1  ;;  %v8283_v48 = vld [vmem:[%s11594_s3 + $0xc0] sm:$0xff]   ;;  %v6854_v42 = vcombine.low %v3888_v7, %v3898_v45  ;;  %3210 = vst [vmem:[#allocation3 + $0x60] sm:$0x1] %v3209_v25  ;;  %v2490_v60 = vadd.f32 %v9567_v14, %v9593_v28 }
 0x1a9   : > { %v7288_v61 = vpop.f32.mrf.mxu0  ;;  %v7237_v23 = vadd.f32 %v7236_v17, %v7235_v5  ;;  %7624 = vmatprep.subr.bf16.mxu0 %v8283_v48 }
 0x1aa   : > { %v7289_v12 = vadd.f32 %v7288_v61, %v7287_v36  ;;  %v7238_v11 = vpop.f32.mrf.mxu1  ;;  %v2487_v36 = vadd.f32 %v9564_v34, %v9593_v28  ;;  %7625 = vmatpush3.bf16.msra.mxu0 %v8285_v1  ;;  %v9935_v61 = vsel %vm8553_vm13, %v4311_v27, %v4312_v55  ;;  %5318 = vmatprep.mubr.bf16.mxu1 %v6854_v42  ;;  %v3259_v1 = vld [vmem:[#allocation3 + $0x5c] sm:$0x1] }
 0x1ab   : > { %v7290_v35 = vpop.f32.mrf.mxu0  ;;  %v9917_v9 = vadd.f32 %v7237_v23, %v2482_v22  ;;  %11711 = vst [vmem:[#allocation14_spill] sm:$0xff] %v9935_v61  ;;  %5319 = vmatmul.mubr.bf16.vlgmr.msra.gmra.mxu1 %v6838_v57  ;;  %v3260_v51 = vsel %vm8499_vm6, 0, %v3259_v1  ;;  %v2495_v42 = vadd.f32 %v9580_v21, %v9593_v28  ;;  %v2498_v21 = vadd.f32 %v9588_v46, %v9593_v28  ;;  %v3214_v1 = vld [vmem:[#allocation3 + $0x78] sm:$0x1] }
 0x1ac   : > { %v9927_v59 = vadd.f32 %v7289_v12, %v9675_v32  ;;  %v7239_v5 = vpop.f32.mrf.mxu1  ;;  %v3205_v32 = vld [vmem:[#allocation3 + $0x54] sm:$0x1]  ;;  %3261 = vst [vmem:[#allocation3 + $0x5c] sm:$0x1] %v3260_v51  ;;  %v3215_v46 = vsel %vm8481_vm3, 0, %v3214_v1 }
 0x1ad   : > { %v7291_v29 = vpop.f32.mrf.mxu0  ;;  %v7240_v17 = vadd.f32 %v7239_v5, %v7238_v11  ;;  %v3206_v34 = vsel %vm8481_vm3, 0, %v3205_v32  ;;  %v3262_v11 = vld [vmem:[#allocation3 + $0x68] sm:$0x1]  ;;  %3216 = vst [vmem:[#allocation3 + $0x78] sm:$0x1] %v3215_v46 }
 0x1ae   : > { %v7292_v10 = vadd.f32 %v7291_v29, %v7290_v35  ;;  %v7241_v22 = vpop.f32.mrf.mxu1  ;;  %3207 = vst [vmem:[#allocation3 + $0x54] sm:$0x1] %v3206_v34  ;;  %v3263_v35 = vsel %vm8499_vm6, 0, %v3262_v11 }
 0x1af   : > { %v7293_v3 = vpop.f32.mrf.mxu0  ;;  %v9937_v23 = vadd.f32 %v7240_v17, %v2487_v36  ;;  %3264 = vst [vmem:[#allocation3 + $0x68] sm:$0x1] %v3263_v35 }
 0x1b0   : > { %v9942_v7 = vadd.f32 %v7292_v10, %v9683_v53  ;;  %v7242_v12 = vpop.f32.mrf.mxu1  ;;  %v6820_v53 = vrot.slane %v9864_v39, 9 }
 0x1b1   : > { %v7294_v45 = vpop.f32.mrf.mxu0  ;;  %v7243_v48 = vadd.f32 %v7242_v12, %v7241_v22 }
 0x1b2   : > { %v7295_v26 = vadd.f32 %v7294_v45, %v7293_v3  ;;  %v7244_v27 = vpop.f32.mrf.mxu1  ;;  %v9962_v39 = vsel %vm8553_vm13, %v6820_v53, %v4309_v41  ;;  %v3217_v3 = vld [vmem:[#allocation3 + $0x84] sm:$0x1] }
 0x1b3   : > { %v7296_v5 = vpop.f32.mrf.mxu0  ;;  %v9948_v57 = vadd.f32 %v7243_v48, %v2490_v60  ;;  %11713 = vst [vmem:[#allocation18_spill] sm:$0xff] %v9962_v39 }
 0x1b4   : > { %v9954_v55 = vadd.f32 %v7295_v26, %v9696_v37  ;;  %v7245_v14 = vpop.f32.mrf.mxu1 }
 0x1b5   : > { %v7297_v36 = vpop.f32.mrf.mxu0  ;;  %v7246_v29 = vadd.f32 %v7245_v14, %v7244_v27 }
 0x1b6   : > { %11712 = vst [vmem:[#allocation16_spill] sm:$0xff] %v9954_v55  ;;  %v7298_v17 = vadd.f32 %v7297_v36, %v7296_v5  ;;  %v7247_v25 = vpop.f32.mrf.mxu1 }
 0x1b7   : > { %v7299_v10 = vpop.f32.mrf.mxu0  ;;  %v9958_v22 = vadd.f32 %v7246_v29, %v2495_v42 }
 0x1b8   : > { %v9965_v32 = vadd.f32 %v7298_v17, %v9702_v15  ;;  %v7248_v37 = vpop.f32.mrf.mxu1  ;;  %v8288_v17 = vld [vmem:[%s11594_s3 + $0x178] sm:$0xff]  }
 0x1b9   : > { %v7300_v34 = vpop.f32.mrf.mxu0  ;;  %v7249_v12 = vadd.f32 %v7248_v37, %v7247_v25  ;;  %v3211_v25 = vld [vmem:[#allocation3 + $0x6c] sm:$0x1]  ;;  %7722 = vmatprep.subr.bf16.mxu1 %v8288_v17 }
 0x1ba   : > { %11714 = vst [vmem:[#allocation9_spill] sm:$0xff] %v9965_v32  ;;  %v7301_v11 = vadd.f32 %v7300_v34, %v7299_v10  ;;  %v9971_v60 = vpop.f32.mrf.mxu1  ;;  %v3212_v37 = vsel %vm8481_vm3, 0, %v3211_v25  ;;  %v3220_v25 = vld [vmem:[#allocation3 + $0x90] sm:$0x1] }
 0x1bb   : > { %v7302_v45 = vpop.f32.mrf.mxu0  ;;  %v9973_v48 = vadd.f32 %v7249_v12, %v2498_v21  ;;  %3213 = vst [vmem:[#allocation3 + $0x6c] sm:$0x1] %v3212_v37  ;;  %v8290_v12 = vld [vmem:[%s11594_s3 + $0x1f8] sm:$0xff]  }
 0x1bc   : > { %v9976_v41 = vadd.f32 %v7301_v11, %v9712_v54  ;;  %v9978_v15 = vpop.f32.mrf.mxu1  ;;  %7834 = vmatprep.subr.bf16.mxu0 %v8290_v12 }
 0x1bd   : > { %v7303_v35 = vpop.f32.mrf.mxu0 }
 0x1be   : > { %11715 = vst [vmem:[#allocation11_spill] sm:$0xff] %v9976_v41  ;;  %v7304_v26 = vadd.f32 %v7303_v35, %v7302_v45  ;;  %v9980_v27 = vpop.f32.mrf.mxu1  ;;  %v3268_v35 = vld [vmem:[#allocation3 + $0x80] sm:$0x1] }
 0x1bf   : > { %v7305_v5 = vpop.f32.mrf.mxu0 }
 0x1c0   : > { %v9985_v28 = vadd.f32 %v7304_v26, %v9729_v33  ;;  %v9987_v53 = vpop.f32.mrf.mxu1  ;;  %v8289_v33 = vld [vmem:[%s11594_s3 + $0x138] sm:$0xff]   ;;  %v3265_v26 = vld [vmem:[#allocation3 + $0x74] sm:$0x1] }
 0x1c1   : > { %v7306_v51 = vpop.f32.mrf.mxu0  ;;  %7723 = vmatpush3.bf16.msra.mxu1 %v8289_v33  ;;  %v3266_v46 = vsel %vm8499_vm6, 0, %v3265_v26 }
 0x1c2   : > { %11716 = vst [vmem:[#allocation19_spill] sm:$0xff] %v9985_v28  ;;  %v7307_v54 = vadd.f32 %v7306_v51, %v7305_v5  ;;  %v9989_v14 = vpop.f32.mrf.mxu1  ;;  %v3269_v5 = vsel %vm8499_vm6, 0, %v3268_v35  ;;  %3267 = vst [vmem:[#allocation3 + $0x74] sm:$0x1] %v3266_v46 }
 0x1c3   : > { %v7308_v42 = vpop.f32.mrf.mxu0  ;;  %3270 = vst [vmem:[#allocation3 + $0x80] sm:$0x1] %v3269_v5 }
 0x1c4   : > { %v9992_v36 = vadd.f32 %v7307_v54, %v9741_v30  ;;  %v9994_v29 = vpop.f32.mrf.mxu1 }
 0x1c5   : > { %v7309_v10 = vpop.f32.mrf.mxu0 }
 0x1c6   : > { %11717 = vst [vmem:[#allocation12_spill] sm:$0xff] %v9992_v36  ;;  %v7310_v21 = vadd.f32 %v7309_v10, %v7308_v42  ;;  %v10004_v34 = vpop.f32.mrf.mxu1  ;;  %v3280_v36 = vld [vmem:[#allocation3 + $0xb0] sm:$0x1] }
 0x1c7   : > { %v7311_v30 = vpop.f32.mrf.mxu0 }
 0x1c8   : > { %v10010_v11 = vadd.f32 %v7310_v21, %v9747_v38  ;;  %v10012_v45 = vpop.f32.mrf.mxu1  ;;  %v3221_v21 = vsel %vm8481_vm3, 0, %v3220_v25 }
 0x1c9   : > { %v7312_v1 = vpop.f32.mrf.mxu0  ;;  %3222 = vst [vmem:[#allocation3 + $0x90] sm:$0x1] %v3221_v21 }
 0x1ca   : > { %11718 = vst [vmem:[#allocation20_spill] sm:$0xff] %v10010_v11  ;;  %v7313_v51 = vadd.f32 %v7312_v1, %v7311_v30  ;;  %v10018_v54 = vpop.f32.mrf.mxu1 }
 0x1cb   : > { %v7314_v42 = vpop.f32.mrf.mxu0 }
 0x1cc   : > { %v10021_v38 = vadd.f32 %v7313_v51, %v9759_v6  ;;  %v10023_v17 = vpop.f32.mrf.mxu1 }
 0x1cd   : > { %v7315_v33 = vpop.f32.mrf.mxu0 }
 0x1ce   : > { %11719 = vst [vmem:[#allocation13_spill] sm:$0xff] %v10021_v38  ;;  %v7316_v10 = vadd.f32 %v7315_v33, %v7314_v42  ;;  %v10025_v37 = vpop.f32.mrf.mxu1 }
 0x1cf   : > { %v7317_v12 = vpop.f32.mrf.mxu0 }
 0x1d0   : > { %v10030_v30 = vadd.f32 %v7316_v10, %v9775_v16  ;;  %v10032_v35 = vpop.f32.mrf.mxu1 }
 0x1d1   : > { %v7318_v26 = vpop.f32.mrf.mxu0 }
 0x1d2   : > { %11720 = vst [vmem:[#allocation21_spill] sm:$0xff] %v10030_v30  ;;  %v7319_v6 = vadd.f32 %v7318_v26, %v7317_v12  ;;  %v10034_v1 = vpop.f32.mrf.mxu1  ;;  %v3218_v12 = vsel %vm8481_vm3, 0, %v3217_v3  ;;  %v3271_v3 = vld [vmem:[#allocation3 + $0x8c] sm:$0x1] }
 0x1d3   : > { %v7320_v5 = vpop.f32.mrf.mxu0  ;;  %3219 = vst [vmem:[#allocation3 + $0x84] sm:$0x1] %v3218_v12  ;;  %v3226_v12 = vld [vmem:[#allocation3 + $0xa8] sm:$0x1] }
 0x1d4   : > { %v10037_v46 = vadd.f32 %v7319_v6, %v9784_v2  ;;  %v10039_v51 = vpop.f32.mrf.mxu1 }
 0x1d5   : > { %v7321_v42 = vpop.f32.mrf.mxu0 }
 0x1d6   : > { %11721 = vst [vmem:[#allocation15_spill] sm:$0xff] %v10037_v46  ;;  %v7322_v33 = vadd.f32 %v7321_v42, %v7320_v5  ;;  %v10041_v25 = vpop.f32.mrf.mxu1  ;;  %v3275_v5 = vsel %vm8499_vm6, 0, %v3274_v56  ;;  %v3227_v46 = vsel %vm8481_vm3, 0, %v3226_v12 }
 0x1d7   : > { %v7323_v21 = vpop.f32.mrf.mxu0  ;;  %3276 = vst [vmem:[#allocation3 + $0x98] sm:$0x1] %v3275_v5  ;;  %3228 = vst [vmem:[#allocation3 + $0xa8] sm:$0x1] %v3227_v46 }
 0x1d8   : > { %v10044_v16 = vadd.f32 %v7322_v33, %v9787_v47  ;;  %v10046_v10 = vpop.f32.mrf.mxu1 }
 0x1d9   : > { %v7324_v26 = vpop.f32.mrf.mxu0 }
 0x1da   : > { %11722 = vst [vmem:[#allocation8_spill] sm:$0xff] %v10044_v16  ;;  %v7325_v2 = vadd.f32 %v7324_v26, %v7323_v21  ;;  %v10050_v6 = vpop.f32.mrf.mxu1  ;;  %v3272_v26 = vsel %vm8499_vm6, 0, %v3271_v3 }
 0x1db   : > { %v7326_v63 = vpop.f32.mrf.mxu0  ;;  %3273 = vst [vmem:[#allocation3 + $0x8c] sm:$0x1] %v3272_v26 }
 0x1dc   : > { %v10055_v42 = vadd.f32 %v7325_v2, %v9796_v8  ;;  %v10057_v47 = vpop.f32.mrf.mxu1 }
 0x1dd   : > { %v7327_v33 = vpop.f32.mrf.mxu0 }
 0x1de   : > { %11723 = vst [vmem:[#allocation17_spill] sm:$0xff] %v10055_v42  ;;  %v7328_v61 = vadd.f32 %v7327_v33, %v7326_v63  ;;  %v10059_v39 = vpop.f32.mrf.mxu1 }
 0x1df   : > { %v7329_v21 = vpop.f32.mrf.mxu0 }
 0x1e0   : > { %v10066_v56 = vadd.f32 %v7328_v61, %v9799_v20  ;;  %v10068_v8 = vpop.f32.mrf.mxu1  ;;  %v8294_v20 = vld [vmem:[%s11594_s3 + $0x170] sm:$0xff]  }
 0x1e1   : > { %v7330_v2 = vpop.f32.mrf.mxu0  ;;  %7724 = vmatprep.subr.bf16.mxu1 %v8294_v20 }
 0x1e2   : > { %11724 = vst [vmem:[#allocation10_spill] sm:$0xff] %v10066_v56  ;;  %v7331_v63 = vadd.f32 %v7330_v2, %v7329_v21  ;;  %v10070_v5 = vpop.f32.mrf.mxu1  ;;  %v3223_v2 = vld [vmem:[#allocation3 + $0x9c] sm:$0x1] }
 0x1e3   : > { %v7332_v33 = vpop.f32.mrf.mxu0 }
 0x1e4   : > { %v10073_v42 = vadd.f32 %v7331_v63, %v9809_v43  ;;  %v10075_v16 = vpop.f32.mrf.mxu1  ;;  %v8295_v43 = vld [vmem:[%s11594_s3 + $0x130] sm:$0xff]  }
 0x1e5   : > { %v7333_v3 = vpop.f32.mrf.mxu0  ;;  %7725 = vmatpush3.bf16.msra.mxu1 %v8295_v43 }
 0x1e6   : > { %11725 = vst [vmem:[#allocation22_spill] sm:$0xff] %v10073_v42  ;;  %v7334_v61 = vadd.f32 %v7333_v3, %v7332_v33  ;;  %v10080_v12 = vpop.f32.mrf.mxu1  ;;  %v3224_v42 = vsel %vm8481_vm3, 0, %v3223_v2  ;;  %v3281_v2 = vsel %vm8499_vm6, 0, %v3280_v36 }
 0x1e7   : > { %v7335_v26 = vpop.f32.mrf.mxu0  ;;  %3225 = vst [vmem:[#allocation3 + $0x9c] sm:$0x1] %v3224_v42  ;;  %3282 = vst [vmem:[#allocation3 + $0xb0] sm:$0x1] %v3281_v2 }
 0x1e8   : > { %v10083_v46 = vadd.f32 %v7334_v61, %v9821_v49  ;;  %v10085_v21 = vpop.f32.mrf.mxu1 }
 0x1e9   : > { %v7336_v63 = vpop.f32.mrf.mxu0 }
 0x1ea   : > { %11726 = vst [vmem:[#allocation23_spill] sm:$0xff] %v10083_v46  ;;  %v7337_v56 = vadd.f32 %v7336_v63, %v7335_v26  ;;  %v10092_v33 = vpop.f32.mrf.mxu1  ;;  %v3277_v26 = vld [vmem:[#allocation3 + $0xa4] sm:$0x1] }
 0x1eb   : > { %v7338_v3 = vpop.f32.mrf.mxu0 }
 0x1ec   : > { %v10095_v49 = vadd.f32 %v7337_v56, %v9841_v40  ;;  %v10097_v20 = vpop.f32.mrf.mxu1  ;;  %v3278_v40 = vsel %vm8499_vm6, 0, %v3277_v26 }
 0x1ed   : > { %v7339_v61 = vpop.f32.mrf.mxu0  ;;  %3279 = vst [vmem:[#allocation3 + $0xa4] sm:$0x1] %v3278_v40 }
 0x1ee   : > { %11727 = vst [vmem:[#allocation24_spill] sm:$0xff] %v10095_v49  ;;  %v7340_v46 = vadd.f32 %v7339_v61, %v7338_v3  ;;  %v10099_v30 = vpop.f32.mrf.mxu1 }
 0x1ef   : > { %v7341_v38 = vpop.f32.mrf.mxu0 }
 0x1f0   : > { %v10104_v63 = vadd.f32 %v7340_v46, %v9857_v50  ;;  %v10106_v42 = vpop.f32.mrf.mxu1 }
 0x1f1   : > { %v7342_v56 = vpop.f32.mrf.mxu0 }
 0x1f2   : > { %11728 = vst [vmem:[#allocation25_spill] sm:$0xff] %v10104_v63  ;;  %v7343_v43 = vadd.f32 %v7342_v56, %v7341_v38  ;;  %v10110_v3 = vpop.f32.mrf.mxu1  ;;  %v3232_v63 = vld [vmem:[#allocation3 + $0xc0] sm:$0x1] }
 0x1f3   : > { %v7344_v61 = vpop.f32.mrf.mxu0  ;;  %v3233_v26 = vsel %vm8481_vm3, 0, %v3232_v63 }
 0x1f4   : > { %v10113_v49 = vadd.f32 %v7343_v43, %v9882_v19  ;;  %v10115_v36 = vpop.f32.mrf.mxu1  ;;  %3234 = vst [vmem:[#allocation3 + $0xc0] sm:$0x1] %v3233_v26 }
 0x1f5   : > { %v7345_v28 = vpop.f32.mrf.mxu0 }
 0x1f6   : > { %11729 = vst [vmem:[#allocation26_spill] sm:$0xff] %v10113_v49  ;;  %v7346_v50 = vadd.f32 %v7345_v28, %v7344_v61  ;;  %v10117_v46 = vpop.f32.mrf.mxu1 }
 0x1f7   : > { %v7347_v2 = vpop.f32.mrf.mxu0 }
 0x1f8   : > { %v10122_v40 = vadd.f32 %v7346_v50, %v9902_v44  ;;  %v10124_v38 = vpop.f32.mrf.mxu1 }
 0x1f9   : > { %v7348_v56 = vpop.f32.mrf.mxu0 }
 0x1fa   : > { %11730 = vst [vmem:[#allocation27_spill] sm:$0xff] %v10122_v40  ;;  %v7349_v19 = vadd.f32 %v7348_v56, %v7347_v2  ;;  %v10126_v43 = vpop.f32.mrf.mxu1  ;;  %v3229_v2 = vld [vmem:[#allocation3 + $0xb4] sm:$0x1]  ;;  %v3286_v56 = vld [vmem:[#allocation3 + $0xc8] sm:$0x1] }
 0x1fb   : > { %v7350_v49 = vpop.f32.mrf.mxu0 }
 0x1fc   : > { %v10129_v28 = vadd.f32 %v7349_v19, %v9917_v9  ;;  %v10131_v61 = vpop.f32.mrf.mxu1  ;;  %v3230_v9 = vsel %vm8481_vm3, 0, %v3229_v2  ;;  %v3287_v19 = vsel %vm8499_vm6, 0, %v3286_v56  ;;  %v7380_v2 = vadd.f32 %v9978_v15, %v9971_v60 }
 0x1fd   : > { %v7351_v11 = vpop.f32.mrf.mxu0  ;;  %3231 = vst [vmem:[#allocation3 + $0xb4] sm:$0x1] %v3230_v9  ;;  %3288 = vst [vmem:[#allocation3 + $0xc8] sm:$0x1] %v3287_v19  ;;  %v7383_v56 = vadd.f32 %v9987_v53, %v9980_v27  ;;  %v7389_v19 = vadd.f32 %v10012_v45, %v10004_v34  ;;  %v7398_v60 = vadd.f32 %v10039_v51, %v10034_v1  ;;  %v8301_v53 = vld [vmem:[%s11594_s3 + $0x128] sm:$0xff]  }
 0x1fe   : > { %v7352_v41 = vadd.f32 %v7351_v11, %v7350_v49  ;;  %v10133_v32 = vpop.f32.mrf.mxu1  ;;  %v3283_v11 = vld [vmem:[#allocation3 + $0xbc] sm:$0x1]  ;;  %v8300_v49 = vld [vmem:[%s11594_s3 + $0x168] sm:$0xff]   ;;  %v7401_v15 = vadd.f32 %v10046_v10, %v10041_v25 }
 0x1ff   : > { %v7353_v63 = vpop.f32.mrf.mxu0  ;;  %7726 = vmatprep.subr.bf16.mxu1 %v8300_v49  ;;  %v7395_v49 = vadd.f32 %v10032_v35, %v10025_v37  ;;  %v7407_v37 = vadd.f32 %v10068_v8, %v10059_v39  ;;  %v2869_v1 = vadd.f32 %v7389_v19, %v9848_v0  ;;  %v7413_v39 = vadd.f32 %v10085_v21, %v10080_v12  ;;  %v11732_v12 = vld [vmem:[#allocation16_spill] sm:$0xff]  ;;  %v11737_v19 = vld [vmem:[#allocation13_spill] sm:$0xff] }
 0x200   : > { %v10136_v44 = vadd.f32 %v7352_v41, %v9937_v23  ;;  %v10138_v50 = vpop.f32.mrf.mxu1  ;;  %v3284_v41 = vsel %vm8499_vm6, 0, %v3283_v11  ;;  %7727 = vmatpush3.bf16.msra.mxu1 %v8301_v53 }
 0x201   : > { %v7354_v26 = vpop.f32.mrf.mxu0  ;;  %3285 = vst [vmem:[#allocation3 + $0xbc] sm:$0x1] %v3284_v41  ;;  %v10213_v21 = vadd.f32 %v7407_v37, %v11732_v12  ;;  %v11742_v37 = vld [vmem:[#allocation15_spill] sm:$0xff]  ;;  %v3709_v12 = vld [vmem:[#allocation3 + $0xc] sm:$0xf] }
 0x202   : > { %11731 = vst [vmem:[#allocation28_spill] sm:$0xff] %v10136_v44  ;;  %v7355_v40 = vadd.f32 %v7354_v26, %v7353_v63  ;;  %v7432_v55 = vpop.f32.mrf.mxu1  ;;  %v7386_v44 = vadd.f32 %v9994_v29, %v9989_v14  ;;  %v7404_v14 = vadd.f32 %v10057_v47, %v10050_v6 }
 0x203   : > { %v7356_v23 = vpop.f32.mrf.mxu0 }
 0x204   : > { %v10150_v63 = vadd.f32 %v7355_v40, %v9948_v57  ;;  %v7433_v26 = vpop.f32.mrf.mxu1  ;;  %v7392_v57 = vadd.f32 %v10023_v17, %v10018_v54  ;;  %v2866_v45 = vadd.f32 %v7386_v44, %v9824_v58  ;;  %v2858_v54 = vadd.f32 %v7380_v2, %v9804_v31 }
 0x205   : > { %v7357_v9 = vpop.f32.mrf.mxu0  ;;  %v2861_v17 = vadd.f32 %v7383_v56, %v9814_v62  ;;  %v2882_v58 = vadd.f32 %v7398_v60, %v9905_v52  ;;  %v10189_v31 = vadd.f32 %v7401_v15, %v9927_v59  ;;  %v10192_v62 = vadd.f32 %v7395_v49, %v9888_v4  ;;  %v11736_v56 = vld [vmem:[#allocation19_spill] sm:$0xff]  ;;  %v11739_v60 = vld [vmem:[#allocation21_spill] sm:$0xff] }
 0x206   : > { %v7358_v40 = vadd.f32 %v7357_v9, %v7356_v23  ;;  %v7435_v11 = vpop.f32.mrf.mxu1  ;;  %v10183_v51 = vadd.f32 %v7392_v57, %v9869_v24  ;;  %v10200_v6 = vadd.f32 %v7404_v14, %v9942_v7  ;;  %v7419_v52 = vadd.f32 %v10106_v42, %v10099_v30  ;;  %v11734_v23 = vld [vmem:[#allocation11_spill] sm:$0xff]  ;;  %v11740_v14 = vld [vmem:[#allocation8_spill] sm:$0xff] }
 0x207   : > { %v7359_v27 = vpop.f32.mrf.mxu0  ;;  %v7422_v4 = vadd.f32 %v10115_v36, %v10110_v3  ;;  %v7425_v59 = vadd.f32 %v10124_v38, %v10117_v46  ;;  %v7431_v30 = vadd.f32 %v10138_v50, %v10133_v32  ;;  %v11733_v3 = vld [vmem:[#allocation9_spill] sm:$0xff]  ;;  %v10221_v41 = vadd.f32 %v7413_v39, %v11734_v23  ;;  %v3716_v39 = vld [vmem:[#allocation3 + $0x18] sm:$0xf] }
 0x208   : > { %v10174_v29 = vadd.f32 %v7358_v40, %v9958_v22  ;;  %v7436_v25 = vpop.f32.mrf.mxu1  ;;  %v7410_v22 = vadd.f32 %v10075_v16, %v10070_v5  ;;  %v7416_v16 = vadd.f32 %v10097_v20, %v10092_v33  ;;  %v7434_v20 = vadd.f32 %v7433_v26, %v7432_v55  ;;  %v11738_v55 = vld [vmem:[#allocation12_spill] sm:$0xff]  ;;  %v8306_v26 = vld [vmem:[%s11594_s3 + $0x160] sm:$0xff]  }
 0x209   : > { %v7360_v34 = vpop.f32.mrf.mxu0  ;;  %v7437_v42 = vadd.f32 %v7436_v25, %v7435_v11  ;;  %v10230_v32 = vadd.f32 %v7425_v59, %v11737_v19  ;;  %v10233_v50 = vadd.f32 %v7419_v52, %v11738_v55  ;;  %7728 = vmatprep.subr.bf16.mxu1 %v8306_v26  ;;  %v8307_v59 = vld [vmem:[%s11594_s3 + $0x120] sm:$0xff]  }
 0x20a   : > { %v7361_v35 = vadd.f32 %v7360_v34, %v7359_v27  ;;  %v7438_v7 = vpop.f32.mrf.mxu1  ;;  %v10218_v36 = vadd.f32 %v7410_v22, %v11733_v3  ;;  %v10227_v9 = vadd.f32 %v7416_v16, %v11736_v56  ;;  %v10242_v34 = vadd.f32 %v7434_v20, %v11740_v14  ;;  %7729 = vmatpush3.bf16.msra.mxu1 %v8307_v59  ;;  %v3730_v59 = vld [vmem:[#allocation3 + $0x30] sm:$0xf] }
 0x20b   : > { %v8012_v10 = vpop.f32.mrf.mxu0 }
 0x20c   : > { %v10197_v0 = vadd.f32 %v7361_v35, %v9973_v48  ;;  %v3027_v24 = vadd.f32 %v8012_v10, %v2866_v45  ;;  %v7428_v48 = vadd.f32 %v10131_v61, %v10126_v43  ;;  %v11735_v61 = vld [vmem:[#allocation20_spill] sm:$0xff]  ;;  %v7439_v49 = vpop.f32.mrf.mxu1  ;;  %v11741_v45 = vld [vmem:[#allocation17_spill] sm:$0xff]  ;;  %v10248_v35 = vadd.f32 %v7431_v30, %v11742_v37 }
 0x20d   : > { %v3018_v47 = vpop.f32.mrf.mxu0  ;;  %v10224_v2 = vadd.f32 %v7422_v4, %v11735_v61  ;;  %v10250_v4 = vadd.f32 %v7439_v49, %v7438_v7 }
 0x20e   : > { %v3147_v8 = vmax.f32 %v3027_v24, 0.0  ;;  %v3019_v5 = vadd.f32 %v3018_v47, %v2858_v54  ;;  %v10239_v15 = vadd.f32 %v7428_v48, %v11739_v60  ;;  %v10245_v54 = vadd.f32 %v7437_v42, %v11741_v45 }
 0x20f   : > { %v8013_v33 = vpop.f32.mrf.mxu0 }
 0x210   : > { %v6996_v46 = vpack.c.bf16 %v3147_v8, %v3147_v8  ;;  %v3145_v38 = vmax.f32 %v3019_v5, 0.0  ;;  %v3030_v44 = vadd.f32 %v8013_v33, %v2869_v1 }
 0x211   : > { %v3021_v43 = vpop.f32.mrf.mxu0 }
 0x212   : > { %v3406_v57 = vshrl.u32 %v6996_v46, 16  ;;  %v6994_v40 = vpack.c.bf16 %v3145_v38, %v3145_v38  ;;  %v3148_v11 = vmax.f32 %v3030_v44, 0.0  ;;  %v3022_v27 = vadd.f32 %v3021_v43, %v2861_v17  ;;  %v3720_v43 = vld [vmem:[#allocation3 + $0x20] sm:$0x1] }
 0x213   : > { %v8016_v53 = vpop.f32.mrf.mxu0  ;;  %v3409_v25 = vshll.u32 %v6996_v46, 16  ;;  %v7441_v46 = vpop.f32.mrf.mxu1 }
 0x214   : > { %v3408_v1 = vrot.slane %v3406_v57, 7  ;;  %v3389_v22 = vshrl.u32 %v6994_v40, 16  ;;  %v6997_v10 = vpack.c.bf16 %v3148_v11, %v3148_v11  ;;  %v3392_v24 = vshll.u32 %v6994_v40, 16 }
 0x215   : > { %v3146_v16 = vmax.f32 %v3022_v27, 0.0  ;;  %v3043_v52 = vadd.f32 %v8016_v53, %v2882_v58  ;;  %v3034_v17 = vpop.f32.mrf.mxu0  ;;  %v7442_v45 = vpop.f32.mrf.mxu1 }
 0x216   : > { %v3411_v47 = vor.u32 %v3409_v25, %v3408_v1  ;;  %v3412_v8 = vrot.slane %v3408_v1, 4  ;;  %v3391_v48 = vrot.slane %v3389_v22, 7  ;;  %v3414_v5 = vshrl.u32 %v6997_v10, 16  ;;  %v3713_v22 = vld [vmem:[#allocation3 + $0x14] sm:$0x1] }
 0x217   : > { %v3417_v33 = vshll.u32 %v6997_v10, 16  ;;  %v6995_v30 = vpack.c.bf16 %v3146_v16, %v3146_v16  ;;  %v3151_v20 = vmax.f32 %v3043_v52, 0.0  ;;  %v3035_v42 = vadd.f32 %v3034_v17, %v10183_v51  ;;  %v8017_v3 = vpop.f32.mrf.mxu0 }
 0x218   : > { %v3717_v7 = vsel %vm8528_vm11, %v3411_v47, %v3716_v39  ;;  %v3394_v38 = vor.u32 %v3392_v24, %v3391_v48  ;;  %v3395_v44 = vrot.slane %v3391_v48, 4  ;;  %v3416_v23 = vrot.slane %v3414_v5, 7 }
 0x219   : > { %3718 = vst [vmem:[#allocation3 + $0x18] sm:$0xf] %v3717_v7  ;;  %v3397_v61 = vshrl.u32 %v6995_v30, 16  ;;  %v3400_v56 = vshll.u32 %v6995_v30, 16  ;;  %v7000_v19 = vpack.c.bf16 %v3151_v20, %v3151_v20  ;;  %v3149_v55 = vmax.f32 %v3035_v42, 0.0  ;;  %v3037_v26 = vpop.f32.mrf.mxu0 }
 0x21a   : > { %v3710_v57 = vsel %vm8528_vm11, %v3394_v38, %v3709_v12  ;;  %v3419_v51 = vor.u32 %v3417_v33, %v3416_v23  ;;  %v3421_v40 = vrot.slane %v3416_v23, 4  ;;  %v3046_v11 = vadd.f32 %v8017_v3, %v10189_v31 }
 0x21b   : > { %3711 = vst [vmem:[#allocation3 + $0xc] sm:$0xf] %v3710_v57  ;;  %v3399_v49 = vrot.slane %v3397_v61, 7  ;;  %v3440_v60 = vshrl.u32 %v7000_v19, 16  ;;  %v3443_v27 = vshll.u32 %v7000_v19, 16  ;;  %v6998_v53 = vpack.c.bf16 %v3149_v55, %v3149_v55  ;;  %v8020_v14 = vpop.f32.mrf.mxu0 }
 0x21c   : > { %v3420_v1 = vsel %vm8537_vm12, %v3412_v8, %v3419_v51  ;;  %v3721_v25 = vsel %vm8481_vm3, %v3421_v40, %v3720_v43  ;;  %v3152_v10 = vmax.f32 %v3046_v11, 0.0  ;;  %v3038_v39 = vadd.f32 %v3037_v26, %v10192_v62  ;;  %v10280_v51 = vpop.f32.mrf.mxu1  ;;  %v8313_v40 = vld [vmem:[%s11594_s3 + $0x118] sm:$0xff]   ;;  %v3734_v11 = vld [vmem:[#allocation3 + $0x38] sm:$0x1] }
 0x21d   : > { %3719 = vst [vmem:[#allocation3 + $0x1c] sm:$0xf] %v3420_v1  ;;  %3722 = vst [vmem:[#allocation3 + $0x20] sm:$0x1] %v3721_v25  ;;  %v3402_v31 = vor.u32 %v3400_v56, %v3399_v49  ;;  %v3404_v24 = vrot.slane %v3399_v49, 4  ;;  %v3442_v16 = vrot.slane %v3440_v60, 7  ;;  %v3050_v17 = vpop.f32.mrf.mxu0  ;;  %v3059_v5 = vadd.f32 %v8020_v14, %v10218_v36 }
 0x21e   : > { %v3423_v52 = vshrl.u32 %v6998_v53, 16  ;;  %v7001_v47 = vpack.c.bf16 %v3152_v10, %v3152_v10  ;;  %v3150_v48 = vmax.f32 %v3038_v39, 0.0  ;;  %v10267_v8 = vadd.f32 %v7442_v45, %v7441_v46  ;;  %v3723_v46 = vld [vmem:[#allocation3 + $0x24] sm:$0xf] }
 0x21f   : > { %v3403_v12 = vsel %vm8537_vm12, %v3395_v44, %v3402_v31  ;;  %v3714_v62 = vsel %vm8481_vm3, %v3404_v24, %v3713_v22  ;;  %v3445_v33 = vor.u32 %v3443_v27, %v3442_v16  ;;  %v3426_v30 = vshll.u32 %v6998_v53, 16  ;;  %v8021_v20 = vpop.f32.mrf.mxu0  ;;  %v8312_v56 = vld [vmem:[%s11594_s3 + $0x158] sm:$0xff]   ;;  %v3727_v22 = vld [vmem:[#allocation3 + $0x2c] sm:$0x1] }
 0x220   : > { %3712 = vst [vmem:[#allocation3 + $0x10] sm:$0xf] %v3403_v12  ;;  %3715 = vst [vmem:[#allocation3 + $0x14] sm:$0x1] %v3714_v62  ;;  %v3446_v42 = vrot.slane %v3442_v16, 4  ;;  %v3425_v3 = vrot.slane %v3423_v52, 7  ;;  %v6999_v38 = vpack.c.bf16 %v3150_v48, %v3150_v48  ;;  %v3051_v43 = vadd.f32 %v3050_v17, %v10200_v6  ;;  %7730 = vmatprep.subr.bf16.mxu1 %v8312_v56 }
 0x221   : > { %v3448_v7 = vshrl.u32 %v7001_v47, 16  ;;  %v3731_v36 = vsel %vm8528_vm11, %v3445_v33, %v3730_v59  ;;  %v3155_v23 = vmax.f32 %v3059_v5, 0.0  ;;  %v3062_v44 = vadd.f32 %v8021_v20, %v10221_v41  ;;  %v3053_v61 = vpop.f32.mrf.mxu0  ;;  %7731 = vmatpush3.bf16.msra.mxu1 %v8313_v40 }
 0x222   : > { %3732 = vst [vmem:[#allocation3 + $0x30] sm:$0xf] %v3731_v36  ;;  %v3428_v19 = vor.u32 %v3426_v30, %v3425_v3  ;;  %v3451_v26 = vshll.u32 %v7001_v47, 16  ;;  %v3431_v57 = vshrl.u32 %v6999_v38, 16  ;;  %v3434_v6 = vshll.u32 %v6999_v38, 16  ;;  %v7445_v47 = vpop.f32.mrf.mxu1 }
 0x223   : > { %v3450_v55 = vrot.slane %v3448_v7, 7  ;;  %v7004_v49 = vpack.c.bf16 %v3155_v23, %v3155_v23  ;;  %v3153_v41 = vmax.f32 %v3051_v43, 0.0  ;;  %v3156_v60 = vmax.f32 %v3062_v44, 0.0  ;;  %v8024_v27 = vpop.f32.mrf.mxu0  ;;  %v3737_v44 = vld [vmem:[#allocation3 + $0x3c] sm:$0xf] }
 0x224   : > { %v3724_v53 = vsel %vm8528_vm11, %v3428_v19, %v3723_v46  ;;  %v3433_v1 = vrot.slane %v3431_v57, 7  ;;  %v3429_v25 = vrot.slane %v3425_v3, 4  ;;  %v3054_v7 = vadd.f32 %v3053_v61, %v10213_v21 }
 0x225   : > { %v3453_v14 = vor.u32 %v3451_v26, %v3450_v55  ;;  %v3455_v45 = vrot.slane %v3450_v55, 4  ;;  %3725 = vst [vmem:[#allocation3 + $0x24] sm:$0xf] %v3724_v53  ;;  %v3474_v10 = vshrl.u32 %v7004_v49, 16  ;;  %v7002_v39 = vpack.c.bf16 %v3153_v41, %v3153_v41  ;;  %v3066_v24 = vpop.f32.mrf.mxu0  ;;  %v7447_v26 = vpop.f32.mrf.mxu1 }
 0x226   : > { %v7005_v31 = vpack.c.bf16 %v3156_v60, %v3156_v60  ;;  %v3436_v17 = vor.u32 %v3434_v6, %v3433_v1  ;;  %v3438_v59 = vrot.slane %v3433_v1, 4  ;;  %v3477_v5 = vshll.u32 %v7004_v49, 16  ;;  %v3748_v6 = vld [vmem:[#allocation3 + $0x50] sm:$0x1] }
 0x227   : > { %v3454_v16 = vsel %vm8537_vm12, %v3446_v42, %v3453_v14  ;;  %v3735_v52 = vsel %vm8481_vm3, %v3455_v45, %v3734_v11  ;;  %v3476_v48 = vrot.slane %v3474_v10, 7  ;;  %v3457_v12 = vshrl.u32 %v7002_v39, 16  ;;  %v8025_v33 = vpop.f32.mrf.mxu0  ;;  %v3744_v42 = vld [vmem:[#allocation3 + $0x48] sm:$0xf]  ;;  %v7448_v10 = vpop.f32.mrf.mxu1 }
 0x228   : > { %3733 = vst [vmem:[#allocation3 + $0x34] sm:$0xf] %v3454_v16  ;;  %3736 = vst [vmem:[#allocation3 + $0x38] sm:$0x1] %v3735_v52  ;;  %v3482_v62 = vshrl.u32 %v7005_v31, 16  ;;  %v3437_v30 = vsel %vm8537_vm12, %v3429_v25, %v3436_v17  ;;  %v3728_v20 = vsel %vm8481_vm3, %v3438_v59, %v3727_v22  ;;  %v3460_v3 = vshll.u32 %v7002_v39, 16 }
 0x229   : > { %3726 = vst [vmem:[#allocation3 + $0x28] sm:$0xf] %v3437_v30  ;;  %3729 = vst [vmem:[#allocation3 + $0x2c] sm:$0x1] %v3728_v20  ;;  %v3479_v38 = vor.u32 %v3477_v5, %v3476_v48  ;;  %v10296_v36 = vrot.slane %v3457_v12, 7  ;;  %v3485_v23 = vshll.u32 %v7005_v31, 16  ;;  %v3069_v43 = vpop.f32.mrf.mxu0  ;;  %v3075_v19 = vadd.f32 %v8024_v27, %v10224_v2 }
 0x22a   : > { %v3484_v46 = vrot.slane %v3482_v62, 7  ;;  %v3154_v56 = vmax.f32 %v3054_v7, 0.0  ;;  %v3067_v55 = vadd.f32 %v3066_v24, %v10227_v9  ;;  %v3078_v57 = vadd.f32 %v8025_v33, %v10230_v32  ;;  %v11745_v27 = vld [vmem:[#allocation10_spill] sm:$0xff]  ;;  %v3741_v5 = vld [vmem:[#allocation3 + $0x44] sm:$0x1] }
 0x22b   : > { %v3480_v40 = vrot.slane %v3476_v48, 4  ;;  %v3745_v21 = vsel %vm8528_vm11, %v3479_v38, %v3744_v42  ;;  %v3462_v61 = vor.u32 %v3460_v3, %v10296_v36  ;;  %v3159_v60 = vmax.f32 %v3075_v19, 0.0  ;;  %v10304_v14 = vpop.f32.mrf.mxu0  ;;  %v11746_v39 = vld [vmem:[#allocation22_spill] sm:$0xff]  ;;  %v3758_v30 = vld [vmem:[#allocation3 + $0x60] sm:$0xf]  ;;  %v10331_v38 = vpop.f32.mrf.mxu1 }
 0x22c   : > { %v3487_v11 = vor.u32 %v3485_v23, %v3484_v46  ;;  %3746 = vst [vmem:[#allocation3 + $0x48] sm:$0xf] %v3745_v21  ;;  %v3489_v49 = vrot.slane %v3484_v46, 4  ;;  %v7003_v41 = vpack.c.bf16 %v3154_v56, %v3154_v56  ;;  %v3157_v53 = vmax.f32 %v3067_v55, 0.0  ;;  %v8319_v46 = vld [vmem:[%s11594_s3 + $0x110] sm:$0xff]  }
 0x22d   : > { %v3738_v2 = vsel %vm8528_vm11, %v3462_v61, %v3737_v44  ;;  %v3160_v32 = vmax.f32 %v3078_v57, 0.0  ;;  %v10312_v45 = vadd.f32 %v10250_v4, %v11745_v27  ;;  %v7008_v22 = vpack.c.bf16 %v3159_v60, %v3159_v60  ;;  %v10325_v62 = vpop.f32.mrf.mxu0  ;;  %v10341_v19 = vld [vmem:[#allocation3 + $0x10] sm:$0xf]  ;;  %v3762_v21 = vld [vmem:[#allocation3 + $0x68] sm:$0x1] }
 0x22e   : > { %v3488_v9 = vsel %vm8537_vm12, %v3480_v40, %v3487_v11  ;;  %3739 = vst [vmem:[#allocation3 + $0x3c] sm:$0xf] %v3738_v2  ;;  %v3749_v1 = vsel %vm8481_vm3, %v3489_v49, %v3748_v6  ;;  %v3465_v25 = vshrl.u32 %v7003_v41, 16  ;;  %v10318_v31 = vadd.f32 %v10267_v8, %v11746_v39  ;;  %v3751_v40 = vld [vmem:[#allocation3 + $0x54] sm:$0xf] }
 0x22f   : > { %3747 = vst [vmem:[#allocation3 + $0x4c] sm:$0xf] %v3488_v9  ;;  %3750 = vst [vmem:[#allocation3 + $0x50] sm:$0x1] %v3749_v1  ;;  %v10321_v24 = vadd.f32 %v7445_v47, %v10280_v51  ;;  %v7006_v16 = vpack.c.bf16 %v3157_v53, %v3157_v53  ;;  %v7009_v52 = vpack.c.bf16 %v3160_v32, %v3160_v32  ;;  %v3463_v17 = vrot.slane %v10296_v36, 4  ;;  %v8318_v36 = vld [vmem:[%s11594_s3 + $0x150] sm:$0xff]   ;;  %v8029_v11 = vpop.f32.mrf.mxu0  ;;  %v10358_v1 = vpop.f32.mrf.mxu1 }
 0x230   : > { %v3070_v4 = vadd.f32 %v3069_v43, %v10233_v50  ;;  %v3467_v59 = vrot.slane %v3465_v25, 7  ;;  %v3468_v48 = vshll.u32 %v7003_v41, 16  ;;  %v3508_v12 = vshrl.u32 %v7008_v22, 16  ;;  %v10329_v51 = vld [vmem:[#allocation3 + $0xc] sm:$0xf]  ;;  %7732 = vmatprep.subr.bf16.mxu1 %v8318_v36  ;;  %v8291_v25 = vld [vmem:[%s11594_s3 + $0x1b8] sm:$0xff]  }
 0x231   : > { %v3511_v33 = vshll.u32 %v7008_v22, 16  ;;  %v3491_v8 = vshrl.u32 %v7006_v16, 16  ;;  %v3516_v20 = vshrl.u32 %v7009_v52, 16  ;;  %v10327_v42 = vadd.f32 %v7448_v10, %v7447_v26  ;;  %7733 = vmatpush3.bf16.msra.mxu1 %v8319_v46  ;;  %v10356_v27 = vld [vmem:[#allocation3 + $0x18] sm:$0xf]  ;;  %v10392_v46 = vpop.f32.mrf.mxu1 }
 0x232   : > { %v3470_v47 = vor.u32 %v3468_v48, %v3467_v59  ;;  %v3472_v3 = vrot.slane %v3467_v59, 4  ;;  %v3510_v7 = vrot.slane %v3508_v12, 7  ;;  %v3158_v50 = vmax.f32 %v3070_v4, 0.0  ;;  %v8296_v4 = vld [vmem:[%s11594_s3 + $0x1f0] sm:$0xff]   ;;  %v3085_v12 = vpop.f32.mrf.mxu0 }
 0x233   : > { %v10339_v23 = vrot.slane %v3491_v8, 7  ;;  %v3494_v43 = vshll.u32 %v7006_v16, 16  ;;  %v3518_v44 = vrot.slane %v3516_v20, 7  ;;  %v3519_v56 = vshll.u32 %v7009_v52, 16  ;;  %v10371_v52 = vld [vmem:[#allocation3 + $0x1c] sm:$0xf] }
 0x234   : > { %v3471_v55 = vsel %vm8537_vm12, %v3463_v17, %v3470_v47  ;;  %v3742_v26 = vsel %vm8481_vm3, %v3472_v3, %v3741_v5  ;;  %v3513_v57 = vor.u32 %v3511_v33, %v3510_v7  ;;  %v3900_v61 = vshrl.u32 %v10329_v51, 16  ;;  %v11747_v33 = vld [vmem:[#allocation18_spill] sm:$0xff] }
 0x235   : > { %3740 = vst [vmem:[#allocation3 + $0x40] sm:$0xf] %v3471_v55  ;;  %3743 = vst [vmem:[#allocation3 + $0x44] sm:$0x1] %v3742_v26  ;;  %v3514_v6 = vrot.slane %v3510_v7, 4  ;;  %v3496_v49 = vor.u32 %v3494_v43, %v10339_v23  ;;  %v3521_v41 = vor.u32 %v3519_v56, %v3518_v44  ;;  %v3523_v60 = vrot.slane %v3518_v44, 4 }
 0x236   : > { %v3759_v53 = vsel %vm8528_vm11, %v3513_v57, %v3758_v30  ;;  %v7007_v2 = vpack.c.bf16 %v3158_v50, %v3158_v50  ;;  %v3903_v9 = vshll.u32 %v10329_v51, 16  ;;  %v10354_v32 = vcombine.low %v10329_v51, %v10341_v19  ;;  %v11748_v30 = vld [vmem:[#allocation14_spill] sm:$0xff]  ;;  %v3755_v43 = vld [vmem:[#allocation3 + $0x5c] sm:$0x1] }
 0x237   : > { %3760 = vst [vmem:[#allocation3 + $0x60] sm:$0xf] %v3759_v53  ;;  %v3752_v22 = vsel %vm8528_vm11, %v3496_v49, %v3751_v40  ;;  %v3522_v10 = vsel %vm8537_vm12, %v3514_v6, %v3521_v41  ;;  %v3763_v39 = vsel %vm8481_vm3, %v3523_v60, %v3762_v21  ;;  %v3091_v16 = vadd.f32 %v10304_v14, %v10242_v34  ;;  %v10408_v53 = vpop.f32.mrf.mxu1 }
 0x238   : > { %v3497_v17 = vrot.slane %v10339_v23, 4  ;;  %3753 = vst [vmem:[#allocation3 + $0x54] sm:$0xf] %v3752_v22  ;;  %3761 = vst [vmem:[#allocation3 + $0x64] sm:$0xf] %v3522_v10  ;;  %v3499_v59 = vshrl.u32 %v7007_v2, 16  ;;  %5479 = vmatprep.mubr.bf16.mxu0 %v10354_v32  ;;  %v11749_v8 = vcombine.low %v11747_v33, %v11748_v30  ;;  %v10388_v50 = vcombine.low %v10356_v27, %v10371_v52  ;;  %v10421_v33 = vpop.f32.mrf.mxu0 }
 0x239   : > { %3764 = vst [vmem:[#allocation3 + $0x68] sm:$0x1] %v3763_v39  ;;  %v3913_v48 = vshrl.u32 %v10341_v19, 16  ;;  %v6821_v5 = vrot.slane %v10329_v51, 9  ;;  %v3502_v34 = vshll.u32 %v7007_v2, 16  ;;  %v4316_v14 = vrot.slane %v10341_v19, 5 }
 0x23a   : > { %5480 = vmatmul.mubr.bf16.vlgmr.msra.gmra.mxu0 %v11749_v8  ;;  %v3163_v20 = vmax.f32 %v3091_v16, 0.0  ;;  %v3924_v47 = vshrl.u32 %v10356_v27, 16  ;;  %v3501_v3 = vrot.slane %v3499_v59, 7  ;;  %v3927_v7 = vshll.u32 %v10356_v27, 16  ;;  %v8297_v23 = vld [vmem:[%s11594_s3 + $0x1b0] sm:$0xff]  }
 0x23b   : > { %v3083_v36 = vadd.f32 %v10325_v62, %v10239_v15  ;;  %7835 = vmatpush3.bf16.msra.mxu0 %v8291_v25  ;;  %v3937_v56 = vshrl.u32 %v10371_v52, 16  ;;  %v3094_v55 = vadd.f32 %v8029_v11, %v10245_v54  ;;  %v3086_v26 = vadd.f32 %v3085_v12, %v10248_v35  ;;  %v8302_v15 = vld [vmem:[%s11594_s3 + $0x1e8] sm:$0xff]   ;;  %5487 = vmatprep.mubr.bf16.mxu0 %v10388_v50  ;;  %v3772_v22 = vld [vmem:[#allocation3 + $0x78] sm:$0xf] }
 0x23c   : > { %v7012_v44 = vpack.c.bf16 %v3163_v20, %v3163_v20  ;;  %7836 = vmatprep.subr.bf16.mxu0 %v8296_v4  ;;  %v3504_v62 = vor.u32 %v3502_v34, %v3501_v3  ;;  %v3506_v57 = vrot.slane %v3501_v3, 4  ;;  %v3902_v21 = vrot.slane %v3900_v61, 4  ;;  %v8303_v25 = vld [vmem:[%s11594_s3 + $0x1a8] sm:$0xff]   ;;  %v8308_v4 = vld [vmem:[%s11594_s3 + $0x1e0] sm:$0xff]  }
 0x23d   : > { %v3161_v40 = vmax.f32 %v3083_v36, 0.0  ;;  %v3164_v41 = vmax.f32 %v3094_v55, 0.0  ;;  %v3162_v60 = vmax.f32 %v3086_v26, 0.0  ;;  %v3905_v2 = vrot.slane %v3903_v9, 5  ;;  %v10419_v12 = vld [vmem:[#allocation3 + $0x14] sm:$0x1]  ;;  %v10426_v26 = vpop.f32.mrf.mxu1 }
 0x23e   : > { %v3542_v6 = vshrl.u32 %v7012_v44, 16  ;;  %v3545_v49 = vshll.u32 %v7012_v44, 16  ;;  %v3505_v54 = vsel %vm8537_vm12, %v3497_v17, %v3504_v62  ;;  %v3756_v35 = vsel %vm8481_vm3, %v3506_v57, %v3755_v43  ;;  %v8324_v36 = vld [vmem:[%s11594_s3 + $0x148] sm:$0xff]   ;;  %v3765_v57 = vld [vmem:[#allocation3 + $0x6c] sm:$0xf] }
 0x23f   : > { %v7010_v11 = vpack.c.bf16 %v3161_v40, %v3161_v40  ;;  %7837 = vmatpush3.bf16.msra.mxu0 %v8297_v23  ;;  %3754 = vst [vmem:[#allocation3 + $0x58] sm:$0xf] %v3505_v54  ;;  %3757 = vst [vmem:[#allocation3 + $0x5c] sm:$0x1] %v3756_v35  ;;  %v7013_v10 = vpack.c.bf16 %v3164_v41, %v3164_v41  ;;  %v7011_v39 = vpack.c.bf16 %v3162_v60, %v3162_v60  ;;  %v8325_v62 = vld [vmem:[%s11594_s3 + $0x108] sm:$0xff]  }
 0x240   : > { %v3544_v61 = vrot.slane %v3542_v6, 7  ;;  %v3909_v16 = vshll.u32 %v10341_v19, 16  ;;  %7838 = vmatprep.subr.bf16.mxu0 %v8302_v15  ;;  %v6822_v9 = vrot.slane %v10356_v27, 9  ;;  %v4323_v17 = vrot.slane %v10371_v52, 5  ;;  %v8309_v15 = vld [vmem:[%s11594_s3 + $0x1a0] sm:$0xff]   ;;  %7734 = vmatprep.subr.bf16.mxu1 %v8324_v36  ;;  %v7457_v36 = vpop.f32.mrf.mxu1 }
 0x241   : > { %v3525_v59 = vshrl.u32 %v7010_v11, 16  ;;  %v3906_v34 = vor.u32 %v3905_v2, %v3902_v21  ;;  %v3528_v8 = vshll.u32 %v7010_v11, 16  ;;  %v3550_v20 = vshrl.u32 %v7013_v10, 16  ;;  %v3776_v60 = vld [vmem:[#allocation3 + $0x80] sm:$0x1]  ;;  %v3098_v2 = vpop.f32.mrf.mxu0  ;;  %7735 = vmatpush3.bf16.msra.mxu1 %v8325_v62  ;;  %v8333_v27 = vld [vmem:[%s11594_s3 + $0x180] sm:$0xff]  }
 0x242   : > { %v3547_v30 = vor.u32 %v3545_v49, %v3544_v61  ;;  %v3915_v3 = vrot.slane %v3913_v48, 4  ;;  %v3548_v23 = vrot.slane %v3544_v61, 4  ;;  %v3553_v44 = vshll.u32 %v7013_v10, 16  ;;  %v8314_v49 = vld [vmem:[%s11594_s3 + $0x1d8] sm:$0xff]   ;;  %v3769_v10 = vld [vmem:[#allocation3 + $0x74] sm:$0x1] }
 0x243   : > { %v3527_v43 = vrot.slane %v3525_v59, 7  ;;  %v3533_v55 = vshrl.u32 %v7011_v39, 16  ;;  %7839 = vmatpush3.bf16.msra.mxu0 %v8303_v25  ;;  %v3552_v40 = vrot.slane %v3550_v20, 7  ;;  %v3911_v21 = vrot.slane %v3909_v16, 5 }
 0x244   : > { %v3773_v48 = vsel %vm8528_vm11, %v3547_v30, %v3772_v22  ;;  %v3919_v6 = vshll.u32 %v10419_v12, 16  ;;  %7840 = vmatprep.subr.bf16.mxu0 %v8308_v4  ;;  %v3536_v35 = vshll.u32 %v7011_v39, 16  ;;  %v3907_v11 = vrot.slane %v3906_v34, 4  ;;  %v8315_v39 = vld [vmem:[%s11594_s3 + $0x198] sm:$0xff]  }
 0x245   : > { %3774 = vst [vmem:[#allocation3 + $0x78] sm:$0xf] %v3773_v48  ;;  %v3530_v41 = vor.u32 %v3528_v8, %v3527_v43  ;;  %v3535_v54 = vrot.slane %v3533_v55, 7  ;;  %v3531_v25 = vrot.slane %v3527_v43, 4  ;;  %v3555_v61 = vor.u32 %v3553_v44, %v3552_v40  ;;  %v10461_v48 = vld [vmem:[#allocation3 + $0x24] sm:$0xf] }
 0x246   : > { %v3557_v22 = vrot.slane %v3552_v40, 4  ;;  %v3916_v16 = vor.u32 %v3915_v3, %v3911_v21  ;;  %v4319_v20 = vrot.slane %v10419_v12, 5  ;;  %v3921_v43 = vrot.slane %v3919_v6, 5  ;;  %v8320_v12 = vld [vmem:[%s11594_s3 + $0x1d0] sm:$0xff]   ;;  %v8033_v40 = vpop.f32.mrf.mxu0 }
 0x247   : > { %v3766_v4 = vsel %vm8528_vm11, %v3530_v41, %v3765_v57  ;;  %v3538_v59 = vor.u32 %v3536_v35, %v3535_v54  ;;  %v3540_v30 = vrot.slane %v3535_v54, 4  ;;  %7841 = vmatpush3.bf16.msra.mxu0 %v8309_v15  ;;  %v3556_v34 = vsel %vm8537_vm12, %v3548_v23, %v3555_v61  ;;  %v11750_v15 = vld [vmem:[#allocation23_spill] sm:$0xff]  ;;  %v10463_v57 = vld [vmem:[#allocation3 + $0x28] sm:$0xf]  ;;  %v10488_v35 = vld [vmem:[#allocation3 + $0x20] sm:$0x1] }
 0x248   : > { %3767 = vst [vmem:[#allocation3 + $0x6c] sm:$0xf] %v3766_v4  ;;  %v3777_v8 = vsel %vm8481_vm3, %v3557_v22, %v3776_v60  ;;  %v3917_v3 = vrot.slane %v3916_v16, 4  ;;  %7842 = vmatprep.subr.bf16.mxu0 %v8314_v49  ;;  %3775 = vst [vmem:[#allocation3 + $0x7c] sm:$0xf] %v3556_v34  ;;  %v4318_v23 = vrot.slane %v4316_v14, 4  ;;  %v2946_v62 = vadd.f32 %v10321_v24, %v11750_v15  ;;  %v3101_v16 = vpop.f32.mrf.mxu0 }
 0x249   : > { %3778 = vst [vmem:[#allocation3 + $0x80] sm:$0x1] %v3777_v8  ;;  %v3539_v44 = vsel %vm8537_vm12, %v3531_v25, %v3538_v59  ;;  %v3770_v55 = vsel %vm8481_vm3, %v3540_v30, %v3769_v10  ;;  %v10467_v6 = vadd.f32 %v10358_v1, %v10331_v38  ;;  %v10471_v49 = vadd.f32 %v10408_v53, %v10392_v46 }
 0x24a   : > { %3768 = vst [vmem:[#allocation3 + $0x70] sm:$0xf] %v3539_v44  ;;  %3771 = vst [vmem:[#allocation3 + $0x74] sm:$0x1] %v3770_v55  ;;  %v3912_v60 = vsel %vm8562_vm14, %v3907_v11, %v3911_v21  ;;  %v3922_v24 = vsel %vm8562_vm14, %v3917_v3, %v3921_v43  ;;  %v4317_v1 = vsel %vm8553_vm13, %v6821_v5, %v4316_v14  ;;  %v10490_v21 = vpop.f32.mrf.mxu1  ;;  %v8321_v11 = vld [vmem:[%s11594_s3 + $0x190] sm:$0xff]   ;;  %v3948_v51 = vshrl.u32 %v10461_v48, 16 }
 0x24b   : > { %v10477_v54 = vcombine.low %v3912_v60, %v3922_v24  ;;  %v4320_v46 = vsel %vm8553_vm13, %v4318_v23, %v4319_v20  ;;  %v3107_v53 = vadd.f32 %v10421_v33, %v2946_v62  ;;  %7843 = vmatpush3.bf16.msra.mxu0 %v8315_v39  ;;  %v10500_v5 = vcombine.low %v10461_v48, %v10463_v57  ;;  %v8326_v33 = vld [vmem:[%s11594_s3 + $0x1c8] sm:$0xff]   ;;  %v11753_v43 = vld [vmem:[#allocation24_spill] sm:$0xff] }
 0x24c   : > { %v10495_v19 = vcombine.low %v4317_v1, %v4320_v46  ;;  %v3926_v14 = vrot.slane %v3924_v47, 4  ;;  %7844 = vmatprep.subr.bf16.mxu0 %v8320_v12  ;;  %v3929_v61 = vrot.slane %v3927_v7, 5  ;;  %v3933_v22 = vshll.u32 %v10371_v52, 16  ;;  %v7460_v34 = vpop.f32.mrf.mxu1  ;;  %v8330_v1 = vld [vmem:[%s11594_s3 + $0x140] sm:$0xff]  }
 0x24d   : > { %5326 = vmatprep.mubr.bf16.mxu1 %v10477_v54  ;;  %v3167_v25 = vmax.f32 %v3107_v53, 0.0  ;;  %v3939_v10 = vrot.slane %v3937_v56, 4  ;;  %v3951_v47 = vshll.u32 %v10461_v48, 16  ;;  %v3961_v4 = vshrl.u32 %v10463_v57, 16  ;;  %v8332_v53 = vld [vmem:[%s11594_s3 + $0x1c0] sm:$0xff]   ;;  %7736 = vmatprep.subr.bf16.mxu1 %v8330_v1 }
 0x24e   : > { %5488 = vmatmul.mubr.bf16.gmra.mxu0 %v10495_v19  ;;  %5327 = vmatmul.mubr.bf16.gmra.mxu1 %v10354_v32  ;;  %v3943_v59 = vshll.u32 %v10488_v35, 16  ;;  %v3099_v30 = vadd.f32 %v3098_v2, %v10312_v45  ;;  %v3930_v7 = vor.u32 %v3929_v61, %v3926_v14  ;;  %v3935_v39 = vrot.slane %v3933_v22, 5  ;;  %v8327_v32 = vld [vmem:[%s11594_s3 + $0x188] sm:$0xff]   ;;  %v10541_v46 = vpop.f32.mrf.mxu1  ;;  %v8036_v22 = vpop.f32.mrf.mxu0 }
 0x24f   : > { %v7016_v20 = vpack.c.bf16 %v3167_v25, %v3167_v25  ;;  %5495 = vmatprep.mubr.bf16.mxu0 %v10500_v5  ;;  %v4326_v56 = vrot.slane %v10488_v35, 5  ;;  %7845 = vmatpush3.bf16.msra.mxu0 %v8321_v11  ;;  %v7458_v8 = vadd.f32 %v7457_v36, %v10426_v26  ;;  %v2949_v12 = vadd.f32 %v10327_v42, %v11753_v43  ;;  %v3786_v35 = vld [vmem:[#allocation3 + $0x90] sm:$0xf] }
 0x250   : > { %v3165_v3 = vmax.f32 %v3099_v30, 0.0  ;;  %v3102_v45 = vadd.f32 %v3101_v16, %v10318_v31  ;;  %7846 = vmatprep.subr.bf16.mxu0 %v8326_v33  ;;  %v3931_v44 = vrot.slane %v3930_v7, 4  ;;  %v3940_v55 = vor.u32 %v3939_v10, %v3935_v39 }
 0x251   : > { %v3576_v2 = vshrl.u32 %v7016_v20, 16  ;;  %v3945_v23 = vrot.slane %v3943_v59, 5  ;;  %v3579_v15 = vshll.u32 %v7016_v20, 16  ;;  %v3110_v60 = vadd.f32 %v8033_v40, %v2949_v12  ;;  %v8331_v40 = vld [vmem:[%s11594_s3 + $0x100] sm:$0xff]   ;;  %v10567_v12 = vpop.f32.mrf.mxu1 }
 0x252   : > { %v7014_v62 = vpack.c.bf16 %v3165_v3, %v3165_v3  ;;  %v3166_v24 = vmax.f32 %v3102_v45, 0.0  ;;  %v3941_v36 = vrot.slane %v3940_v55, 4  ;;  %v4324_v31 = vsel %vm8553_vm13, %v6822_v9, %v4323_v17  ;;  %7737 = vmatpush3.bf16.msra.mxu1 %v8331_v40  ;;  %v11754_v3 = vld [vmem:[#allocation27_spill] sm:$0xff] }
 0x253   : > { %v10531_v26 = vrot.slane %v3576_v2, 7  ;;  %v4325_v42 = vrot.slane %v4323_v17, 4  ;;  %7847 = vmatpush3.bf16.msra.mxu0 %v8327_v32  ;;  %v3936_v52 = vsel %vm8562_vm14, %v3931_v44, %v3935_v39  ;;  %v3168_v17 = vmax.f32 %v3110_v60, 0.0  ;;  %v3779_v39 = vld [vmem:[#allocation3 + $0x84] sm:$0xf] }
 0x254   : > { %v3559_v9 = vshrl.u32 %v7014_v62, 16  ;;  %v7015_v11 = vpack.c.bf16 %v3166_v24, %v3166_v24  ;;  %v3946_v33 = vsel %vm8562_vm14, %v3941_v36, %v3945_v23  ;;  %v3562_v25 = vshll.u32 %v7014_v62, 16  ;;  %7848 = vmatprep.subr.bf16.mxu0 %v8332_v53  ;;  %v10572_v55 = vld [vmem:[#allocation3 + $0x30] sm:$0xf]  ;;  %v10577_v60 = vld [vmem:[#allocation3 + $0x34] sm:$0xf]  ;;  %v3114_v24 = vpop.f32.mrf.mxu0 }
 0x255   : > { %v3581_v14 = vor.u32 %v3579_v15, %v10531_v26  ;;  %v4327_v61 = vsel %vm8553_vm13, %v4325_v42, %v4326_v56  ;;  %v10559_v10 = vcombine.low %v3936_v52, %v3946_v33  ;;  %v7017_v59 = vpack.c.bf16 %v3168_v17, %v3168_v17  ;;  %v3790_v42 = vld [vmem:[#allocation3 + $0x98] sm:$0x1] }
 0x256   : > { %v3561_v16 = vrot.slane %v3559_v9, 7  ;;  %v3567_v30 = vshrl.u32 %v7015_v11, 16  ;;  %v6823_v7 = vrot.slane %v10461_v48, 9  ;;  %v10564_v32 = vcombine.low %v4324_v31, %v4327_v61  ;;  %v3832_v61 = vld [vmem:[#allocation3 + $0x2c] sm:$0x1] }
 0x257   : > { %v3787_v20 = vsel %vm8528_vm11, %v3581_v14, %v3786_v35  ;;  %v2962_v43 = vadd.f32 %v7458_v8, %v11754_v3  ;;  %7849 = vmatpush3.bf16.msra.mxu0 %v8333_v27  ;;  %v4330_v56 = vrot.slane %v10463_v57, 5  ;;  %5334 = vmatprep.mubr.bf16.mxu1 %v10559_v10  ;;  %v3584_v2 = vshrl.u32 %v7017_v59, 16  ;;  %v7465_v35 = vpop.f32.mrf.mxu1 }
 0x258   : > { %3788 = vst [vmem:[#allocation3 + $0x90] sm:$0xf] %v3787_v20  ;;  %v3564_v45 = vor.u32 %v3562_v25, %v3561_v16  ;;  %v7461_v44 = vadd.f32 %v7460_v34, %v10490_v21  ;;  %v3582_v23 = vrot.slane %v10531_v26, 4  ;;  %v3569_v15 = vrot.slane %v3567_v30, 7  ;;  %5496 = vmatmul.mubr.bf16.gmra.mxu0 %v10564_v32  ;;  %5335 = vmatmul.mubr.bf16.gmra.mxu1 %v10388_v50  ;;  %v3783_v34 = vld [vmem:[#allocation3 + $0x8c] sm:$0x1] }
 0x259   : > { %v3570_v62 = vshll.u32 %v7015_v11, 16  ;;  %v3123_v8 = vadd.f32 %v8036_v22, %v2962_v43  ;;  %v3565_v1 = vrot.slane %v3561_v16, 4  ;;  %v3586_v31 = vrot.slane %v3584_v2, 7  ;;  %v8037_v16 = vpop.f32.mrf.mxu0 }
 0x25a   : > { %v3780_v36 = vsel %vm8528_vm11, %v3564_v45, %v3779_v39  ;;  %v3587_v21 = vshll.u32 %v7017_v59, 16  ;;  %v3574_v40 = vrot.slane %v3569_v15, 4  ;;  %v3972_v27 = vshrl.u32 %v10572_v55, 16  ;;  %v7466_v45 = vpop.f32.mrf.mxu1 }
 0x25b   : > { %3781 = vst [vmem:[#allocation3 + $0x84] sm:$0xf] %v3780_v36  ;;  %v3572_v26 = vor.u32 %v3570_v62, %v3569_v15  ;;  %v3171_v53 = vmax.f32 %v3123_v8, 0.0  ;;  %v3591_v9 = vrot.slane %v3586_v31, 4  ;;  %v10584_v17 = vcombine.low %v10572_v55, %v10577_v60  ;;  %v11755_v62 = vld [vmem:[#allocation25_spill] sm:$0xff] }
 0x25c   : > { %v3589_v52 = vor.u32 %v3587_v21, %v3586_v31  ;;  %v3950_v11 = vrot.slane %v3948_v51, 4  ;;  %v3784_v33 = vsel %vm8481_vm3, %v3574_v40, %v3783_v34  ;;  %v3953_v22 = vrot.slane %v3951_v47, 5  ;;  %v3117_v21 = vpop.f32.mrf.mxu0  ;;  %v3800_v34 = vld [vmem:[#allocation3 + $0xa8] sm:$0xf] }
 0x25d   : > { %v3573_v14 = vsel %vm8537_vm12, %v3565_v1, %v3572_v26  ;;  %v7020_v25 = vpack.c.bf16 %v3171_v53, %v3171_v53  ;;  %v3791_v30 = vsel %vm8481_vm3, %v3591_v9, %v3790_v42  ;;  %3785 = vst [vmem:[#allocation3 + $0x8c] sm:$0x1] %v3784_v33  ;;  %5503 = vmatprep.mubr.bf16.mxu0 %v10584_v17  ;;  %v3957_v51 = vshll.u32 %v10463_v57, 16  ;;  %v11756_v53 = vld [vmem:[#allocation26_spill] sm:$0xff]  ;;  %v8334_v9 = vld [vmem:[%s11594_s3 + $0x238] sm:$0xff]  }
 0x25e   : > { %v3590_v59 = vsel %vm8537_vm12, %v3582_v23, %v3589_v52  ;;  %3782 = vst [vmem:[#allocation3 + $0x88] sm:$0xf] %v3573_v14  ;;  %v3963_v20 = vrot.slane %v3961_v4, 4  ;;  %3792 = vst [vmem:[#allocation3 + $0x98] sm:$0x1] %v3791_v30  ;;  %v3975_v47 = vshll.u32 %v10572_v55, 16  ;;  %v3954_v43 = vor.u32 %v3953_v22, %v3950_v11  ;;  %8042 = vmatprep.subr.bf16.mxu1 %v8334_v9 }
 0x25f   : > { %3789 = vst [vmem:[#allocation3 + $0x94] sm:$0xf] %v3590_v59  ;;  %v3610_v39 = vshrl.u32 %v7020_v25, 16  ;;  %v3985_v3 = vshrl.u32 %v10577_v60, 16  ;;  %v6824_v2 = vrot.slane %v10572_v55, 9  ;;  %v3959_v23 = vrot.slane %v3957_v51, 5 }
 0x260   : > { %v3967_v15 = vshll.u32 %v3832_v61, 16  ;;  %v2954_v8 = vadd.f32 %v10467_v6, %v11755_v62  ;;  %v3613_v36 = vshll.u32 %v7020_v25, 16  ;;  %v4337_v4 = vrot.slane %v10577_v60, 5  ;;  %v10650_v62 = vld [vmem:[#allocation3 + $0x40] sm:$0xf] }
 0x261   : > { %v10607_v1 = vrot.slane %v3610_v39, 7  ;;  %v2965_v31 = vadd.f32 %v7461_v44, %v10129_v28  ;;  %v3955_v42 = vrot.slane %v3954_v43, 4  ;;  %v3964_v26 = vor.u32 %v3963_v20, %v3959_v23  ;;  %v10621_v44 = vpop.f32.mrf.mxu1  ;;  %v10638_v43 = vld [vmem:[#allocation3 + $0x3c] sm:$0xf] }
 0x262   : > { %v3115_v40 = vadd.f32 %v3114_v24, %v2954_v8  ;;  %v2957_v52 = vadd.f32 %v10471_v49, %v11756_v53  ;;  %v4333_v11 = vrot.slane %v3832_v61, 5  ;;  %v10619_v14 = vadd.f32 %v10567_v12, %v10541_v46  ;;  %v8335_v24 = vld [vmem:[%s11596_s5 + $0x38] sm:$0xff]   ;;  %v10632_v12 = vpop.f32.mrf.mxu0 }
 0x263   : > { %v3615_v6 = vor.u32 %v3613_v36, %v10607_v1  ;;  %v3126_v28 = vadd.f32 %v8037_v16, %v2965_v31  ;;  %v3965_v33 = vrot.slane %v3964_v26, 4  ;;  %v3969_v49 = vrot.slane %v3967_v15, 5  ;;  %8090 = vmatprep.subr.bf16.mxu0 %v8335_v24  ;;  %v7469_v8 = vpop.f32.mrf.mxu1 }
 0x264   : > { %v3169_v25 = vmax.f32 %v3115_v40, 0.0  ;;  %v3118_v22 = vadd.f32 %v3117_v21, %v2957_v52  ;;  %v10628_v30 = vadd.f32 %v7466_v45, %v7465_v35  ;;  %v4332_v46 = vrot.slane %v4330_v56, 4  ;;  %v3793_v40 = vld [vmem:[#allocation3 + $0x9c] sm:$0xf] }
 0x265   : > { %v3801_v59 = vsel %vm8528_vm11, %v3615_v6, %v3800_v34  ;;  %v3172_v61 = vmax.f32 %v3126_v28, 0.0  ;;  %v3960_v16 = vsel %vm8562_vm14, %v3955_v42, %v3959_v23  ;;  %v3970_v51 = vsel %vm8562_vm14, %v3965_v33, %v3969_v49  ;;  %v3835_v6 = vld [vmem:[#allocation3 + $0x38] sm:$0x1]  ;;  %v7471_v33 = vpop.f32.mrf.mxu1 }
 0x266   : > { %3802 = vst [vmem:[#allocation3 + $0xa8] sm:$0xf] %v3801_v59  ;;  %v7018_v20 = vpack.c.bf16 %v3169_v25, %v3169_v25  ;;  %v3170_v39 = vmax.f32 %v3118_v22, 0.0  ;;  %v10640_v15 = vcombine.low %v3960_v16, %v3970_v51  ;;  %v4331_v45 = vsel %vm8553_vm13, %v6823_v7, %v4330_v56  ;;  %v3130_v7 = vpop.f32.mrf.mxu0  ;;  %v3804_v22 = vld [vmem:[#allocation3 + $0xb0] sm:$0x1] }
 0x267   : > { %v7021_v35 = vpack.c.bf16 %v3172_v61, %v3172_v61  ;;  %v4334_v23 = vsel %vm8553_vm13, %v4332_v46, %v4333_v11  ;;  %v3616_v36 = vrot.slane %v10607_v1, 4  ;;  %v3996_v26 = vshrl.u32 %v10638_v43, 16  ;;  %v3797_v51 = vld [vmem:[#allocation3 + $0xa4] sm:$0x1] }
 0x268   : > { %v3593_v31 = vshrl.u32 %v7018_v20, 16  ;;  %v7019_v21 = vpack.c.bf16 %v3170_v39, %v3170_v39  ;;  %v10653_v34 = vcombine.low %v4331_v45, %v4334_v23  ;;  %5342 = vmatprep.mubr.bf16.mxu1 %v10640_v15  ;;  %v3596_v57 = vshll.u32 %v7018_v20, 16  ;;  %v8041_v39 = vpop.f32.mrf.mxu0 }
 0x269   : > { %v3618_v42 = vshrl.u32 %v7021_v35, 16  ;;  %v3621_v48 = vshll.u32 %v7021_v35, 16  ;;  %5343 = vmatmul.mubr.bf16.gmra.mxu1 %v10500_v5  ;;  %v10661_v1 = vcombine.low %v10638_v43, %v10650_v62  ;;  %v3974_v11 = vrot.slane %v3972_v27, 4 }
 0x26a   : > { %v3595_v56 = vrot.slane %v3593_v31, 7  ;;  %v3601_v53 = vshrl.u32 %v7019_v21, 16  ;;  %v3604_v52 = vshll.u32 %v7019_v21, 16  ;;  %5504 = vmatmul.mubr.bf16.gmra.mxu0 %v10653_v34  ;;  %v3977_v28 = vrot.slane %v3975_v47, 5 }
 0x26b   : > { %v3620_v9 = vrot.slane %v3618_v42, 7  ;;  %v3981_v24 = vshll.u32 %v10577_v60, 16  ;;  %5511 = vmatprep.mubr.bf16.mxu0 %v10661_v1  ;;  %v3987_v61 = vrot.slane %v3985_v3, 4  ;;  %v3991_v23 = vshll.u32 %v3835_v6, 16  ;;  %v7472_v42 = vpop.f32.mrf.mxu1 }
 0x26c   : > { %v3598_v49 = vor.u32 %v3596_v57, %v3595_v56  ;;  %v3599_v25 = vrot.slane %v3595_v56, 4  ;;  %v3603_v59 = vrot.slane %v3601_v53, 7  ;;  %v3978_v20 = vor.u32 %v3977_v28, %v3974_v11  ;;  %v11757_v11 = vld [vmem:[#allocation28_spill] sm:$0xff] }
 0x26d   : > { %v3623_v46 = vor.u32 %v3621_v48, %v3620_v9  ;;  %v3625_v16 = vrot.slane %v3620_v9, 4  ;;  %v3983_v27 = vrot.slane %v3981_v24, 5  ;;  %v3993_v53 = vrot.slane %v3991_v23, 5  ;;  %v3133_v24 = vpop.f32.mrf.mxu0 }
 0x26e   : > { %v3794_v47 = vsel %vm8528_vm11, %v3598_v49, %v3793_v40  ;;  %v3606_v35 = vor.u32 %v3604_v52, %v3603_v59  ;;  %v3608_v45 = vrot.slane %v3603_v59, 4  ;;  %v3979_v3 = vrot.slane %v3978_v20, 4 }
 0x26f   : > { %3795 = vst [vmem:[#allocation3 + $0x9c] sm:$0xf] %v3794_v47  ;;  %v3624_v31 = vsel %vm8537_vm12, %v3616_v36, %v3623_v46  ;;  %v3805_v21 = vsel %vm8481_vm3, %v3625_v16, %v3804_v22  ;;  %v3988_v57 = vor.u32 %v3987_v61, %v3983_v27  ;;  %v3999_v40 = vshll.u32 %v10638_v43, 16  ;;  %v10705_v46 = vld [vmem:[#allocation3 + $0x48] sm:$0xf] }
 0x270   : > { %3803 = vst [vmem:[#allocation3 + $0xac] sm:$0xf] %v3624_v31  ;;  %3806 = vst [vmem:[#allocation3 + $0xb0] sm:$0x1] %v3805_v21  ;;  %v3607_v48 = vsel %vm8537_vm12, %v3599_v25, %v3606_v35  ;;  %v3798_v56 = vsel %vm8481_vm3, %v3608_v45, %v3797_v51  ;;  %v4340_v52 = vrot.slane %v3835_v6, 5  ;;  %v7470_v9 = vadd.f32 %v7469_v8, %v10621_v44 }
 0x271   : > { %3796 = vst [vmem:[#allocation3 + $0xa0] sm:$0xf] %v3607_v48  ;;  %3799 = vst [vmem:[#allocation3 + $0xa4] sm:$0x1] %v3798_v56  ;;  %v3989_v36 = vrot.slane %v3988_v57, 4  ;;  %v2970_v28 = vadd.f32 %v10619_v14, %v11757_v11  ;;  %v3984_v49 = vsel %vm8562_vm14, %v3979_v3, %v3983_v27  ;;  %v7473_v25 = vadd.f32 %v7472_v42, %v7471_v33 }
 0x272   : > { %v2973_v22 = vadd.f32 %v10628_v30, %v10150_v63  ;;  %v4339_v59 = vrot.slane %v4337_v4, 4  ;;  %v2978_v6 = vadd.f32 %v7470_v9, %v10174_v29  ;;  %v4338_v14 = vsel %vm8553_vm13, %v6824_v2, %v4337_v4  ;;  %v10707_v16 = vld [vmem:[#allocation3 + $0x4c] sm:$0xf] }
 0x273   : > { %v3994_v61 = vsel %vm8562_vm14, %v3989_v36, %v3993_v53  ;;  %v3131_v44 = vadd.f32 %v3130_v7, %v2970_v28  ;;  %v2981_v63 = vadd.f32 %v7473_v25, %v10197_v0  ;;  %v4009_v29 = vshrl.u32 %v10650_v62, 16 }
 0x274   : > { %v10700_v8 = vcombine.low %v3984_v49, %v3994_v61  ;;  %v3134_v30 = vadd.f32 %v3133_v24, %v2973_v22  ;;  %v4341_v33 = vsel %vm8553_vm13, %v4339_v59, %v4340_v52  ;;  %v3139_v60 = vadd.f32 %v10632_v12, %v2978_v6  ;;  %v3814_v24 = vld [vmem:[#allocation3 + $0xc0] sm:$0xf]  ;;  %v3811_v61 = vld [vmem:[#allocation3 + $0xbc] sm:$0x1] }
 0x275   : > { %v3173_v55 = vmax.f32 %v3131_v44, 0.0  ;;  %v10711_v7 = vcombine.low %v4338_v14, %v4341_v33  ;;  %v6825_v2 = vrot.slane %v10638_v43, 9  ;;  %v4344_v4 = vrot.slane %v10650_v62, 5 }
 0x276   : > { %5350 = vmatprep.mubr.bf16.mxu1 %v10700_v8  ;;  %v3142_v0 = vadd.f32 %v8041_v39, %v2981_v63  ;;  %v3174_v51 = vmax.f32 %v3134_v30, 0.0  ;;  %v3175_v20 = vmax.f32 %v3139_v60, 0.0  ;;  %v4020_v47 = vshrl.u32 %v10705_v46, 16  ;;  %v3838_v60 = vld [vmem:[#allocation3 + $0x44] sm:$0x1] }
 0x277   : > { %v7022_v27 = vpack.c.bf16 %v3173_v55, %v3173_v55  ;;  %5512 = vmatmul.mubr.bf16.gmra.mxu0 %v10711_v7  ;;  %5351 = vmatmul.mubr.bf16.gmra.mxu1 %v10584_v17  ;;  %v10721_v12 = vcombine.low %v10705_v46, %v10707_v16  ;;  %v3998_v23 = vrot.slane %v3996_v26, 4  ;;  %v4001_v31 = vrot.slane %v3999_v40, 5  ;;  %v3807_v26 = vld [vmem:[#allocation3 + $0xb4] sm:$0xf] }
 0x278   : > { %v3176_v35 = vmax.f32 %v3142_v0, 0.0  ;;  %v7023_v45 = vpack.c.bf16 %v3174_v51, %v3174_v51  ;;  %v7024_v39 = vpack.c.bf16 %v3175_v20, %v3175_v20  ;;  %v4023_v3 = vshll.u32 %v10705_v46, 16  ;;  %v3818_v20 = vld [vmem:[#allocation3 + $0xc8] sm:$0x1] }
 0x279   : > { %v3627_v21 = vshrl.u32 %v7022_v27, 16  ;;  %5519 = vmatprep.mubr.bf16.mxu0 %v10721_v12  ;;  %v4005_v57 = vshll.u32 %v10650_v62, 16  ;;  %v3630_v42 = vshll.u32 %v7022_v27, 16  ;;  %v4002_v53 = vor.u32 %v4001_v31, %v3998_v23 }
 0x27a   : > { %v7025_v48 = vpack.c.bf16 %v3176_v35, %v3176_v35  ;;  %v3635_v56 = vshrl.u32 %v7023_v45, 16  ;;  %v3644_v36 = vshrl.u32 %v7024_v39, 16  ;;  %v3638_v9 = vshll.u32 %v7023_v45, 16 }
 0x27b   : > { %v3629_v52 = vrot.slane %v3627_v21, 7  ;;  %v4007_v11 = vrot.slane %v4005_v57, 5  ;;  %v3647_v28 = vshll.u32 %v7024_v39, 16  ;;  %v4003_v6 = vrot.slane %v4002_v53, 4 }
 0x27c   : > { %v3652_v40 = vshrl.u32 %v7025_v48, 16  ;;  %v3655_v49 = vshll.u32 %v7025_v48, 16  ;;  %v3637_v25 = vrot.slane %v3635_v56, 7  ;;  %v3646_v22 = vrot.slane %v3644_v36, 7  ;;  %v3841_v36 = vld [vmem:[#allocation3 + $0x50] sm:$0x1] }
 0x27d   : > { %v3632_v59 = vor.u32 %v3630_v42, %v3629_v52  ;;  %v4011_v44 = vrot.slane %v4009_v29, 4  ;;  %v3633_v14 = vrot.slane %v3629_v52, 4  ;;  %v4033_v39 = vshrl.u32 %v10707_v16, 16  ;;  %v10737_v42 = vld [vmem:[#allocation3 + $0x58] sm:$0xf] }
 0x27e   : > { %v3654_v63 = vrot.slane %v3652_v40, 7  ;;  %v3640_v30 = vor.u32 %v3638_v9, %v3637_v25  ;;  %v3642_v33 = vrot.slane %v3637_v25, 4  ;;  %v3649_v55 = vor.u32 %v3647_v28, %v3646_v22 }
 0x27f   : > { %v3650_v0 = vrot.slane %v3646_v22, 4  ;;  %v3808_v51 = vsel %vm8528_vm11, %v3632_v59, %v3807_v26  ;;  %v4012_v27 = vor.u32 %v4011_v44, %v4007_v11  ;;  %v4015_v57 = vshll.u32 %v3838_v60, 16 }
 0x280   : > { %3809 = vst [vmem:[#allocation3 + $0xb4] sm:$0xf] %v3808_v51  ;;  %v3657_v35 = vor.u32 %v3655_v49, %v3654_v63  ;;  %v3659_v45 = vrot.slane %v3654_v63, 4  ;;  %v3641_v23 = vsel %vm8537_vm12, %v3633_v14, %v3640_v30  ;;  %v3812_v29 = vsel %vm8481_vm3, %v3642_v33, %v3811_v61 }
 0x281   : > { %v3815_v31 = vsel %vm8528_vm11, %v3649_v55, %v3814_v24  ;;  %3810 = vst [vmem:[#allocation3 + $0xb8] sm:$0xf] %v3641_v23  ;;  %3813 = vst [vmem:[#allocation3 + $0xbc] sm:$0x1] %v3812_v29  ;;  %v4013_v21 = vrot.slane %v4012_v27, 4  ;;  %v4347_v53 = vrot.slane %v3838_v60, 5  ;;  %v4008_v37 = vsel %vm8562_vm14, %v4003_v6, %v4007_v11 }
 0x282   : > { %3816 = vst [vmem:[#allocation3 + $0xc0] sm:$0xf] %v3815_v31  ;;  %v3658_v48 = vsel %vm8537_vm12, %v3650_v0, %v3657_v35  ;;  %v3819_v56 = vsel %vm8481_vm3, %v3659_v45, %v3818_v20  ;;  %v4346_v58 = vrot.slane %v4344_v4, 4  ;;  %v6826_v52 = vrot.slane %v10705_v46, 9  ;;  %v3842_v24 = vld [vmem:[#allocation3 + $0x54] sm:$0xf] }
 0x283   : > { %3817 = vst [vmem:[#allocation3 + $0xc4] sm:$0xf] %v3658_v48  ;;  %3820 = vst [vmem:[#allocation3 + $0xc8] sm:$0x1] %v3819_v56  ;;  %v4351_v9 = vrot.slane %v10707_v16, 5  ;;  %v4017_v28 = vrot.slane %v4015_v57, 5  ;;  %v4345_v26 = vsel %vm8553_vm13, %v6825_v2, %v4344_v4  ;;  %v10758_v49 = vcombine.low %v3842_v24, %v10737_v42 }
 0x284   : > { %v4348_v40 = vsel %vm8553_vm13, %v4346_v58, %v4347_v53  ;;  %v4022_v11 = vrot.slane %v4020_v47, 4  ;;  %v4025_v62 = vrot.slane %v4023_v3, 5  ;;  %v4029_v43 = vshll.u32 %v10707_v16, 16  ;;  %v10773_v3 = vld [vmem:[#allocation3 + $0x60] sm:$0xf] }
 0x285   : > { %v4018_v25 = vsel %vm8562_vm14, %v4013_v21, %v4017_v28  ;;  %v10762_v22 = vcombine.low %v4345_v26, %v4348_v40  ;;  %v4035_v2 = vrot.slane %v4033_v39, 4  ;;  %v4039_v4 = vshll.u32 %v3841_v36, 16  ;;  %v10779_v60 = vld [vmem:[#allocation3 + $0x64] sm:$0xf]  ;;  %v3844_v27 = vld [vmem:[#allocation3 + $0x5c] sm:$0x1] }
 0x286   : > { %v10766_v59 = vcombine.low %v4008_v37, %v4018_v25  ;;  %v4044_v61 = vshrl.u32 %v3842_v24, 16  ;;  %v4047_v6 = vshll.u32 %v3842_v24, 16  ;;  %v4026_v44 = vor.u32 %v4025_v62, %v4022_v11  ;;  %v10797_v28 = vld [vmem:[#allocation3 + $0x6c] sm:$0xf]  ;;  %v10806_v62 = vld [vmem:[#allocation3 + $0x70] sm:$0xf] }
 0x287   : > { %5520 = vmatmul.mubr.bf16.gmra.mxu0 %v10762_v22  ;;  %v4353_v14 = vrot.slane %v4351_v9, 4  ;;  %v4057_v63 = vshrl.u32 %v10737_v42, 16  ;;  %v4031_v46 = vrot.slane %v4029_v43, 5  ;;  %v4354_v47 = vrot.slane %v3841_v36, 5 }
 0x288   : > { %5358 = vmatprep.mubr.bf16.mxu1 %v10766_v59  ;;  %5527 = vmatprep.mubr.bf16.mxu0 %v10758_v49  ;;  %v6827_v16 = vrot.slane %v3842_v24, 9  ;;  %v4358_v30 = vrot.slane %v10737_v42, 5  ;;  %v4352_v33 = vsel %vm8553_vm13, %v6826_v52, %v4351_v9  ;;  %v4027_v55 = vrot.slane %v4026_v44, 4 }
 0x289   : > { %5359 = vmatmul.mubr.bf16.gmra.mxu1 %v10661_v1  ;;  %v4036_v0 = vor.u32 %v4035_v2, %v4031_v46  ;;  %v4041_v51 = vrot.slane %v4039_v4, 5  ;;  %v4355_v20 = vsel %vm8553_vm13, %v4353_v14, %v4354_v47  ;;  %v4068_v35 = vshrl.u32 %v10773_v3, 16 }
 0x28a   : > { %v4046_v45 = vrot.slane %v4044_v61, 4  ;;  %v4049_v23 = vrot.slane %v4047_v6, 5  ;;  %v4053_v29 = vshll.u32 %v10737_v42, 16  ;;  %v4071_v39 = vshll.u32 %v10773_v3, 16  ;;  %v3847_v61 = vld [vmem:[#allocation3 + $0x68] sm:$0x1] }
 0x28b   : > { %v4037_v31 = vrot.slane %v4036_v0, 4  ;;  %v4081_v21 = vshrl.u32 %v10779_v60, 16  ;;  %v4059_v57 = vrot.slane %v4057_v63, 4  ;;  %v10787_v48 = vcombine.low %v4352_v33, %v4355_v20 }
 0x28c   : > { %v4050_v56 = vor.u32 %v4049_v23, %v4046_v45  ;;  %v4055_v53 = vrot.slane %v4053_v29, 5  ;;  %v4063_v58 = vshll.u32 %v3844_v27, 16  ;;  %v4032_v36 = vsel %vm8562_vm14, %v4027_v55, %v4031_v46 }
 0x28d   : > { %v4042_v52 = vsel %vm8562_vm14, %v4037_v31, %v4041_v51  ;;  %v10795_v42 = vcombine.low %v10773_v3, %v10779_v60  ;;  %v4360_v9 = vrot.slane %v4358_v30, 4  ;;  %v4365_v40 = vrot.slane %v10779_v60, 5  ;;  %v10830_v31 = vld [vmem:[#allocation3 + $0x78] sm:$0xf] }
 0x28e   : > { %v10799_v24 = vcombine.low %v4032_v36, %v4042_v52  ;;  %v4051_v37 = vrot.slane %v4050_v56, 4  ;;  %v4060_v26 = vor.u32 %v4059_v57, %v4055_v53  ;;  %v4361_v25 = vrot.slane %v3844_v27, 5  ;;  %v10835_v36 = vld [vmem:[#allocation3 + $0x7c] sm:$0xf] }
 0x28f   : > { %11758 = vst [vmem:[#allocation16_spill] sm:$0xff] %v10795_v42  ;;  %5528 = vmatmul.mubr.bf16.gmra.mxu0 %v10787_v48  ;;  %v4359_v11 = vsel %vm8553_vm13, %v6827_v16, %v4358_v30  ;;  %v4065_v2 = vrot.slane %v4063_v58, 5  ;;  %v4092_v4 = vshrl.u32 %v10797_v28, 16  ;;  %v4070_v6 = vrot.slane %v4068_v35, 4 }
 0x290   : > { %5535 = vmatprep.mubr.bf16.mxu0 %v10795_v42  ;;  %5366 = vmatprep.mubr.bf16.mxu1 %v10799_v24  ;;  %v4061_v43 = vrot.slane %v4060_v26, 4  ;;  %v4362_v44 = vsel %vm8553_vm13, %v4360_v9, %v4361_v25  ;;  %v4073_v14 = vrot.slane %v4071_v39, 5  ;;  %v4077_v63 = vshll.u32 %v10779_v60, 16  ;;  %v3850_v39 = vld [vmem:[#allocation3 + $0x74] sm:$0x1] }
 0x291   : > { %5367 = vmatmul.mubr.bf16.gmra.mxu1 %v10721_v12  ;;  %v4083_v46 = vrot.slane %v4081_v21, 4  ;;  %v4056_v47 = vsel %vm8562_vm14, %v4051_v37, %v4055_v53  ;;  %v4095_v30 = vshll.u32 %v10797_v28, 16  ;;  %v4105_v33 = vshrl.u32 %v10806_v62, 16 }
 0x292   : > { %v4066_v16 = vsel %vm8562_vm14, %v4061_v43, %v4065_v2  ;;  %v4074_v0 = vor.u32 %v4073_v14, %v4070_v6  ;;  %v4079_v51 = vrot.slane %v4077_v63, 5  ;;  %v4087_v20 = vshll.u32 %v3847_v61, 16 }
 0x293   : > { %v10820_v55 = vcombine.low %v4056_v47, %v4066_v16  ;;  %v10822_v27 = vcombine.low %v4359_v11, %v4362_v44  ;;  %v4367_v35 = vrot.slane %v4365_v40, 4  ;;  %v6828_v60 = vrot.slane %v10773_v3, 9  ;;  %v10854_v47 = vld [vmem:[#allocation3 + $0x84] sm:$0xf]  ;;  %v3853_v16 = vld [vmem:[#allocation3 + $0x80] sm:$0x1] }
 0x294   : > { %v10828_v45 = vcombine.low %v10797_v28, %v10806_v62  ;;  %v4075_v23 = vrot.slane %v4074_v0, 4  ;;  %v4084_v29 = vor.u32 %v4083_v46, %v4079_v51  ;;  %v4372_v21 = vrot.slane %v10806_v62, 5 }
 0x295   : > { %11759 = vst [vmem:[#allocation9_spill] sm:$0xff] %v10822_v27  ;;  %5374 = vmatprep.mubr.bf16.mxu1 %v10820_v55  ;;  %v4368_v57 = vrot.slane %v3847_v61, 5  ;;  %v4094_v56 = vrot.slane %v4092_v4, 4  ;;  %v4097_v53 = vrot.slane %v4095_v30, 5  ;;  %v4089_v58 = vrot.slane %v4087_v20, 5 }
 0x296   : > { %11760 = vst [vmem:[#allocation11_spill] sm:$0xff] %v10828_v45  ;;  %v4085_v3 = vrot.slane %v4084_v29, 4  ;;  %v4101_v52 = vshll.u32 %v10806_v62, 16  ;;  %v4107_v9 = vrot.slane %v4105_v33, 4  ;;  %v4116_v26 = vshrl.u32 %v10830_v31, 16 }
 0x297   : > { %5536 = vmatmul.mubr.bf16.gmra.mxu0 %v10822_v27  ;;  %v4369_v37 = vsel %vm8553_vm13, %v4367_v35, %v4368_v57  ;;  %v4098_v25 = vor.u32 %v4097_v53, %v4094_v56  ;;  %v4111_v11 = vshll.u32 %v3850_v39, 16  ;;  %v4080_v43 = vsel %vm8562_vm14, %v4075_v23, %v4079_v51 }
 0x298   : > { %5543 = vmatprep.mubr.bf16.mxu0 %v10828_v45  ;;  %v4090_v2 = vsel %vm8562_vm14, %v4085_v3, %v4089_v58  ;;  %v4119_v4 = vshll.u32 %v10830_v31, 16  ;;  %v4103_v61 = vrot.slane %v4101_v52, 5  ;;  %v4366_v6 = vsel %vm8553_vm13, %v6828_v60, %v4365_v40  ;;  %v10861_v40 = vld [vmem:[#allocation3 + $0x88] sm:$0xf] }
 0x299   : > { %5375 = vmatmul.mubr.bf16.gmra.mxu1 %v10758_v49  ;;  %v10847_v62 = vcombine.low %v4080_v43, %v4090_v2  ;;  %v4129_v44 = vshrl.u32 %v10835_v36, 16  ;;  %v10852_v14 = vcombine.low %v4366_v6, %v4369_v37  ;;  %v4099_v63 = vrot.slane %v4098_v25, 4 }
 0x29a   : > { %v4108_v46 = vor.u32 %v4107_v9, %v4103_v61  ;;  %v10859_v30 = vcombine.low %v10830_v31, %v10835_v36  ;;  %v4113_v33 = vrot.slane %v4111_v11, 5  ;;  %v4375_v0 = vrot.slane %v3850_v39, 5 }
 0x29b   : > { %11761 = vst [vmem:[#allocation20_spill] sm:$0xff] %v10852_v14  ;;  %5382 = vmatprep.mubr.bf16.mxu1 %v10847_v62  ;;  %v4374_v51 = vrot.slane %v4372_v21, 4  ;;  %v4118_v35 = vrot.slane %v4116_v26, 4  ;;  %v4121_v60 = vrot.slane %v4119_v4, 5  ;;  %v4125_v23 = vshll.u32 %v10835_v36, 16 }
 0x29c   : > { %11762 = vst [vmem:[#allocation19_spill] sm:$0xff] %v10859_v30  ;;  %v4109_v20 = vrot.slane %v4108_v46, 4  ;;  %v4140_v29 = vshrl.u32 %v10854_v47, 16  ;;  %v4143_v57 = vshll.u32 %v10854_v47, 16  ;;  %v4131_v56 = vrot.slane %v4129_v44, 4 }
 0x29d   : > { %v4135_v53 = vshll.u32 %v3853_v16, 16  ;;  %v4104_v39 = vsel %vm8562_vm14, %v4099_v63, %v4103_v61  ;;  %v4122_v58 = vor.u32 %v4121_v60, %v4118_v35  ;;  %v4127_v52 = vrot.slane %v4125_v23, 5  ;;  %v10883_v61 = vld [vmem:[#allocation3 + $0x90] sm:$0xf]  ;;  %v10885_v44 = vld [vmem:[#allocation3 + $0x94] sm:$0xf] }
 0x29e   : > { %v4114_v3 = vsel %vm8562_vm14, %v4109_v20, %v4113_v33  ;;  %v6829_v9 = vrot.slane %v10797_v28, 9  ;;  %v4153_v26 = vshrl.u32 %v10861_v40, 16  ;;  %v4379_v25 = vrot.slane %v10835_v36, 5  ;;  %v3856_v36 = vld [vmem:[#allocation3 + $0x8c] sm:$0x1] }
 0x29f   : > { %5544 = vmatmul.mubr.bf16.gmra.mxu0 %v10852_v14  ;;  %v10873_v37 = vcombine.low %v4104_v39, %v4114_v3  ;;  %v4376_v11 = vsel %vm8553_vm13, %v4374_v51, %v4375_v0  ;;  %v4132_v43 = vor.u32 %v4131_v56, %v4127_v52  ;;  %v4137_v4 = vrot.slane %v4135_v53, 5 }
 0x2a0   : > { %5551 = vmatprep.mubr.bf16.mxu0 %v10859_v30  ;;  %v4373_v2 = vsel %vm8553_vm13, %v6829_v9, %v4372_v21  ;;  %v4123_v28 = vrot.slane %v4122_v58, 4  ;;  %v4142_v63 = vrot.slane %v4140_v29, 4  ;;  %v4145_v46 = vrot.slane %v4143_v57, 5 }
 0x2a1   : > { %11763 = vst [vmem:[#allocation13_spill] sm:$0xff] %v10873_v37  ;;  %5383 = vmatmul.mubr.bf16.gmra.mxu1 %v10795_v42  ;;  %v4133_v6 = vrot.slane %v4132_v43, 4  ;;  %v10887_v33 = vcombine.low %v4373_v2, %v4376_v11  ;;  %v4149_v0 = vshll.u32 %v10861_v40, 16  ;;  %v4155_v51 = vrot.slane %v4153_v26, 4  ;;  %v10910_v43 = vld [vmem:[#allocation3 + $0xa0] sm:$0xf] }
 0x2a2   : > { %5390 = vmatprep.mubr.bf16.mxu1 %v10873_v37  ;;  %v10892_v20 = vcombine.low %v10854_v47, %v10861_v40  ;;  %v4381_v35 = vrot.slane %v4379_v25, 4  ;;  %v4382_v60 = vrot.slane %v3853_v16, 5  ;;  %v4164_v23 = vshrl.u32 %v10883_v61, 16 }
 0x2a3   : > { %11764 = vst [vmem:[#allocation12_spill] sm:$0xff] %v10887_v33  ;;  %v4138_v21 = vsel %vm8562_vm14, %v4133_v6, %v4137_v4  ;;  %v4177_v29 = vshrl.u32 %v10885_v44, 16  ;;  %v4151_v57 = vrot.slane %v4149_v0, 5  ;;  %v4128_v56 = vsel %vm8562_vm14, %v4123_v28, %v4127_v52 }
 0x2a4   : > { %11765 = vst [vmem:[#allocation21_spill] sm:$0xff] %v10892_v20  ;;  %v4167_v53 = vshll.u32 %v10883_v61, 16  ;;  %v4146_v39 = vor.u32 %v4145_v46, %v4142_v63  ;;  %v4159_v3 = vshll.u32 %v3856_v36, 16  ;;  %v6830_v58 = vrot.slane %v10830_v31, 9  ;;  %v10916_v63 = vld [vmem:[#allocation3 + $0x9c] sm:$0xf] }
 0x2a5   : > { %v10904_v9 = vcombine.low %v4128_v56, %v4138_v21  ;;  %v4156_v26 = vor.u32 %v4155_v51, %v4151_v57  ;;  %v4386_v16 = vrot.slane %v10861_v40, 5  ;;  %v4383_v11 = vsel %vm8553_vm13, %v4381_v35, %v4382_v60  ;;  %v3859_v21 = vld [vmem:[#allocation3 + $0x98] sm:$0x1] }
 0x2a6   : > { %v4380_v52 = vsel %vm8553_vm13, %v6830_v58, %v4379_v25  ;;  %v4173_v31 = vshll.u32 %v10885_v44, 16  ;;  %v4179_v4 = vrot.slane %v4177_v29, 4  ;;  %v4147_v28 = vrot.slane %v4146_v39, 4 }
 0x2a7   : > { %5552 = vmatmul.mubr.bf16.gmra.mxu0 %v10887_v33  ;;  %11766 = vst [vmem:[#allocation8_spill] sm:$0xff] %v10904_v9  ;;  %v4157_v2 = vrot.slane %v4156_v26, 4  ;;  %v4161_v6 = vrot.slane %v4159_v3, 5  ;;  %v4166_v46 = vrot.slane %v4164_v23, 4  ;;  %v4169_v40 = vrot.slane %v4167_v53, 5 }
 0x2a8   : > { %5559 = vmatprep.mubr.bf16.mxu0 %v10892_v20  ;;  %v10918_v0 = vcombine.low %v4380_v52, %v4383_v11  ;;  %v4201_v51 = vshrl.u32 %v10910_v43, 16  ;;  %v4175_v35 = vrot.slane %v4173_v31, 5  ;;  %v4393_v60 = vrot.slane %v10885_v44, 5  ;;  %v10941_v33 = vld [vmem:[#allocation3 + $0xac] sm:$0xf] }
 0x2a9   : > { %5391 = vmatmul.mubr.bf16.gmra.mxu1 %v10828_v45  ;;  %v10924_v25 = vcombine.low %v10883_v61, %v10885_v44  ;;  %v4162_v29 = vsel %vm8562_vm14, %v4157_v2, %v4161_v6  ;;  %v4388_v56 = vrot.slane %v4386_v16, 4  ;;  %v4188_v23 = vshrl.u32 %v10916_v63, 16 }
 0x2aa   : > { %5398 = vmatprep.mubr.bf16.mxu1 %v10904_v9  ;;  %11767 = vst [vmem:[#allocation17_spill] sm:$0xff] %v10918_v0  ;;  %v4191_v53 = vshll.u32 %v10916_v63, 16  ;;  %v4180_v39 = vor.u32 %v4179_v4, %v4175_v35  ;;  %v4152_v3 = vsel %vm8562_vm14, %v4147_v28, %v4151_v57  ;;  %v4389_v58 = vrot.slane %v3856_v36, 5 }
 0x2ab   : > { %11768 = vst [vmem:[#allocation15_spill] sm:$0xff] %v10924_v25  ;;  %v4170_v26 = vor.u32 %v4169_v40, %v4166_v46  ;;  %v4183_v44 = vshll.u32 %v3859_v21, 16  ;;  %v6831_v11 = vrot.slane %v10854_v47, 9  ;;  %v10935_v52 = vcombine.low %v4152_v3, %v4162_v29  ;;  %v10946_v47 = vld [vmem:[#allocation3 + $0xa8] sm:$0xf]  ;;  %v11786_v38 = vld [vmem:[#allocation21_spill] sm:$0xff] }
 0x2ac   : > { %v4197_v2 = vshll.u32 %v10910_v43, 16  ;;  %v4203_v31 = vrot.slane %v4201_v51, 4  ;;  %v4390_v4 = vsel %vm8553_vm13, %v4388_v56, %v4389_v58  ;;  %v4181_v6 = vrot.slane %v4180_v39, 4  ;;  %v3862_v56 = vld [vmem:[#allocation3 + $0xa4] sm:$0x1] }
 0x2ad   : > { %11769 = vst [vmem:[#allocation4_spill] sm:$0xff] %v10935_v52  ;;  %v4387_v36 = vsel %vm8553_vm13, %v6831_v11, %v4386_v16  ;;  %v4190_v57 = vrot.slane %v4188_v23, 4  ;;  %v4193_v28 = vrot.slane %v4191_v53, 5  ;;  %v4400_v40 = vrot.slane %v10910_v43, 5 }
 0x2ae   : > { %v4199_v46 = vrot.slane %v4197_v2, 5  ;;  %v4171_v51 = vrot.slane %v4170_v26, 4  ;;  %v4185_v29 = vrot.slane %v4183_v44, 5  ;;  %v4396_v3 = vrot.slane %v3859_v21, 5 }
 0x2af   : > { %5560 = vmatmul.mubr.bf16.gmra.mxu0 %v10918_v0  ;;  %v4395_v0 = vrot.slane %v4393_v60, 4  ;;  %v6832_v39 = vrot.slane %v10883_v61, 9  ;;  %v10950_v58 = vcombine.low %v4387_v36, %v4390_v4  ;;  %v10955_v16 = vcombine.low %v10916_v63, %v10910_v43 }
 0x2b0   : > { %5567 = vmatprep.mubr.bf16.mxu0 %v10924_v25  ;;  %v4186_v23 = vsel %vm8562_vm14, %v4181_v6, %v4185_v29  ;;  %v4212_v21 = vshrl.u32 %v10946_v47, 16  ;;  %v4215_v61 = vshll.u32 %v10946_v47, 16  ;;  %v4194_v26 = vor.u32 %v4193_v28, %v4190_v57  ;;  %v10972_v6 = vld [vmem:[#allocation3 + $0xb8] sm:$0xf] }
 0x2b1   : > { %5399 = vmatmul.mubr.bf16.gmra.mxu1 %v10859_v30  ;;  %11770 = vst [vmem:[#allocation5_spill] sm:$0xff] %v10950_v58  ;;  %v4204_v30 = vor.u32 %v4203_v31, %v4199_v46  ;;  %v4397_v53 = vsel %vm8553_vm13, %v4395_v0, %v4396_v3  ;;  %v4207_v44 = vshll.u32 %v3862_v56, 16  ;;  %v4221_v11 = vshll.u32 %v10941_v33, 16 }
 0x2b2   : > { %5406 = vmatprep.mubr.bf16.mxu1 %v10935_v52  ;;  %v4225_v52 = vshrl.u32 %v10941_v33, 16  ;;  %v4176_v43 = vsel %vm8562_vm14, %v4171_v51, %v4175_v35  ;;  %v4394_v2 = vsel %vm8553_vm13, %v6832_v39, %v4393_v60  ;;  %v4402_v31 = vrot.slane %v4400_v40, 4  ;;  %v10980_v35 = vld [vmem:[#allocation3 + $0xb0] sm:$0x1]  ;;  %v10982_v51 = vld [vmem:[#allocation3 + $0xc0] sm:$0xf]  ;;  %v7514_v60 = vpop.f32.mrf.mxu1 }
 0x2b3   : > { %v10970_v0 = vcombine.low %v4176_v43, %v4186_v23  ;;  %v4205_v4 = vrot.slane %v4204_v30, 4  ;;  %v10974_v36 = vrot.slane %v4221_v11, 5  ;;  %v6833_v28 = vrot.slane %v10916_v63, 9  ;;  %v10985_v23 = vld [vmem:[#allocation3 + $0xb4] sm:$0xf] }
 0x2b4   : > { %v4227_v57 = vrot.slane %v4225_v52, 4  ;;  %v10978_v29 = vcombine.low %v4394_v2, %v4397_v53  ;;  %v4403_v3 = vrot.slane %v3862_v56, 5  ;;  %v4195_v30 = vrot.slane %v4194_v26, 4  ;;  %v10995_v2 = vld [vmem:[#allocation3 + $0xc4] sm:$0xf] }
 0x2b5   : > { %11771 = vst [vmem:[#allocation10_spill] sm:$0xff] %v10970_v0  ;;  %v4209_v39 = vrot.slane %v4207_v44, 5  ;;  %v4214_v11 = vrot.slane %v4212_v21, 4  ;;  %v4217_v52 = vrot.slane %v4215_v61, 5  ;;  %v10990_v63 = vcombine.low %v10946_v47, %v10941_v33 }
 0x2b6   : > { %11772 = vst [vmem:[#allocation22_spill] sm:$0xff] %v10978_v29  ;;  %v4404_v56 = vsel %vm8553_vm13, %v4402_v31, %v4403_v3  ;;  %v4249_v53 = vshrl.u32 %v10972_v6, 16  ;;  %v4228_v44 = vor.u32 %v4227_v57, %v10974_v36  ;;  %v4420_v21 = vshrl.u32 %v10982_v51, 16 }
 0x2b7   : > { %5568 = vmatmul.mubr.bf16.gmra.mxu0 %v10950_v58  ;;  %v4210_v26 = vsel %vm8562_vm14, %v4205_v4, %v4209_v39  ;;  %v4245_v61 = vshll.u32 %v10972_v6, 16  ;;  %v4401_v43 = vsel %vm8553_vm13, %v6833_v28, %v4400_v40  ;;  %v4236_v58 = vshrl.u32 %v10985_v23, 16 }
 0x2b8   : > { %5575 = vmatprep.mubr.bf16.mxu0 %v10955_v16  ;;  %v4231_v31 = vshll.u32 %v10980_v35, 16  ;;  %v4423_v3 = vshll.u32 %v10982_v51, 16  ;;  %v4200_v4 = vsel %vm8562_vm14, %v4195_v30, %v4199_v46  ;;  %v4218_v57 = vor.u32 %v4217_v52, %v4214_v11  ;;  %v3871_v11 = vld [vmem:[#allocation3 + $0xc8] sm:$0x1] }
 0x2b9   : > { %5407 = vmatmul.mubr.bf16.gmra.mxu1 %v10892_v20  ;;  %v4433_v39 = vshrl.u32 %v10995_v2, 16  ;;  %v11014_v40 = vcombine.low %v4200_v4, %v4210_v26  ;;  %v11016_v28 = vcombine.low %v4401_v43, %v4404_v56  ;;  %v4239_v9 = vshll.u32 %v10985_v23, 16 }
 0x2ba   : > { %5414 = vmatprep.mubr.bf16.mxu1 %v10970_v0  ;;  %v7515_v0 = vpop.f32.mrf.mxu1  ;;  %v4229_v45 = vrot.slane %v4228_v44, 4  ;;  %v4247_v14 = vrot.slane %v4245_v61, 5  ;;  %v4251_v37 = vrot.slane %v4249_v53, 4  ;;  %v11022_v46 = vcombine.low %v10985_v23, %v10972_v6 }
 0x2bb   : > { %v11011_v20 = vadd.f32 %v7515_v0, %v7514_v60  ;;  %11773 = vst [vmem:[#allocation18_spill] sm:$0xff] %v11014_v40  ;;  %v4233_v0 = vrot.slane %v4231_v31, 5  ;;  %v11774_v60 = vrot.slane %v10941_v33, 5  ;;  %v4425_v52 = vrot.slane %v4423_v3, 5 }
 0x2bc   : > { %v4219_v43 = vrot.slane %v4218_v57, 4  ;;  %v4238_v56 = vrot.slane %v4236_v58, 4  ;;  %v4429_v26 = vshll.u32 %v10995_v2, 16  ;;  %v4435_v53 = vrot.slane %v4433_v39, 4 }
 0x2bd   : > { %v4409_v30 = vrot.slane %v11774_v60, 4  ;;  %v4241_v44 = vrot.slane %v4239_v9, 5  ;;  %v6836_v61 = vrot.slane %v10982_v51, 9  ;;  %v4448_v4 = vrot.slane %v10995_v2, 5 }
 0x2be   : > { %v4234_v31 = vsel %vm8562_vm14, %v4229_v45, %v4233_v0  ;;  %v4252_v60 = vor.u32 %v4251_v37, %v4247_v14  ;;  %v4431_v42 = vrot.slane %v4429_v26, 5  ;;  %v4439_v3 = vshll.u32 %v3871_v11, 16 }
 0x2bf   : > { %5576 = vmatmul.mubr.bf16.gmra.mxu0 %v10978_v29  ;;  %v4422_v29 = vrot.slane %v4420_v21, 4  ;;  %v4449_v58 = vsel %vm8553_vm13, %v6836_v61, %v4448_v4  ;;  %v4450_v57 = vrot.slane %v4448_v4, 4  ;;  %v4224_v9 = vsel %vm8562_vm14, %v4219_v43, %v10974_v36 }
 0x2c0   : > { %5583 = vmatprep.mubr.bf16.mxu0 %v10990_v63  ;;  %v4436_v39 = vor.u32 %v4435_v53, %v4431_v42  ;;  %v4242_v45 = vor.u32 %v4241_v44, %v4238_v56  ;;  %v6834_v36 = vrot.slane %v10946_v47, 9  ;;  %v4253_v56 = vrot.slane %v4252_v60, 4 }
 0x2c1   : > { %5415 = vmatmul.mubr.bf16.gmra.mxu1 %v10924_v25  ;;  %v4426_v21 = vor.u32 %v4425_v52, %v4422_v29  ;;  %v3868_v25 = vld [vmem:[#allocation3 + $0xbc] sm:$0x1]  ;;  %v4410_v29 = vrot.slane %v10980_v35, 5  ;;  %v4414_v35 = vrot.slane %v10972_v6, 5  ;;  %v11066_v6 = vcombine.low %v10982_v51, %v10995_v2 }
 0x2c2   : > { %5422 = vmatprep.mubr.bf16.mxu1 %v11014_v40  ;;  %v4451_v40 = vrot.slane %v3871_v11, 5  ;;  %v4255_v37 = vshll.u32 %v3868_v25, 16  ;;  %v11044_v11 = vcombine.low %v4224_v9, %v4234_v31  ;;  %v4437_v26 = vrot.slane %v4436_v39, 4  ;;  %v8338_v39 = vld [vmem:[%s11594_s3 + $0x228] sm:$0xff]  }
 0x2c3   : > { %v4427_v27 = vrot.slane %v4426_v21, 4  ;;  %v4441_v21 = vrot.slane %v4439_v3, 5  ;;  %v4411_v43 = vsel %vm8553_vm13, %v4409_v30, %v4410_v29  ;;  %v4243_v53 = vrot.slane %v4242_v45, 4  ;;  %v8337_v29 = vld [vmem:[%s11596_s5 + $0x30] sm:$0xff]   ;;  %v8341_v45 = vld [vmem:[%s11596_s5 + $0x20] sm:$0xff]  }
 0x2c4   : > { %v4452_v52 = vsel %vm8553_vm13, %v4450_v57, %v4451_v40  ;;  %v4257_v47 = vrot.slane %v4255_v37, 5  ;;  %v4416_v31 = vrot.slane %v4414_v35, 4  ;;  %v4417_v60 = vrot.slane %v3868_v25, 5  ;;  %v3289_v25 = vld [vmem:[#allocation3 + $0xd4] sm:$0x1]  ;;  %v8343_v37 = vld [vmem:[%s11596_s5 + $0x18] sm:$0xff]  }
 0x2c5   : > { %v4432_v0 = vsel %vm8562_vm14, %v4427_v27, %v4431_v42  ;;  %v11046_v61 = vcombine.low %v4449_v58, %v4452_v52  ;;  %v4442_v42 = vsel %vm8562_vm14, %v4437_v26, %v4441_v21  ;;  %v11775_v27 = vrot.slane %v10941_v33, 5  ;;  %v8347_v52 = vld [vmem:[%s11596_s5 + $0x8] sm:$0xff]   ;;  %v7517_v26 = vpop.f32.mrf.mxu1  ;;  %v11155_v21 = vld [vmem:[%s11595_s4] ss:$0 sm:$0xff] }
 0x2c6   : > { %v11060_v44 = vcombine.low %v4432_v0, %v4442_v42  ;;  %v4258_v30 = vsel %vm8562_vm14, %v4253_v56, %v4257_v47  ;;  %v4248_v33 = vsel %vm8562_vm14, %v4243_v53, %v4247_v14  ;;  %v6835_v58 = vrot.slane %v10985_v23, 9  ;;  %v3235_v14 = vld [vmem:[#allocation3 + $0xcc] sm:$0x1]  ;;  %v8345_v0 = vld [vmem:[%s11596_s5 + $0x10] sm:$0xff]  }
 0x2c7   : > { %5584 = vmatmul.mubr.bf16.gmra.mxu0 %v11016_v28  ;;  %v4408_v40 = vsel %vm8553_vm13, %v6834_v36, %v11775_v27  ;;  %v11074_v3 = vcombine.low %v4248_v33, %v4258_v30  ;;  %v4418_v51 = vsel %vm8553_vm13, %v4416_v31, %v4417_v60  ;;  %v3236_v23 = vsel %vm8481_vm3, 0, %v3235_v14  ;;  %v8348_v36 = vld [vmem:[%s11594_s3 + $0x200] sm:$0xff]   ;;  %v11777_v60 = vld [vmem:[#allocation16_spill] sm:$0xff] }
 0x2c8   : > { %5591 = vmatprep.mubr.bf16.mxu0 %v11022_v46  ;;  %v11062_v4 = vcombine.low %v4408_v40, %v4411_v43  ;;  %v4415_v2 = vsel %vm8553_vm13, %v6835_v58, %v4414_v35  ;;  %v3290_v9 = vsel %vm8499_vm6, 0, %v3289_v25  ;;  %3237 = vst [vmem:[#allocation3 + $0xcc] sm:$0x1] %v3236_v23  ;;  %v7518_v43 = vpop.f32.mrf.mxu1  ;;  %v11778_v58 = vld [vmem:[#allocation13_spill] sm:$0xff]  ;;  %v11779_v23 = vld [vmem:[#allocation20_spill] sm:$0xff] }
 0x2c9   : > { %5423 = vmatmul.mubr.bf16.gmra.mxu1 %v10955_v16  ;;  %v11083_v57 = vcombine.low %v4415_v2, %v4418_v51  ;;  %3291 = vst [vmem:[#allocation3 + $0xd4] sm:$0x1] %v3290_v9  ;;  %v7519_v42 = vadd.f32 %v7518_v43, %v7517_v26 }
 0x2ca   : > { %5430 = vmatprep.mubr.bf16.mxu1 %v11044_v11 }
 0x2cb   : > { %v5324_v47 = vadd.f32 %v7519_v42, %v11155_v21 }
 0x2cf   : > { %5592 = vmatmul.mubr.bf16.gmra.mxu0 %v11062_v4 }
 0x2d0   : > { %5599 = vmatprep.mubr.bf16.mxu0 %v11066_v6 }
 0x2d1   : > { %5431 = vmatmul.mubr.bf16.gmra.mxu1 %v10990_v63 }
 0x2d2   : > { %5438 = vmatprep.mubr.bf16.mxu1 %v11074_v3 }
 0x2d7   : > { %5600 = vmatmul.mubr.bf16.gmra.mxu0 %v11083_v57 }
 0x2d8   : > { %5801 = vmatprep.mubr.bf16.mxu0 %v10559_v10 }
 0x2d9   : > { %5439 = vmatmul.mubr.bf16.gmra.mxu1 %v11022_v46 }
 0x2da   : > { %5640 = vmatprep.mubr.bf16.mxu1 %v10495_v19  ;;  %v8380_v19 = vld [vmem:[%s11596_s5 + $0x38] sm:$0xff]  }
 0x2df   : > { %5802 = vmatmul.mubr.bf16.vlgmr.msra.gmra.mxu0 %v10388_v50  ;;  %v8381_v50 = vld [vmem:[%s11594_s3 + $0x238] sm:$0xff]  }
 0x2e0   : > { %5809 = vmatprep.mubr.bf16.mxu0 %v10640_v15  ;;  %8091 = vmatpush3.bf16.msra.mxu0 %v8380_v19 }
 0x2e1   : > { %8092 = vmatprep.subr.bf16.mxu0 %v8337_v29  ;;  %5641 = vmatmul.mubr.bf16.vlgmr.msra.gmra.mxu1 %v10477_v54  ;;  %v8340_v54 = vld [vmem:[%s11594_s3 + $0x220] sm:$0xff]  }
 0x2e2   : > { %5648 = vmatprep.mubr.bf16.mxu1 %v10564_v32  ;;  %8043 = vmatpush3.bf16.msra.mxu1 %v8381_v50  ;;  %v11780_v50 = vld [vmem:[#allocation11_spill] sm:$0xff] }
 0x2e3   : > { %8044 = vmatprep.subr.bf16.mxu1 %v8336_v13 }
 0x2e4   : > { %8093 = vmatpush3.bf16.msra.mxu0 %v8337_v29 }
 0x2e5   : > { %8094 = vmatprep.subr.bf16.mxu0 %v8339_v18 }
 0x2e6   : > { %8045 = vmatpush3.bf16.msra.mxu1 %v8336_v13 }
 0x2e7   : > { %5810 = vmatmul.mubr.bf16.gmra.mxu0 %v10500_v5  ;;  %8046 = vmatprep.subr.bf16.mxu1 %v8338_v39  ;;  %v8342_v5 = vld [vmem:[%s11594_s3 + $0x218] sm:$0xff]  }
 0x2e8   : > { %5817 = vmatprep.mubr.bf16.mxu0 %v10700_v8  ;;  %8095 = vmatpush3.bf16.msra.mxu0 %v8339_v18 }
 0x2e9   : > { %5649 = vmatmul.mubr.bf16.gmra.mxu1 %v10559_v10  ;;  %8096 = vmatprep.subr.bf16.mxu0 %v8341_v45  ;;  %v8344_v10 = vld [vmem:[%s11594_s3 + $0x210] sm:$0xff]  }
 0x2ea   : > { %5656 = vmatprep.mubr.bf16.mxu1 %v10653_v34  ;;  %8047 = vmatpush3.bf16.msra.mxu1 %v8338_v39 }
 0x2eb   : > { %8048 = vmatprep.subr.bf16.mxu1 %v8340_v54 }
 0x2ec   : > { %8097 = vmatpush3.bf16.msra.mxu0 %v8341_v45  ;;  %v11781_v45 = vld [vmem:[#allocation8_spill] sm:$0xff] }
 0x2ed   : > { %8098 = vmatprep.subr.bf16.mxu0 %v8343_v37 }
 0x2ee   : > { %8049 = vmatpush3.bf16.msra.mxu1 %v8340_v54 }
 0x2ef   : > { %5818 = vmatmul.mubr.bf16.gmra.mxu0 %v10584_v17  ;;  %8050 = vmatprep.subr.bf16.mxu1 %v8342_v5  ;;  %v8346_v17 = vld [vmem:[%s11594_s3 + $0x208] sm:$0xff]  }
 0x2f0   : > { %5825 = vmatprep.mubr.bf16.mxu0 %v10766_v59  ;;  %8099 = vmatpush3.bf16.msra.mxu0 %v8343_v37 }
 0x2f1   : > { %5657 = vmatmul.mubr.bf16.gmra.mxu1 %v10640_v15  ;;  %8100 = vmatprep.subr.bf16.mxu0 %v8345_v0  ;;  %v8349_v15 = vld [vmem:[%s11596_s5] sm:$0xff]  }
 0x2f2   : > { %5664 = vmatprep.mubr.bf16.mxu1 %v10711_v7  ;;  %8051 = vmatpush3.bf16.msra.mxu1 %v8342_v5  ;;  %v11190_v5 = vld [vmem:[#allocation3 + $0xcc] sm:$0xf] }
 0x2f3   : > { %8052 = vmatprep.subr.bf16.mxu1 %v8344_v10 }
 0x2f4   : > { %8101 = vmatpush3.bf16.msra.mxu0 %v8345_v0  ;;  %v11192_v0 = vld [vmem:[#allocation3 + $0xd0] sm:$0xf] }
 0x2f5   : > { %8102 = vmatprep.subr.bf16.mxu0 %v8347_v52 }
 0x2f6   : > { %8053 = vmatpush3.bf16.msra.mxu1 %v8344_v10  ;;  %v11194_v10 = vld [vmem:[#allocation3 + $0xd4] sm:$0x1] }
 0x2f7   : > { %5826 = vmatmul.mubr.bf16.gmra.mxu0 %v10661_v1  ;;  %8054 = vmatprep.subr.bf16.mxu1 %v8346_v17  ;;  %v5321_v1 = vadd.f32 %v11011_v20, %v11155_v21 }
 0x2f8   : > { %5833 = vmatprep.mubr.bf16.mxu0 %v10799_v24  ;;  %8103 = vmatpush3.bf16.msra.mxu0 %v8347_v52  ;;  %v11782_v52 = vld [vmem:[#allocation12_spill] sm:$0xff] }
 0x2f9   : > { %5665 = vmatmul.mubr.bf16.gmra.mxu1 %v10700_v8  ;;  %8104 = vmatprep.subr.bf16.mxu0 %v8349_v15 }
 0x2fa   : > { %v7626_v35 = vpop.f32.mrf.mxu0  ;;  %5672 = vmatprep.mubr.bf16.mxu1 %v10762_v22  ;;  %8055 = vmatpush3.bf16.msra.mxu1 %v8346_v17 }
 0x2fb   : > { %8056 = vmatprep.subr.bf16.mxu1 %v8348_v36 }
 0x2fc   : > { %v7627_v56 = vpop.f32.mrf.mxu0  ;;  %8105 = vmatpush3.bf16.msra.mxu0 %v8349_v15  ;;  %v4485_v15 = vrot.slane %v11194_v10, 5 }
 0x2fd   : > { %v7628_v27 = vadd.f32 %v7627_v56, %v7626_v35  ;;  %v4482_v35 = vrot.slane %v11192_v0, 5 }
 0x2fe   : > { %v7629_v40 = vpop.f32.mrf.mxu0  ;;  %8057 = vmatpush3.bf16.msra.mxu1 %v8348_v36  ;;  %v6837_v36 = vrot.slane %v11190_v5, 9 }
 0x2ff   : > { %5834 = vmatmul.mubr.bf16.gmra.mxu0 %v10721_v12  ;;  %v11165_v53 = vadd.f32 %v7628_v27, %v5321_v1  ;;  %v11776_v12 = vld [vmem:[#allocation9_spill] sm:$0xff]  ;;  %v4484_v27 = vrot.slane %v4482_v35, 4 }
 0x300   : > { %5841 = vmatprep.mubr.bf16.mxu0 %v10820_v55  ;;  %v7630_v8 = vpop.f32.mrf.mxu0  ;;  %v11202_v42 = vsel %vm8553_vm13, %v6837_v36, %v4482_v35 }
 0x301   : > { %v7631_v30 = vadd.f32 %v7630_v8, %v7629_v40  ;;  %5673 = vmatmul.mubr.bf16.gmra.mxu1 %v10766_v59  ;;  %v11783_v8 = vld [vmem:[#allocation19_spill] sm:$0xff] }
 0x302   : > { %5680 = vmatprep.mubr.bf16.mxu1 %v10787_v48 }
 0x303   : > { %v11171_v20 = vadd.f32 %v7631_v30, %v5324_v47 }
 0x307   : > { %5842 = vmatmul.mubr.bf16.gmra.mxu0 %v10758_v49 }
 0x308   : > { %5849 = vmatprep.mubr.bf16.mxu0 %v10847_v62 }
 0x309   : > { %5681 = vmatmul.mubr.bf16.gmra.mxu1 %v10799_v24 }
 0x30a   : > { %5688 = vmatprep.mubr.bf16.mxu1 %v11776_v12 }
 0x30e   : > { %v7632_v31 = vpop.f32.mrf.mxu0  ;;  %v7520_v33 = vpop.f32.mrf.mxu1 }
 0x30f   : > { %5850 = vmatmul.mubr.bf16.gmra.mxu0 %v11777_v60 }
 0x310   : > { %5857 = vmatprep.mubr.bf16.mxu0 %v11778_v58  ;;  %v7633_v51 = vpop.f32.mrf.mxu0  ;;  %v7521_v59 = vpop.f32.mrf.mxu1 }
 0x311   : > { %v7634_v2 = vadd.f32 %v7633_v51, %v7632_v31  ;;  %v7522_v14 = vadd.f32 %v7521_v59, %v7520_v33  ;;  %5689 = vmatmul.mubr.bf16.gmra.mxu1 %v10820_v55  ;;  %v11208_v31 = vsel %vm8553_vm13, %v4484_v27, %v4485_v15  ;;  %v11784_v33 = vld [vmem:[#allocation4_spill] sm:$0xff]  ;;  %v11790_v15 = vld [vmem:[#allocation18_spill] sm:$0xff] }
 0x312   : > { %v7635_v25 = vpop.f32.mrf.mxu0  ;;  %v7523_v49 = vpop.f32.mrf.mxu1  ;;  %5696 = vmatprep.mubr.bf16.mxu1 %v11779_v23  ;;  %v6891_v59 = vcombine.low %v11202_v42, %v11208_v31 }
 0x313   : > { %v5329_v24 = vadd.f32 %v7522_v14, %v11155_v21 }
 0x314   : > { %v7636_v9 = vpop.f32.mrf.mxu0  ;;  %v7524_v29 = vpop.f32.mrf.mxu1 }
 0x315   : > { %v7637_v19 = vadd.f32 %v7636_v9, %v7635_v25  ;;  %v7525_v13 = vadd.f32 %v7524_v29, %v7523_v49  ;;  %v11182_v18 = vadd.f32 %v7634_v2, %v5329_v24  ;;  %v11785_v25 = vld [vmem:[#allocation17_spill] sm:$0xff]  ;;  %v11787_v24 = vld [vmem:[#allocation10_spill] sm:$0xff] }
 0x317   : > { %5858 = vmatmul.mubr.bf16.gmra.mxu0 %v11780_v50  ;;  %v5332_v39 = vadd.f32 %v7525_v13, %v11155_v21 }
 0x318   : > { %5865 = vmatprep.mubr.bf16.mxu0 %v11781_v45  ;;  %v7638_v54 = vpop.f32.mrf.mxu0  ;;  %v7526_v55 = vpop.f32.mrf.mxu1 }
 0x319   : > { %v11187_v37 = vadd.f32 %v7637_v19, %v5332_v39  ;;  %5697 = vmatmul.mubr.bf16.gmra.mxu1 %v10847_v62  ;;  %v11788_v19 = vld [vmem:[#allocation5_spill] sm:$0xff] }
 0x31a   : > { %5704 = vmatprep.mubr.bf16.mxu1 %v11782_v52  ;;  %v7639_v17 = vpop.f32.mrf.mxu0  ;;  %v7527_v26 = vpop.f32.mrf.mxu1 }
 0x31b   : > { %v7640_v43 = vadd.f32 %v7639_v17, %v7638_v54  ;;  %v7528_v1 = vadd.f32 %v7527_v26, %v7526_v55  ;;  %v11789_v17 = vld [vmem:[#allocation15_spill] sm:$0xff] }
 0x31c   : > { %v7641_v56 = vpop.f32.mrf.mxu0  ;;  %v7529_v62 = vpop.f32.mrf.mxu1 }
 0x31d   : > { %v5337_v40 = vadd.f32 %v7528_v1, %v11155_v21 }
 0x31e   : > { %v7642_v47 = vpop.f32.mrf.mxu0  ;;  %v7530_v30 = vpop.f32.mrf.mxu1 }
 0x31f   : > { %5866 = vmatmul.mubr.bf16.gmra.mxu0 %v11783_v8  ;;  %v7643_v60 = vadd.f32 %v7642_v47, %v7641_v56  ;;  %v7531_v51 = vadd.f32 %v7530_v30, %v7529_v62  ;;  %v11213_v2 = vadd.f32 %v7640_v43, %v5337_v40  ;;  %v11791_v56 = vld [vmem:[#allocation22_spill] sm:$0xff] }
 0x320   : > { %5873 = vmatprep.mubr.bf16.mxu0 %v11784_v33 }
 0x321   : > { %5705 = vmatmul.mubr.bf16.gmra.mxu1 %v11778_v58  ;;  %v5340_v14 = vadd.f32 %v7531_v51, %v11155_v21  ;;  %v4457_v51 = vshll.u32 %v11190_v5, 16 }
 0x322   : > { %5712 = vmatprep.mubr.bf16.mxu1 %v11785_v25 }
 0x323   : > { %v11218_v49 = vadd.f32 %v7643_v60, %v5340_v14  ;;  %v4454_v60 = vshrl.u32 %v11190_v5, 16  ;;  %v4467_v14 = vshrl.u32 %v11192_v0, 16 }
 0x327   : > { %5874 = vmatmul.mubr.bf16.gmra.mxu0 %v11786_v38 }
 0x328   : > { %5881 = vmatprep.mubr.bf16.mxu0 %v11787_v24 }
 0x329   : > { %5713 = vmatmul.mubr.bf16.gmra.mxu1 %v11781_v45  ;;  %v7532_v29 = vpop.f32.mrf.mxu1 }
 0x32a   : > { %v7644_v9 = vpop.f32.mrf.mxu0  ;;  %5720 = vmatprep.mubr.bf16.mxu1 %v11788_v19 }
 0x32b   : > { %v7533_v50 = vpop.f32.mrf.mxu1 }
 0x32c   : > { %v7645_v13 = vpop.f32.mrf.mxu0  ;;  %v7534_v58 = vadd.f32 %v7533_v50, %v7532_v29 }
 0x32d   : > { %v7646_v39 = vadd.f32 %v7645_v13, %v7644_v9  ;;  %v7535_v55 = vpop.f32.mrf.mxu1 }
 0x32e   : > { %v7647_v54 = vpop.f32.mrf.mxu0  ;;  %v5345_v26 = vadd.f32 %v7534_v58, %v11155_v21  ;;  %v4456_v58 = vrot.slane %v4454_v60, 4 }
 0x32f   : > { %5882 = vmatmul.mubr.bf16.gmra.mxu0 %v11789_v17  ;;  %v7536_v35 = vpop.f32.mrf.mxu1  ;;  %v4469_v17 = vrot.slane %v4467_v14, 4 }
 0x330   : > { %5889 = vmatprep.mubr.bf16.mxu0 %v11790_v15  ;;  %v7648_v36 = vpop.f32.mrf.mxu0  ;;  %v7537_v45 = vadd.f32 %v7536_v35, %v7535_v55  ;;  %v11227_v1 = vadd.f32 %v7646_v39, %v5345_v26 }
 0x331   : > { %v7649_v43 = vadd.f32 %v7648_v36, %v7647_v54  ;;  %5721 = vmatmul.mubr.bf16.gmra.mxu1 %v11784_v33  ;;  %v4463_v33 = vshll.u32 %v11192_v0, 16  ;;  %v4459_v54 = vrot.slane %v4457_v51, 5 }
 0x332   : > { %5728 = vmatprep.mubr.bf16.mxu1 %v11791_v56  ;;  %v5348_v62 = vadd.f32 %v7537_v45, %v11155_v21 }
 0x333   : > { %v4465_v55 = vrot.slane %v4463_v33, 5 }
 0x334   : > { %v11232_v27 = vadd.f32 %v7649_v43, %v5348_v62  ;;  %v4460_v43 = vor.u32 %v4459_v54, %v4456_v58  ;;  %v4473_v62 = vshll.u32 %v11194_v10, 16 }
 0x335   : > { %v4470_v45 = vor.u32 %v4469_v17, %v4465_v55 }
 0x337   : > { %5890 = vmatmul.mubr.bf16.gmra.mxu0 %v10955_v16  ;;  %v7650_v40 = vpop.f32.mrf.mxu0  ;;  %v7538_v8 = vpop.f32.mrf.mxu1 }
 0x338   : > { %5897 = vmatprep.mubr.bf16.mxu0 %v11044_v11 }
 0x339   : > { %v7651_v47 = vpop.f32.mrf.mxu0  ;;  %v7539_v30 = vpop.f32.mrf.mxu1  ;;  %5729 = vmatmul.mubr.bf16.gmra.mxu1 %v11787_v24 }
 0x33a   : > { %v7652_v38 = vadd.f32 %v7651_v47, %v7650_v40  ;;  %v7540_v9 = vadd.f32 %v7539_v30, %v7538_v8  ;;  %5736 = vmatprep.mubr.bf16.mxu1 %v11016_v28  ;;  %v4461_v8 = vrot.slane %v4460_v43, 4  ;;  %v4471_v47 = vrot.slane %v4470_v45, 4  ;;  %v8351_v45 = vld [vmem:[%s8490_s30] sm:$0xff]  }
 0x33b   : > { %v7653_v16 = vpop.f32.mrf.mxu0  ;;  %v7541_v29 = vpop.f32.mrf.mxu1  ;;  %v4475_v30 = vrot.slane %v4473_v62, 5 }
 0x33c   : > { %v5353_v13 = vadd.f32 %v7540_v9, %v11155_v21  ;;  %v4466_v33 = vsel %vm8562_vm14, %v4461_v8, %v4465_v55 }
 0x33d   : > { %v7654_v50 = vpop.f32.mrf.mxu0  ;;  %v7542_v39 = vpop.f32.mrf.mxu1  ;;  %v4476_v10 = vsel %vm8562_vm14, %v4471_v47, %v4475_v30 }
 0x33e   : > { %v7655_v26 = vadd.f32 %v7654_v50, %v7653_v16  ;;  %v7543_v36 = vadd.f32 %v7542_v39, %v7541_v29  ;;  %v11243_v35 = vadd.f32 %v7652_v38, %v5353_v13  ;;  %v6890_v16 = vcombine.low %v4466_v33, %v4476_v10 }
 0x33f   : > { %5898 = vmatmul.mubr.bf16.gmra.mxu0 %v10990_v63 }
 0x340   : > { %5905 = vmatprep.mubr.bf16.mxu0 %v11074_v3  ;;  %v5356_v24 = vadd.f32 %v7543_v36, %v11155_v21 }
 0x341   : > { %5737 = vmatmul.mubr.bf16.gmra.mxu1 %v11790_v15 }
 0x342   : > { %v11250_v40 = vadd.f32 %v7655_v26, %v5356_v24  ;;  %5744 = vmatprep.mubr.bf16.mxu1 %v11062_v4  ;;  %v6889_v24 = vcombine.low %v11190_v5, %v11192_v0 }
 0x347   : > { %v7656_v60 = vpop.f32.mrf.mxu0  ;;  %5906 = vmatmul.mubr.bf16.gmra.mxu0 %v11022_v46 }
 0x348   : > { %5913 = vmatprep.mubr.bf16.mxu0 %v11060_v44 }
 0x349   : > { %v7544_v63 = vpop.f32.mrf.mxu1  ;;  %v7657_v51 = vpop.f32.mrf.mxu0  ;;  %5745 = vmatmul.mubr.bf16.gmra.mxu1 %v11044_v11 }
 0x34a   : > { %v7658_v15 = vadd.f32 %v7657_v51, %v7656_v60  ;;  %5752 = vmatprep.mubr.bf16.mxu1 %v11083_v57 }
 0x34b   : > { %v7545_v14 = vpop.f32.mrf.mxu1  ;;  %v7659_v38 = vpop.f32.mrf.mxu0 }
 0x34c   : > { %v7546_v9 = vadd.f32 %v7545_v14, %v7544_v63 }
 0x34d   : > { %v7547_v46 = vpop.f32.mrf.mxu1  ;;  %v7660_v29 = vpop.f32.mrf.mxu0 }
 0x34e   : > { %v5361_v13 = vadd.f32 %v7546_v9, %v11155_v21  ;;  %v7661_v50 = vadd.f32 %v7660_v29, %v7659_v38  ;;  %v8352_v38 = vld [vmem:[%s8490_s30 + $0x8] sm:$0xff]  }
 0x34f   : > { %v7548_v39 = vpop.f32.mrf.mxu1  ;;  %v7662_v58 = vpop.f32.mrf.mxu0  ;;  %5914 = vmatmul.mubr.bf16.gmra.mxu0 %v11066_v6 }
 0x350   : > { %v7549_v41 = vadd.f32 %v7548_v39, %v7547_v46  ;;  %5921 = vmatprep.mubr.bf16.mxu0 %v6890_v16  ;;  %v11263_v11 = vadd.f32 %v7658_v15, %v5361_v13  ;;  %v8353_v16 = vld [vmem:[%s8490_s30 + $0x10] sm:$0xff]  }
 0x351   : > { %v7663_v54 = vpop.f32.mrf.mxu0  ;;  %v7550_v17 = vpop.f32.mrf.mxu1  ;;  %5753 = vmatmul.mubr.bf16.gmra.mxu1 %v11074_v3 }
 0x352   : > { %v5364_v55 = vadd.f32 %v7549_v41, %v11155_v21  ;;  %v7664_v26 = vadd.f32 %v7663_v54, %v7662_v58  ;;  %5760 = vmatprep.mubr.bf16.mxu1 %v11046_v61 }
 0x353   : > { %v7665_v36 = vpop.f32.mrf.mxu0  ;;  %v7551_v43 = vpop.f32.mrf.mxu1 }
 0x354   : > { %v11271_v6 = vadd.f32 %v7661_v50, %v5364_v55  ;;  %v7552_v62 = vadd.f32 %v7551_v43, %v7550_v17  ;;  %v8354_v43 = vld [vmem:[%s8490_s30 + $0x18] sm:$0xff]  }
 0x355   : > { %v7666_v8 = vpop.f32.mrf.mxu0  ;;  %v7553_v47 = vpop.f32.mrf.mxu1 }
 0x356   : > { %v7667_v30 = vadd.f32 %v7666_v8, %v7665_v36  ;;  %v5369_v60 = vadd.f32 %v7552_v62, %v11155_v21  ;;  %v8355_v62 = vld [vmem:[%s8490_s30 + $0x20] sm:$0xff]  }
 0x357   : > { %v7668_v3 = vpop.f32.mrf.mxu0  ;;  %5922 = vmatmul.mubr.bf16.gmra.mxu0 %v6889_v24  ;;  %v7554_v63 = vpop.f32.mrf.mxu1 }
 0x358   : > { %8106 = vmatprep.mubr.bf16.mxu0 %v8351_v45  ;;  %v7555_v51 = vadd.f32 %v7554_v63, %v7553_v47  ;;  %v11274_v10 = vadd.f32 %v7664_v26, %v5369_v60 }
 0x359   : > { %v7669_v33 = vpop.f32.mrf.mxu0  ;;  %v7556_v5 = vpop.f32.mrf.mxu1  ;;  %5761 = vmatmul.mubr.bf16.gmra.mxu1 %v11060_v44 }
 0x35a   : > { %v7670_v0 = vadd.f32 %v7669_v33, %v7668_v3  ;;  %v5372_v15 = vadd.f32 %v7555_v51, %v11155_v21  ;;  %8058 = vmatprep.mubr.bf16.mxu1 %v10564_v32 }
 0x35b   : > { %v7671_v14 = vpop.f32.mrf.mxu0  ;;  %v7557_v9 = vpop.f32.mrf.mxu1 }
 0x35c   : > { %v7558_v46 = vadd.f32 %v7557_v9, %v7556_v5  ;;  %v11281_v13 = vadd.f32 %v7667_v30, %v5372_v15  ;;  %v8356_v9 = vld [vmem:[%s8490_s30 + $0x28] sm:$0xff]  }
 0x35d   : > { %v7672_v29 = vpop.f32.mrf.mxu0  ;;  %v7559_v50 = vpop.f32.mrf.mxu1 }
 0x35e   : > { %v7673_v39 = vadd.f32 %v7672_v29, %v7671_v14  ;;  %v5377_v58 = vadd.f32 %v7558_v46, %v11155_v21  ;;  %v8357_v46 = vld [vmem:[%s8490_s30 + $0x30] sm:$0xff]  }
 0x35f   : > { %v7674_v44 = vpop.f32.mrf.mxu0  ;;  %8107 = vmatmul.mubr.bf16.vlgmr.msra.gmra.mxu0 %v8352_v38  ;;  %v7560_v41 = vpop.f32.mrf.mxu1 }
 0x360   : > { %8110 = vmatprep.mubr.bf16.mxu0 %v8353_v16  ;;  %v7561_v54 = vadd.f32 %v7560_v41, %v7559_v50  ;;  %v11284_v55 = vadd.f32 %v7670_v0, %v5377_v58 }
 0x361   : > { %v7675_v32 = vpop.f32.mrf.mxu0  ;;  %v7562_v17 = vpop.f32.mrf.mxu1  ;;  %8059 = vmatmul.mubr.bf16.vlgmr.msra.gmra.mxu1 %v10653_v34 }
 0x362   : > { %v7676_v26 = vadd.f32 %v7675_v32, %v7674_v44  ;;  %v5380_v36 = vadd.f32 %v7561_v54, %v11155_v21  ;;  %8062 = vmatprep.mubr.bf16.mxu1 %v10711_v7 }
 0x363   : > { %v7677_v24 = vpop.f32.mrf.mxu0  ;;  %v7563_v45 = vpop.f32.mrf.mxu1 }
 0x364   : > { %v7564_v8 = vadd.f32 %v7563_v45, %v7562_v17  ;;  %v11291_v30 = vadd.f32 %v7673_v39, %v5380_v36  ;;  %v8358_v45 = vld [vmem:[%s8490_s30 + $0x38] sm:$0xff]  }
 0x365   : > { %v7678_v47 = vpop.f32.mrf.mxu0  ;;  %v7565_v60 = vpop.f32.mrf.mxu1 }
 0x366   : > { %v7679_v3 = vadd.f32 %v7678_v47, %v7677_v24  ;;  %v5385_v63 = vadd.f32 %v7564_v8, %v11155_v21  ;;  %v8359_v8 = vld [vmem:[%s8490_s30 + $0x40] sm:$0xff]  }
 0x367   : > { %v7680_v34 = vpop.f32.mrf.mxu0  ;;  %8111 = vmatmul.mubr.bf16.gmra.mxu0 %v8354_v43  ;;  %v7566_v51 = vpop.f32.mrf.mxu1 }
 0x368   : > { %8114 = vmatprep.mubr.bf16.mxu0 %v8355_v62  ;;  %v7567_v33 = vadd.f32 %v7566_v51, %v7565_v60  ;;  %v11294_v5 = vadd.f32 %v7676_v26, %v5385_v63 }
 0x369   : > { %v7681_v7 = vpop.f32.mrf.mxu0  ;;  %v7568_v0 = vpop.f32.mrf.mxu1  ;;  %8063 = vmatmul.mubr.bf16.gmra.mxu1 %v10762_v22 }
 0x36a   : > { %v7682_v15 = vadd.f32 %v7681_v7, %v7680_v34  ;;  %v5388_v14 = vadd.f32 %v7567_v33, %v11155_v21  ;;  %8066 = vmatprep.mubr.bf16.mxu1 %v10787_v48 }
 0x36b   : > { %v7683_v38 = vpop.f32.mrf.mxu0  ;;  %v7569_v16 = vpop.f32.mrf.mxu1 }
 0x36c   : > { %v7570_v29 = vadd.f32 %v7569_v16, %v7568_v0  ;;  %v11301_v39 = vadd.f32 %v7679_v3, %v5388_v14  ;;  %v8360_v16 = vld [vmem:[%s8490_s30 + $0x48] sm:$0xff]  }
 0x36d   : > { %v7684_v50 = vpop.f32.mrf.mxu0  ;;  %v7571_v58 = vpop.f32.mrf.mxu1 }
 0x36e   : > { %v7685_v44 = vadd.f32 %v7684_v50, %v7683_v38  ;;  %v5393_v41 = vadd.f32 %v7570_v29, %v11155_v21  ;;  %v8361_v29 = vld [vmem:[%s8490_s30 + $0x50] sm:$0xff]  }
 0x36f   : > { %v7686_v22 = vpop.f32.mrf.mxu0  ;;  %8115 = vmatmul.mubr.bf16.gmra.mxu0 %v8356_v9  ;;  %v7572_v54 = vpop.f32.mrf.mxu1 }
 0x370   : > { %8118 = vmatprep.mubr.bf16.mxu0 %v8357_v46  ;;  %v7573_v32 = vadd.f32 %v7572_v54, %v7571_v58  ;;  %v11304_v17 = vadd.f32 %v7682_v15, %v5393_v41 }
 0x371   : > { %v7687_v48 = vpop.f32.mrf.mxu0  ;;  %v7574_v26 = vpop.f32.mrf.mxu1  ;;  %8067 = vmatmul.mubr.bf16.gmra.mxu1 %v11776_v12 }
 0x372   : > { %v7688_v36 = vadd.f32 %v7687_v48, %v7686_v22  ;;  %v5396_v24 = vadd.f32 %v7573_v32, %v11155_v21  ;;  %8070 = vmatprep.mubr.bf16.mxu1 %v11779_v23 }
 0x373   : > { %v7689_v43 = vpop.f32.mrf.mxu0  ;;  %v7575_v62 = vpop.f32.mrf.mxu1 }
 0x374   : > { %v7576_v47 = vadd.f32 %v7575_v62, %v7574_v26  ;;  %v11311_v3 = vadd.f32 %v7685_v44, %v5396_v24  ;;  %v8362_v62 = vld [vmem:[%s8490_s30 + $0x58] sm:$0xff]  }
 0x375   : > { %v7690_v60 = vpop.f32.mrf.mxu0  ;;  %v7577_v63 = vpop.f32.mrf.mxu1 }
 0x376   : > { %v7691_v34 = vadd.f32 %v7690_v60, %v7689_v43  ;;  %v5401_v51 = vadd.f32 %v7576_v47, %v11155_v21  ;;  %v8363_v47 = vld [vmem:[%s8490_s30 + $0x60] sm:$0xff]  }
 0x377   : > { %v7692_v12 = vpop.f32.mrf.mxu0  ;;  %8119 = vmatmul.mubr.bf16.gmra.mxu0 %v8358_v45  ;;  %v7578_v33 = vpop.f32.mrf.mxu1 }
 0x378   : > { %8122 = vmatprep.mubr.bf16.mxu0 %v8359_v8  ;;  %v7579_v7 = vadd.f32 %v7578_v33, %v7577_v63  ;;  %v11314_v0 = vadd.f32 %v7688_v36, %v5401_v51 }
 0x379   : > { %v7693_v23 = vpop.f32.mrf.mxu0  ;;  %v7580_v15 = vpop.f32.mrf.mxu1  ;;  %8071 = vmatmul.mubr.bf16.gmra.mxu1 %v11782_v52 }
 0x37a   : > { %v7694_v14 = vadd.f32 %v7693_v23, %v7692_v12  ;;  %v5404_v38 = vadd.f32 %v7579_v7, %v11155_v21  ;;  %8074 = vmatprep.mubr.bf16.mxu1 %v11785_v25 }
 0x37b   : > { %v7695_v9 = vpop.f32.mrf.mxu0  ;;  %v7581_v46 = vpop.f32.mrf.mxu1 }
 0x37c   : > { %v7582_v50 = vadd.f32 %v7581_v46, %v7580_v15  ;;  %v11321_v44 = vadd.f32 %v7691_v34, %v5404_v38  ;;  %v8364_v46 = vld [vmem:[%s8490_s30 + $0x68] sm:$0xff]  }
 0x37d   : > { %v7696_v58 = vpop.f32.mrf.mxu0  ;;  %v7583_v41 = vpop.f32.mrf.mxu1 }
 0x37e   : > { %v7697_v22 = vadd.f32 %v7696_v58, %v7695_v9  ;;  %v5409_v54 = vadd.f32 %v7582_v50, %v11155_v21  ;;  %v8365_v50 = vld [vmem:[%s8490_s30 + $0x70] sm:$0xff]  }
 0x37f   : > { %v7698_v52 = vpop.f32.mrf.mxu0  ;;  %8123 = vmatmul.mubr.bf16.gmra.mxu0 %v8360_v16  ;;  %v7584_v32 = vpop.f32.mrf.mxu1 }
 0x380   : > { %8126 = vmatprep.mubr.bf16.mxu0 %v8361_v29  ;;  %v7585_v48 = vadd.f32 %v7584_v32, %v7583_v41  ;;  %v11324_v26 = vadd.f32 %v7694_v14, %v5409_v54 }
 0x381   : > { %v7699_v25 = vpop.f32.mrf.mxu0  ;;  %v7586_v36 = vpop.f32.mrf.mxu1  ;;  %8075 = vmatmul.mubr.bf16.gmra.mxu1 %v11788_v19 }
 0x382   : > { %v7700_v24 = vadd.f32 %v7699_v25, %v7698_v52  ;;  %v5412_v43 = vadd.f32 %v7585_v48, %v11155_v21  ;;  %8078 = vmatprep.mubr.bf16.mxu1 %v11791_v56 }
 0x383   : > { %v7701_v45 = vpop.f32.mrf.mxu0  ;;  %v7587_v8 = vpop.f32.mrf.mxu1 }
 0x384   : > { %v7588_v60 = vadd.f32 %v7587_v8, %v7586_v36  ;;  %v11331_v34 = vadd.f32 %v7697_v22, %v5412_v43  ;;  %v8366_v8 = vld [vmem:[%s8490_s30 + $0x78] sm:$0xff]  }
 0x385   : > { %v7702_v63 = vpop.f32.mrf.mxu0  ;;  %v7589_v51 = vpop.f32.mrf.mxu1 }
 0x386   : > { %v7703_v12 = vadd.f32 %v7702_v63, %v7701_v45  ;;  %v5417_v33 = vadd.f32 %v7588_v60, %v11155_v21 }
 0x387   : > { %v7704_v19 = vpop.f32.mrf.mxu0  ;;  %8127 = vmatmul.mubr.bf16.gmra.mxu0 %v8362_v62  ;;  %v7590_v7 = vpop.f32.mrf.mxu1 }
 0x388   : > { %8130 = vmatprep.mubr.bf16.mxu0 %v8363_v47  ;;  %v7591_v23 = vadd.f32 %v7590_v7, %v7589_v51  ;;  %v11334_v15 = vadd.f32 %v7700_v24, %v5417_v33 }
 0x389   : > { %v7705_v56 = vpop.f32.mrf.mxu0  ;;  %v7592_v14 = vpop.f32.mrf.mxu1  ;;  %8079 = vmatmul.mubr.bf16.gmra.mxu1 %v11016_v28 }
 0x38a   : > { %v7706_v38 = vadd.f32 %v7705_v56, %v7704_v19  ;;  %v5420_v9 = vadd.f32 %v7591_v23, %v11155_v21  ;;  %8082 = vmatprep.mubr.bf16.mxu1 %v11062_v4 }
 0x38b   : > { %v7707_v16 = vpop.f32.mrf.mxu0  ;;  %v7593_v29 = vpop.f32.mrf.mxu1 }
 0x38c   : > { %v7594_v58 = vadd.f32 %v7593_v29, %v7592_v14  ;;  %v11341_v22 = vadd.f32 %v7703_v12, %v5420_v9 }
 0x38d   : > { %v7708_v41 = vpop.f32.mrf.mxu0  ;;  %v7595_v54 = vpop.f32.mrf.mxu1 }
 0x38e   : > { %v7709_v52 = vadd.f32 %v7708_v41, %v7707_v16  ;;  %v5425_v32 = vadd.f32 %v7594_v58, %v11155_v21 }
 0x38f   : > { %v7710_v48 = vpop.f32.mrf.mxu0  ;;  %8131 = vmatmul.mubr.bf16.gmra.mxu0 %v8364_v46  ;;  %v7596_v28 = vpop.f32.mrf.mxu1 }
 0x390   : > { %8134 = vmatprep.mubr.bf16.mxu0 %v8365_v50  ;;  %v7597_v25 = vadd.f32 %v7596_v28, %v7595_v54  ;;  %v11344_v4 = vadd.f32 %v7706_v38, %v5425_v32 }
 0x391   : > { %v7711_v36 = vpop.f32.mrf.mxu0  ;;  %v7598_v24 = vpop.f32.mrf.mxu1  ;;  %8083 = vmatmul.mubr.bf16.gmra.mxu1 %v11083_v57 }
 0x392   : > { %v7712_v43 = vadd.f32 %v7711_v36, %v7710_v48  ;;  %v5428_v45 = vadd.f32 %v7597_v25, %v11155_v21  ;;  %8086 = vmatprep.mubr.bf16.mxu1 %v11046_v61 }
 0x393   : > { %v7713_v62 = vpop.f32.mrf.mxu0  ;;  %v7599_v47 = vpop.f32.mrf.mxu1 }
 0x394   : > { %v7600_v60 = vadd.f32 %v7599_v47, %v7598_v24  ;;  %v11350_v51 = vadd.f32 %v7709_v52, %v5428_v45 }
 0x395   : > { %v7714_v63 = vpop.f32.mrf.mxu0  ;;  %v7601_v12 = vpop.f32.mrf.mxu1 }
 0x396   : > { %v7715_v33 = vadd.f32 %v7714_v63, %v7713_v62  ;;  %v5433_v19 = vadd.f32 %v7600_v60, %v11155_v21 }
 0x397   : > { %v7716_v7 = vpop.f32.mrf.mxu0  ;;  %8135 = vmatmul.mubr.bf16.gmra.mxu0 %v8366_v8  ;;  %v7602_v23 = vpop.f32.mrf.mxu1 }
 0x398   : > { %v7603_v57 = vadd.f32 %v7602_v23, %v7601_v12  ;;  %v11353_v14 = vadd.f32 %v7712_v43, %v5433_v19 }
 0x399   : > { %v7717_v56 = vpop.f32.mrf.mxu0  ;;  %v7604_v38 = vpop.f32.mrf.mxu1  ;;  %8087 = vmatmul.mubr.bf16.gmra.mxu1 %v6891_v59 }
 0x39a   : > { %v7718_v61 = vadd.f32 %v7717_v56, %v7716_v7  ;;  %v5436_v9 = vadd.f32 %v7603_v57, %v11155_v21 }
 0x39b   : > { %v7719_v16 = vpop.f32.mrf.mxu0  ;;  %v7605_v46 = vpop.f32.mrf.mxu1 }
 0x39c   : > { %v7606_v29 = vadd.f32 %v7605_v46, %v7604_v38  ;;  %v11359_v58 = vadd.f32 %v7715_v33, %v5436_v9 }
 0x39d   : > { %v7720_v50 = vpop.f32.mrf.mxu0  ;;  %v7607_v41 = vpop.f32.mrf.mxu1 }
 0x39e   : > { %v7721_v54 = vadd.f32 %v7720_v50, %v7719_v16  ;;  %v5441_v52 = vadd.f32 %v7606_v29, %v11155_v21 }
 0x39f   : > { %v7850_v32 = vpop.f32.mrf.mxu0  ;;  %v7608_v48 = vpop.f32.mrf.mxu1 }
 0x3a0   : > { %v7609_v28 = vadd.f32 %v7608_v48, %v7607_v41  ;;  %v11362_v36 = vadd.f32 %v7718_v61, %v5441_v52 }
 0x3a1   : > { %v7851_v25 = vpop.f32.mrf.mxu0  ;;  %v7738_v42 = vpop.f32.mrf.mxu1 }
 0x3a2   : > { %v7852_v31 = vadd.f32 %v7851_v25, %v7850_v32  ;;  %v5444_v59 = vadd.f32 %v7609_v28, %v11155_v21 }
 0x3a3   : > { %v7853_v24 = vpop.f32.mrf.mxu0  ;;  %v7739_v43 = vpop.f32.mrf.mxu1 }
 0x3a4   : > { %v7740_v45 = vadd.f32 %v7739_v43, %v7738_v42  ;;  %v11365_v8 = vadd.f32 %v7721_v54, %v5444_v59 }
 0x3a5   : > { %v7854_v62 = vpop.f32.mrf.mxu0  ;;  %v7741_v47 = vpop.f32.mrf.mxu1 }
 0x3a6   : > { %v7855_v60 = vadd.f32 %v7854_v62, %v7853_v24  ;;  %v5643_v63 = vadd.f32 %v7740_v45, %v11165_v53 }
 0x3a7   : > { %v7856_v12 = vpop.f32.mrf.mxu0  ;;  %v7742_v33 = vpop.f32.mrf.mxu1 }
 0x3a8   : > { %v7743_v19 = vadd.f32 %v7742_v33, %v7741_v47  ;;  %v11368_v23 = vadd.f32 %v7852_v31, %v5643_v63 }
 0x3a9   : > { %v7857_v7 = vpop.f32.mrf.mxu0  ;;  %v7744_v57 = vpop.f32.mrf.mxu1 }
 0x3aa   : > { %v7858_v56 = vadd.f32 %v7857_v7, %v7856_v12  ;;  %v5646_v21 = vadd.f32 %v7743_v19, %v11171_v20 }
 0x3ab   : > { %v7859_v38 = vpop.f32.mrf.mxu0  ;;  %v7745_v61 = vpop.f32.mrf.mxu1 }
 0x3ac   : > { %v7746_v9 = vadd.f32 %v7745_v61, %v7744_v57  ;;  %v11371_v46 = vadd.f32 %v7855_v60, %v5646_v21 }
 0x3ad   : > { %v7860_v16 = vpop.f32.mrf.mxu0  ;;  %v7747_v29 = vpop.f32.mrf.mxu1 }
 0x3ae   : > { %v7861_v50 = vadd.f32 %v7860_v16, %v7859_v38  ;;  %v5651_v53 = vadd.f32 %v7746_v9, %v11182_v18 }
 0x3af   : > { %v7862_v41 = vpop.f32.mrf.mxu0  ;;  %v7748_v54 = vpop.f32.mrf.mxu1 }
 0x3b0   : > { %v7749_v52 = vadd.f32 %v7748_v54, %v7747_v29  ;;  %v11374_v48 = vadd.f32 %v7858_v56, %v5651_v53 }
 0x3b1   : > { %v7863_v32 = vpop.f32.mrf.mxu0  ;;  %v7750_v28 = vpop.f32.mrf.mxu1 }
 0x3b2   : > { %v7864_v25 = vadd.f32 %v7863_v32, %v7862_v41  ;;  %v5654_v20 = vadd.f32 %v7749_v52, %v11187_v37 }
 0x3b3   : > { %v7865_v42 = vpop.f32.mrf.mxu0  ;;  %v7751_v31 = vpop.f32.mrf.mxu1 }
 0x3b4   : > { %v7752_v59 = vadd.f32 %v7751_v31, %v7750_v28  ;;  %v11377_v43 = vadd.f32 %v7861_v50, %v5654_v20 }
 0x3b5   : > { %v7866_v24 = vpop.f32.mrf.mxu0  ;;  %v7753_v45 = vpop.f32.mrf.mxu1 }
 0x3b6   : > { %v7867_v62 = vadd.f32 %v7866_v24, %v7865_v42  ;;  %v5659_v18 = vadd.f32 %v7752_v59, %v11213_v2 }
 0x3b7   : > { %v7868_v47 = vpop.f32.mrf.mxu0  ;;  %v7754_v60 = vpop.f32.mrf.mxu1 }
 0x3b8   : > { %v7755_v63 = vadd.f32 %v7754_v60, %v7753_v45  ;;  %v11380_v33 = vadd.f32 %v7864_v25, %v5659_v18 }
 0x3b9   : > { %v7869_v12 = vpop.f32.mrf.mxu0  ;;  %v7756_v19 = vpop.f32.mrf.mxu1 }
 0x3ba   : > { %v7870_v7 = vadd.f32 %v7869_v12, %v7868_v47  ;;  %v5662_v37 = vadd.f32 %v7755_v63, %v11218_v49 }
 0x3bb   : > { %v7871_v57 = vpop.f32.mrf.mxu0  ;;  %v7757_v56 = vpop.f32.mrf.mxu1 }
 0x3bc   : > { %v7758_v21 = vadd.f32 %v7757_v56, %v7756_v19  ;;  %v11383_v61 = vadd.f32 %v7867_v62, %v5662_v37 }
 0x3bd   : > { %v7872_v38 = vpop.f32.mrf.mxu0  ;;  %v7759_v9 = vpop.f32.mrf.mxu1 }
 0x3be   : > { %v7873_v16 = vadd.f32 %v7872_v38, %v7871_v57  ;;  %v5667_v2 = vadd.f32 %v7758_v21, %v11227_v1 }
 0x3bf   : > { %v7874_v29 = vpop.f32.mrf.mxu0  ;;  %v7760_v50 = vpop.f32.mrf.mxu1 }
 0x3c0   : > { %v7761_v53 = vadd.f32 %v7760_v50, %v7759_v9  ;;  %v11386_v54 = vadd.f32 %v7870_v7, %v5667_v2 }
 0x3c1   : > { %v7875_v41 = vpop.f32.mrf.mxu0  ;;  %v7762_v52 = vpop.f32.mrf.mxu1 }
 0x3c2   : > { %v7876_v32 = vadd.f32 %v7875_v41, %v7874_v29  ;;  %v5670_v49 = vadd.f32 %v7761_v53, %v11232_v27 }
 0x3c3   : > { %v7877_v28 = vpop.f32.mrf.mxu0  ;;  %v7763_v25 = vpop.f32.mrf.mxu1 }
 0x3c4   : > { %v7764_v20 = vadd.f32 %v7763_v25, %v7762_v52  ;;  %v11389_v31 = vadd.f32 %v7873_v16, %v5670_v49 }
 0x3c5   : > { %v7878_v42 = vpop.f32.mrf.mxu0  ;;  %v7765_v59 = vpop.f32.mrf.mxu1 }
 0x3c6   : > { %v7879_v24 = vadd.f32 %v7878_v42, %v7877_v28  ;;  %v5675_v1 = vadd.f32 %v7764_v20, %v11243_v35 }
 0x3c7   : > { %v7880_v45 = vpop.f32.mrf.mxu0  ;;  %v7766_v62 = vpop.f32.mrf.mxu1 }
 0x3c8   : > { %v7767_v18 = vadd.f32 %v7766_v62, %v7765_v59  ;;  %v11392_v60 = vadd.f32 %v7876_v32, %v5675_v1 }
 0x3c9   : > { %v7881_v47 = vpop.f32.mrf.mxu0  ;;  %v7768_v63 = vpop.f32.mrf.mxu1 }
 0x3ca   : > { %v7882_v12 = vadd.f32 %v7881_v47, %v7880_v45  ;;  %v5678_v27 = vadd.f32 %v7767_v18, %v11250_v40 }
 0x3cb   : > { %v7883_v19 = vpop.f32.mrf.mxu0  ;;  %v7769_v7 = vpop.f32.mrf.mxu1 }
 0x3cc   : > { %v7770_v37 = vadd.f32 %v7769_v7, %v7768_v63  ;;  %v11395_v56 = vadd.f32 %v7879_v24, %v5678_v27 }
 0x3cd   : > { %v7884_v57 = vpop.f32.mrf.mxu0  ;;  %v7771_v21 = vpop.f32.mrf.mxu1 }
 0x3ce   : > { %v7885_v38 = vadd.f32 %v7884_v57, %v7883_v19  ;;  %v5683_v35 = vadd.f32 %v7770_v37, %v11263_v11 }
 0x3cf   : > { %v7886_v9 = vpop.f32.mrf.mxu0  ;;  %v7772_v16 = vpop.f32.mrf.mxu1 }
 0x3d0   : > { %v7773_v2 = vadd.f32 %v7772_v16, %v7771_v21  ;;  %v11398_v50 = vadd.f32 %v7882_v12, %v5683_v35 }
 0x3d1   : > { %v7887_v29 = vpop.f32.mrf.mxu0  ;;  %v7774_v53 = vpop.f32.mrf.mxu1 }
 0x3d2   : > { %v7888_v41 = vadd.f32 %v7887_v29, %v7886_v9  ;;  %v5686_v40 = vadd.f32 %v7773_v2, %v11271_v6 }
 0x3d3   : > { %v7889_v52 = vpop.f32.mrf.mxu0  ;;  %v7775_v32 = vpop.f32.mrf.mxu1 }
 0x3d4   : > { %v7776_v49 = vadd.f32 %v7775_v32, %v7774_v53  ;;  %v11401_v25 = vadd.f32 %v7885_v38, %v5686_v40 }
 0x3d5   : > { %v7890_v28 = vpop.f32.mrf.mxu0  ;;  %v7777_v20 = vpop.f32.mrf.mxu1 }
 0x3d6   : > { %v7891_v42 = vadd.f32 %v7890_v28, %v7889_v52  ;;  %v5691_v11 = vadd.f32 %v7776_v49, %v11274_v10 }
 0x3d7   : > { %v7892_v59 = vpop.f32.mrf.mxu0  ;;  %v7778_v24 = vpop.f32.mrf.mxu1 }
 0x3d8   : > { %v7779_v1 = vadd.f32 %v7778_v24, %v7777_v20  ;;  %v11404_v62 = vadd.f32 %v7888_v41, %v5691_v11 }
 0x3d9   : > { %v7893_v45 = vpop.f32.mrf.mxu0  ;;  %v7780_v18 = vpop.f32.mrf.mxu1 }
 0x3da   : > { %v7894_v47 = vadd.f32 %v7893_v45, %v7892_v59  ;;  %v5694_v6 = vadd.f32 %v7779_v1, %v11281_v13 }
 0x3db   : > { %v7895_v63 = vpop.f32.mrf.mxu0  ;;  %v7781_v12 = vpop.f32.mrf.mxu1 }
 0x3dc   : > { %v7782_v27 = vadd.f32 %v7781_v12, %v7780_v18  ;;  %v11407_v7 = vadd.f32 %v7891_v42, %v5694_v6 }
 0x3dd   : > { %v7896_v19 = vpop.f32.mrf.mxu0  ;;  %v7783_v37 = vpop.f32.mrf.mxu1 }
 0x3de   : > { %v7897_v57 = vadd.f32 %v7896_v19, %v7895_v63  ;;  %v5699_v10 = vadd.f32 %v7782_v27, %v11284_v55 }
 0x3df   : > { %v7898_v21 = vpop.f32.mrf.mxu0  ;;  %v7784_v38 = vpop.f32.mrf.mxu1 }
 0x3e0   : > { %v7785_v35 = vadd.f32 %v7784_v38, %v7783_v37  ;;  %v11410_v16 = vadd.f32 %v7894_v47, %v5699_v10 }
 0x3e1   : > { %v7899_v9 = vpop.f32.mrf.mxu0  ;;  %v7786_v2 = vpop.f32.mrf.mxu1 }
 0x3e2   : > { %v7900_v29 = vadd.f32 %v7899_v9, %v7898_v21  ;;  %v5702_v13 = vadd.f32 %v7785_v35, %v11291_v30 }
 0x3e3   : > { %v7901_v53 = vpop.f32.mrf.mxu0  ;;  %v7787_v41 = vpop.f32.mrf.mxu1 }
 0x3e4   : > { %v7788_v40 = vadd.f32 %v7787_v41, %v7786_v2  ;;  %v11413_v32 = vadd.f32 %v7897_v57, %v5702_v13 }
 0x3e5   : > { %v7902_v52 = vpop.f32.mrf.mxu0  ;;  %v7789_v49 = vpop.f32.mrf.mxu1 }
 0x3e6   : > { %v7903_v28 = vadd.f32 %v7902_v52, %v7901_v53  ;;  %v5707_v55 = vadd.f32 %v7788_v40, %v11294_v5 }
 0x3e7   : > { %v7904_v20 = vpop.f32.mrf.mxu0  ;;  %v7790_v42 = vpop.f32.mrf.mxu1 }
 0x3e8   : > { %v7791_v11 = vadd.f32 %v7790_v42, %v7789_v49  ;;  %v11416_v24 = vadd.f32 %v7900_v29, %v5707_v55 }
 0x3e9   : > { %v7905_v59 = vpop.f32.mrf.mxu0  ;;  %v7792_v1 = vpop.f32.mrf.mxu1 }
 0x3ea   : > { %v7906_v45 = vadd.f32 %v7905_v59, %v7904_v20  ;;  %v5710_v30 = vadd.f32 %v7791_v11, %v11301_v39 }
 0x3eb   : > { %v7907_v18 = vpop.f32.mrf.mxu0  ;;  %v7793_v47 = vpop.f32.mrf.mxu1 }
 0x3ec   : > { %v7794_v6 = vadd.f32 %v7793_v47, %v7792_v1  ;;  %v11419_v12 = vadd.f32 %v7903_v28, %v5710_v30 }
 0x3ed   : > { %v7908_v63 = vpop.f32.mrf.mxu0  ;;  %v7795_v27 = vpop.f32.mrf.mxu1 }
 0x3ee   : > { %v7909_v19 = vadd.f32 %v7908_v63, %v7907_v18  ;;  %v5715_v5 = vadd.f32 %v7794_v6, %v11304_v17 }
 0x3ef   : > { %v7910_v37 = vpop.f32.mrf.mxu0  ;;  %v7796_v57 = vpop.f32.mrf.mxu1 }
 0x3f0   : > { %v7797_v10 = vadd.f32 %v7796_v57, %v7795_v27  ;;  %v11422_v38 = vadd.f32 %v7906_v45, %v5715_v5 }
 0x3f1   : > { %v7911_v21 = vpop.f32.mrf.mxu0  ;;  %v7798_v35 = vpop.f32.mrf.mxu1 }
 0x3f2   : > { %v7912_v9 = vadd.f32 %v7911_v21, %v7910_v37  ;;  %v5718_v39 = vadd.f32 %v7797_v10, %v11311_v3 }
 0x3f3   : > { %v7913_v2 = vpop.f32.mrf.mxu0  ;;  %v7799_v29 = vpop.f32.mrf.mxu1 }
 0x3f4   : > { %v7800_v13 = vadd.f32 %v7799_v29, %v7798_v35  ;;  %v11425_v41 = vadd.f32 %v7909_v19, %v5718_v39 }
 0x3f5   : > { %v7914_v53 = vpop.f32.mrf.mxu0  ;;  %v7801_v40 = vpop.f32.mrf.mxu1 }
 0x3f6   : > { %v7915_v52 = vadd.f32 %v7914_v53, %v7913_v2  ;;  %v5723_v17 = vadd.f32 %v7800_v13, %v11314_v0 }
 0x3f7   : > { %v7916_v49 = vpop.f32.mrf.mxu0  ;;  %v7802_v28 = vpop.f32.mrf.mxu1 }
 0x3f8   : > { %v7803_v55 = vadd.f32 %v7802_v28, %v7801_v40  ;;  %v11428_v42 = vadd.f32 %v7912_v9, %v5723_v17 }
 0x3f9   : > { %v7917_v20 = vpop.f32.mrf.mxu0  ;;  %v7804_v11 = vpop.f32.mrf.mxu1 }
 0x3fa   : > { %v7918_v59 = vadd.f32 %v7917_v20, %v7916_v49  ;;  %v5726_v3 = vadd.f32 %v7803_v55, %v11321_v44 }
 0x3fb   : > { %v7919_v1 = vpop.f32.mrf.mxu0  ;;  %v7805_v45 = vpop.f32.mrf.mxu1 }
 0x3fc   : > { %v7806_v30 = vadd.f32 %v7805_v45, %v7804_v11  ;;  %v11431_v47 = vadd.f32 %v7915_v52, %v5726_v3 }
 0x3fd   : > { %v7920_v18 = vpop.f32.mrf.mxu0  ;;  %v7807_v6 = vpop.f32.mrf.mxu1 }
 0x3fe   : > { %v7921_v63 = vadd.f32 %v7920_v18, %v7919_v1  ;;  %v5731_v0 = vadd.f32 %v7806_v30, %v11324_v26 }
 0x3ff   : > { %v7922_v27 = vpop.f32.mrf.mxu0  ;;  %v7808_v19 = vpop.f32.mrf.mxu1 }
 0x400   : > { %v7809_v5 = vadd.f32 %v7808_v19, %v7807_v6  ;;  %v11434_v57 = vadd.f32 %v7918_v59, %v5731_v0 }
 0x401   : > { %v7923_v37 = vpop.f32.mrf.mxu0  ;;  %v7810_v10 = vpop.f32.mrf.mxu1 }
 0x402   : > { %v7924_v21 = vadd.f32 %v7923_v37, %v7922_v27  ;;  %v5734_v44 = vadd.f32 %v7809_v5, %v11331_v34 }
 0x403   : > { %v7925_v35 = vpop.f32.mrf.mxu0  ;;  %v7811_v9 = vpop.f32.mrf.mxu1 }
 0x404   : > { %v7812_v39 = vadd.f32 %v7811_v9, %v7810_v10  ;;  %v11437_v29 = vadd.f32 %v7921_v63, %v5734_v44 }
 0x405   : > { %v7926_v2 = vpop.f32.mrf.mxu0  ;;  %v7813_v13 = vpop.f32.mrf.mxu1 }
 0x406   : > { %v7927_v53 = vadd.f32 %v7926_v2, %v7925_v35  ;;  %v5739_v26 = vadd.f32 %v7812_v39, %v11334_v15 }
 0x407   : > { %v7928_v40 = vpop.f32.mrf.mxu0  ;;  %v7814_v52 = vpop.f32.mrf.mxu1 }
 0x408   : > { %v7815_v17 = vadd.f32 %v7814_v52, %v7813_v13  ;;  %v11440_v28 = vadd.f32 %v7924_v21, %v5739_v26 }
 0x409   : > { %v7929_v49 = vpop.f32.mrf.mxu0  ;;  %v7816_v55 = vpop.f32.mrf.mxu1 }
 0x40a   : > { %v7930_v20 = vadd.f32 %v7929_v49, %v7928_v40  ;;  %v5742_v34 = vadd.f32 %v7815_v17, %v11341_v22 }
 0x40b   : > { %v7931_v11 = vpop.f32.mrf.mxu0  ;;  %v7817_v59 = vpop.f32.mrf.mxu1 }
 0x40c   : > { %v7818_v3 = vadd.f32 %v7817_v59, %v7816_v55  ;;  %v11443_v45 = vadd.f32 %v7927_v53, %v5742_v34 }
 0x40d   : > { %v7932_v1 = vpop.f32.mrf.mxu0  ;;  %v7819_v30 = vpop.f32.mrf.mxu1 }
 0x40e   : > { %v7933_v18 = vadd.f32 %v7932_v1, %v7931_v11  ;;  %v5747_v15 = vadd.f32 %v7818_v3, %v11344_v4 }
 0x40f   : > { %v7934_v6 = vpop.f32.mrf.mxu0  ;;  %v7820_v63 = vpop.f32.mrf.mxu1 }
 0x410   : > { %v7821_v0 = vadd.f32 %v7820_v63, %v7819_v30  ;;  %v11446_v19 = vadd.f32 %v7930_v20, %v5747_v15 }
 0x411   : > { %v7935_v27 = vpop.f32.mrf.mxu0  ;;  %v7822_v5 = vpop.f32.mrf.mxu1 }
 0x412   : > { %v7936_v37 = vadd.f32 %v7935_v27, %v7934_v6  ;;  %v5750_v22 = vadd.f32 %v7821_v0, %v11350_v51 }
 0x413   : > { %v7937_v10 = vpop.f32.mrf.mxu0  ;;  %v7823_v21 = vpop.f32.mrf.mxu1 }
 0x414   : > { %v7824_v44 = vadd.f32 %v7823_v21, %v7822_v5  ;;  %v11449_v9 = vadd.f32 %v7933_v18, %v5750_v22 }
 0x415   : > { %v7938_v35 = vpop.f32.mrf.mxu0  ;;  %v7825_v39 = vpop.f32.mrf.mxu1 }
 0x416   : > { %v7939_v2 = vadd.f32 %v7938_v35, %v7937_v10  ;;  %v5755_v4 = vadd.f32 %v7824_v44, %v11353_v14 }
 0x417   : > { %v11452_v13 = vpop.f32.mrf.mxu0  ;;  %v7826_v53 = vpop.f32.mrf.mxu1 }
 0x418   : > { %v7827_v26 = vadd.f32 %v7826_v53, %v7825_v39  ;;  %v11456_v52 = vadd.f32 %v7936_v37, %v5755_v4 }
 0x419   : > { %v11454_v40 = vpop.f32.mrf.mxu0  ;;  %v11458_v51 = vpop.f32.mrf.mxu1 }
 0x41a   : > { %v5758_v17 = vadd.f32 %v7827_v26, %v11359_v58  ;;  %v11477_v58 = vld [vmem:[%s11597_s6] ss:$0 sm:$0xff] }
 0x41b   : > { %v11461_v49 = vpop.f32.mrf.mxu0  ;;  %v11463_v55 = vpop.f32.mrf.mxu1 }
 0x41c   : > { %v11467_v14 = vadd.f32 %v7939_v2, %v5758_v17 }
 0x41d   : > { %v11465_v20 = vpop.f32.mrf.mxu0  ;;  %v11469_v34 = vpop.f32.mrf.mxu1 }
 0x41f   : > { %v8108_v11 = vpop.f32.mrf.mxu0  ;;  %v11471_v59 = vpop.f32.mrf.mxu1 }
 0x421   : > { %v6317_v3 = vpop.f32.mrf.mxu0  ;;  %v8060_v1 = vpop.f32.mrf.mxu1 }
 0x422   : > { %v5973_v30 = vadd.f32 %v8060_v1, %v11374_v48 }
 0x423   : > { %v8109_v18 = vpop.f32.mrf.mxu0  ;;  %v5964_v15 = vpop.f32.mrf.mxu1 }
 0x424   : > { %v6446_v6 = vadd.f32 %v8108_v11, %v5973_v30  ;;  %v5965_v63 = vadd.f32 %v5964_v15, %v11368_v23 }
 0x425   : > { %v6320_v0 = vpop.f32.mrf.mxu0  ;;  %v8061_v27 = vpop.f32.mrf.mxu1 }
 0x426   : > { %v6485_v5 = vadd.f32 %v11477_v58, %v6446_v6  ;;  %v6444_v37 = vadd.f32 %v6317_v3, %v5965_v63  ;;  %v5976_v22 = vadd.f32 %v8061_v27, %v11377_v43 }
 0x427   : > { %v8112_v10 = vpop.f32.mrf.mxu0  ;;  %v5967_v48 = vpop.f32.mrf.mxu1 }
 0x428   : > { %v6517_v21 = vmax.f32 %v6485_v5, 0.0  ;;  %v6483_v44 = vadd.f32 %v11477_v58, %v6444_v37  ;;  %v6447_v23 = vadd.f32 %v8109_v18, %v5976_v22  ;;  %v5968_v35 = vadd.f32 %v5967_v48, %v11371_v46 }
 0x429   : > { %v6333_v39 = vpop.f32.mrf.mxu0  ;;  %v8064_v2 = vpop.f32.mrf.mxu1 }
 0x42a   : > { %6549 = vst [vmem:[%s11486_s26 + $0x10] sm:$0xff] %v6517_v21  ;;  %v6515_v43 = vmax.f32 %v6483_v44, 0.0  ;;  %v6486_v4 = vadd.f32 %v11477_v58, %v6447_v23  ;;  %v6445_v53 = vadd.f32 %v6320_v0, %v5968_v35  ;;  %v5989_v26 = vadd.f32 %v8064_v2, %v11386_v54 }
 0x42b   : > { %v8113_v17 = vpop.f32.mrf.mxu0  ;;  %v5980_v11 = vpop.f32.mrf.mxu1 }
 0x42c   : > { %6547 = vst [vmem:[%s11486_s26] sm:$0xff] %v6515_v43  ;;  %v6518_v3 = vmax.f32 %v6486_v4, 0.0  ;;  %v6484_v1 = vadd.f32 %v11477_v58, %v6445_v53  ;;  %v6450_v30 = vadd.f32 %v8112_v10, %v5989_v26  ;;  %v5981_v46 = vadd.f32 %v5980_v11, %v11380_v33 }
 0x42d   : > { %v6336_v18 = vpop.f32.mrf.mxu0  ;;  %v8065_v15 = vpop.f32.mrf.mxu1 }
 0x42e   : > { %6550 = vst [vmem:[%s11486_s26 + $0x18] sm:$0xff] %v6518_v3  ;;  %v6516_v6 = vmax.f32 %v6484_v1, 0.0  ;;  %v6489_v63 = vadd.f32 %v11477_v58, %v6450_v30  ;;  %v6448_v0 = vadd.f32 %v6333_v39, %v5981_v46  ;;  %v5992_v54 = vadd.f32 %v8065_v15, %v11389_v31 }
 0x42f   : > { %v8116_v27 = vpop.f32.mrf.mxu0  ;;  %v5983_v5 = vpop.f32.mrf.mxu1 }
 0x430   : > { %6548 = vst [vmem:[%s11486_s26 + $0x8] sm:$0xff] %v6516_v6  ;;  %v6521_v37 = vmax.f32 %v6489_v63, 0.0  ;;  %v6487_v22 = vadd.f32 %v11477_v58, %v6448_v0  ;;  %v6451_v10 = vadd.f32 %v8113_v17, %v5992_v54  ;;  %v5984_v33 = vadd.f32 %v5983_v5, %v11383_v61 }
 0x431   : > { %v6349_v48 = vpop.f32.mrf.mxu0  ;;  %v8068_v21 = vpop.f32.mrf.mxu1 }
 0x432   : > { %6553 = vst [vmem:[%s11486_s26 + $0x30] sm:$0xff] %v6521_v37  ;;  %v6519_v44 = vmax.f32 %v6487_v22, 0.0  ;;  %v6490_v23 = vadd.f32 %v11477_v58, %v6451_v10  ;;  %v6449_v35 = vadd.f32 %v6336_v18, %v5984_v33  ;;  %v6005_v31 = vadd.f32 %v8068_v21, %v11398_v50 }
 0x433   : > { %v8117_v39 = vpop.f32.mrf.mxu0  ;;  %v5996_v2 = vpop.f32.mrf.mxu1 }
 0x434   : > { %6551 = vst [vmem:[%s11486_s26 + $0x20] sm:$0xff] %v6519_v44  ;;  %v6522_v43 = vmax.f32 %v6490_v23, 0.0  ;;  %v6488_v4 = vadd.f32 %v11477_v58, %v6449_v35  ;;  %v6454_v53 = vadd.f32 %v8116_v27, %v6005_v31  ;;  %v5997_v61 = vadd.f32 %v5996_v2, %v11392_v60 }
 0x435   : > { %v6352_v26 = vpop.f32.mrf.mxu0  ;;  %v8069_v17 = vpop.f32.mrf.mxu1 }
 0x436   : > { %6554 = vst [vmem:[%s11486_s26 + $0x38] sm:$0xff] %v6522_v43  ;;  %v6520_v11 = vmax.f32 %v6488_v4, 0.0  ;;  %v6493_v3 = vadd.f32 %v11477_v58, %v6454_v53  ;;  %v6452_v1 = vadd.f32 %v6349_v48, %v5997_v61  ;;  %v6008_v50 = vadd.f32 %v8069_v17, %v11401_v25 }
 0x437   : > { %v8120_v30 = vpop.f32.mrf.mxu0  ;;  %v5999_v46 = vpop.f32.mrf.mxu1 }
 0x438   : > { %6552 = vst [vmem:[%s11486_s26 + $0x28] sm:$0xff] %v6520_v11  ;;  %v6525_v18 = vmax.f32 %v6493_v3, 0.0  ;;  %v6491_v15 = vadd.f32 %v11477_v58, %v6452_v1  ;;  %v6455_v6 = vadd.f32 %v8117_v39, %v6008_v50  ;;  %v6000_v60 = vadd.f32 %v5999_v46, %v11395_v56 }
 0x439   : > { %v6365_v63 = vpop.f32.mrf.mxu0  ;;  %v8072_v0 = vpop.f32.mrf.mxu1 }
 0x43a   : > { %6557 = vst [vmem:[%s11486_s26 + $0x50] sm:$0xff] %v6525_v18  ;;  %v6523_v54 = vmax.f32 %v6491_v15, 0.0  ;;  %v6494_v27 = vadd.f32 %v11477_v58, %v6455_v6  ;;  %v6453_v5 = vadd.f32 %v6352_v26, %v6000_v60  ;;  %v6021_v25 = vadd.f32 %v8072_v0, %v11410_v16 }
 0x43b   : > { %v8121_v37 = vpop.f32.mrf.mxu0  ;;  %v6012_v22 = vpop.f32.mrf.mxu1 }
 0x43c   : > { %6555 = vst [vmem:[%s11486_s26 + $0x40] sm:$0xff] %v6523_v54  ;;  %v6526_v10 = vmax.f32 %v6494_v27, 0.0  ;;  %v6492_v33 = vadd.f32 %v11477_v58, %v6453_v5  ;;  %v6458_v48 = vadd.f32 %v8120_v30, %v6021_v25  ;;  %v6013_v56 = vadd.f32 %v6012_v22, %v11404_v62 }
 0x43d   : > { %v6368_v21 = vpop.f32.mrf.mxu0  ;;  %v8073_v44 = vpop.f32.mrf.mxu1 }
 0x43e   : > { %6558 = vst [vmem:[%s11486_s26 + $0x58] sm:$0xff] %v6526_v10  ;;  %v6524_v23 = vmax.f32 %v6492_v33, 0.0  ;;  %v6497_v35 = vadd.f32 %v11477_v58, %v6458_v48  ;;  %v6456_v31 = vadd.f32 %v6365_v63, %v6013_v56  ;;  %v6024_v16 = vadd.f32 %v8073_v44, %v11413_v32 }
 0x43f   : > { %v8124_v39 = vpop.f32.mrf.mxu0  ;;  %v6015_v2 = vpop.f32.mrf.mxu1 }
 0x440   : > { %6556 = vst [vmem:[%s11486_s26 + $0x48] sm:$0xff] %v6524_v23  ;;  %v6529_v43 = vmax.f32 %v6497_v35, 0.0  ;;  %v6495_v4 = vadd.f32 %v11477_v58, %v6456_v31  ;;  %v6459_v53 = vadd.f32 %v8121_v37, %v6024_v16  ;;  %v6016_v62 = vadd.f32 %v6015_v2, %v11407_v7 }
 0x441   : > { %v6381_v61 = vpop.f32.mrf.mxu0  ;;  %v8076_v26 = vpop.f32.mrf.mxu1 }
 0x442   : > { %6561 = vst [vmem:[%s11486_s26 + $0x70] sm:$0xff] %v6529_v43  ;;  %v6527_v17 = vmax.f32 %v6495_v4, 0.0  ;;  %v6498_v11 = vadd.f32 %v11477_v58, %v6459_v53  ;;  %v6457_v3 = vadd.f32 %v6368_v21, %v6016_v62  ;;  %v6037_v32 = vadd.f32 %v8076_v26, %v11422_v38 }
 0x443   : > { %v8125_v1 = vpop.f32.mrf.mxu0  ;;  %v6028_v50 = vpop.f32.mrf.mxu1  ;;  %v7830_v62 = vadd.f32 %v11463_v55, %v11458_v51 }
 0x444   : > { %6559 = vst [vmem:[%s11486_s26 + $0x60] sm:$0xff] %v6527_v17  ;;  %v6530_v30 = vmax.f32 %v6498_v11, 0.0  ;;  %v6496_v46 = vadd.f32 %v11477_v58, %v6457_v3  ;;  %v6462_v18 = vadd.f32 %v8124_v39, %v6037_v32  ;;  %v6029_v7 = vadd.f32 %v6028_v50, %v11416_v24 }
 0x445   : > { %v6384_v15 = vpop.f32.mrf.mxu0  ;;  %v8077_v6 = vpop.f32.mrf.mxu1  ;;  %v5763_v55 = vadd.f32 %v7830_v62, %v11362_v36 }
 0x446   : > { %6562 = vst [vmem:[%s11486_s26 + $0x78] sm:$0xff] %v6530_v30  ;;  %v6528_v60 = vmax.f32 %v6496_v46, 0.0  ;;  %v6501_v63 = vadd.f32 %v11477_v58, %v6462_v18  ;;  %v6460_v0 = vadd.f32 %v6381_v61, %v6029_v7  ;;  %v6040_v38 = vadd.f32 %v8077_v6, %v11425_v41 }
 0x447   : > { %v8128_v54 = vpop.f32.mrf.mxu0  ;;  %v6031_v27 = vpop.f32.mrf.mxu1  ;;  %v7833_v46 = vadd.f32 %v11471_v59, %v11469_v34 }
 0x448   : > { %6560 = vst [vmem:[%s11486_s26 + $0x68] sm:$0xff] %v6528_v60  ;;  %v6533_v5 = vmax.f32 %v6501_v63, 0.0  ;;  %v6499_v25 = vadd.f32 %v11477_v58, %v6460_v0  ;;  %v6463_v37 = vadd.f32 %v8125_v1, %v6040_v38  ;;  %v6032_v24 = vadd.f32 %v6031_v27, %v11419_v12 }
 0x449   : > { %v6397_v22 = vpop.f32.mrf.mxu0  ;;  %v8080_v10 = vpop.f32.mrf.mxu1  ;;  %v7942_v63 = vadd.f32 %v11454_v40, %v11452_v13 }
 0x44a   : > { %6565 = vst [vmem:[%s11486_s26 + $0x90] sm:$0xff] %v6533_v5  ;;  %v6531_v33 = vmax.f32 %v6499_v25, 0.0  ;;  %v6502_v48 = vadd.f32 %v11477_v58, %v6463_v37  ;;  %v6461_v56 = vadd.f32 %v6384_v15, %v6032_v24  ;;  %v6053_v41 = vadd.f32 %v8080_v10, %v11434_v57 }
 0x44b   : > { %v8129_v21 = vpop.f32.mrf.mxu0  ;;  %v6044_v44 = vpop.f32.mrf.mxu1  ;;  %v5924_v5 = vadd.f32 %v7942_v63, %v5763_v55  ;;  %v7945_v37 = vadd.f32 %v11465_v20, %v11461_v49 }
 0x44c   : > { %6563 = vst [vmem:[%s11486_s26 + $0x80] sm:$0xff] %v6531_v33  ;;  %v6534_v23 = vmax.f32 %v6502_v48, 0.0  ;;  %v6500_v35 = vadd.f32 %v11477_v58, %v6461_v56  ;;  %v6466_v31 = vadd.f32 %v8128_v54, %v6053_v41  ;;  %v6045_v12 = vadd.f32 %v6044_v44, %v11428_v42 }
 0x44d   : > { %v6400_v16 = vpop.f32.mrf.mxu0  ;;  %v8081_v39 = vpop.f32.mrf.mxu1  ;;  %v5766_v54 = vadd.f32 %v7833_v46, %v11365_v8 }
 0x44e   : > { %6566 = vst [vmem:[%s11486_s26 + $0x98] sm:$0xff] %v6534_v23  ;;  %v6532_v2 = vmax.f32 %v6500_v35, 0.0  ;;  %v6505_v43 = vadd.f32 %v11477_v58, %v6466_v31  ;;  %v6464_v4 = vadd.f32 %v6397_v22, %v6045_v12  ;;  %v6056_v57 = vadd.f32 %v8081_v39, %v11437_v29 }
 0x44f   : > { %v8132_v53 = vpop.f32.mrf.mxu0  ;;  %v6047_v61 = vpop.f32.mrf.mxu1  ;;  %v5927_v56 = vadd.f32 %v7945_v37, %v5766_v54 }
 0x450   : > { %6564 = vst [vmem:[%s11486_s26 + $0x88] sm:$0xff] %v6532_v2  ;;  %v6537_v26 = vmax.f32 %v6505_v43, 0.0  ;;  %v6503_v42 = vadd.f32 %v11477_v58, %v6464_v4  ;;  %v6467_v17 = vadd.f32 %v8129_v21, %v6056_v57  ;;  %v6048_v11 = vadd.f32 %v6047_v61, %v11431_v47 }
 0x451   : > { %v6413_v3 = vpop.f32.mrf.mxu0  ;;  %v8084_v32 = vpop.f32.mrf.mxu1 }
 0x452   : > { %6569 = vst [vmem:[%s11486_s26 + $0xb0] sm:$0xff] %v6537_v26  ;;  %v6535_v1 = vmax.f32 %v6503_v42, 0.0  ;;  %v6506_v29 = vadd.f32 %v11477_v58, %v6467_v17  ;;  %v6465_v50 = vadd.f32 %v6400_v16, %v6048_v11  ;;  %v6069_v30 = vadd.f32 %v8084_v32, %v11446_v19 }
 0x453   : > { %v8133_v51 = vpop.f32.mrf.mxu0  ;;  %v6060_v18 = vpop.f32.mrf.mxu1 }
 0x454   : > { %6567 = vst [vmem:[%s11486_s26 + $0xa0] sm:$0xff] %v6535_v1  ;;  %v6538_v7 = vmax.f32 %v6506_v29, 0.0  ;;  %v6504_v47 = vadd.f32 %v11477_v58, %v6465_v50  ;;  %v6470_v15 = vadd.f32 %v8132_v53, %v6069_v30  ;;  %v6061_v6 = vadd.f32 %v6060_v18, %v11440_v28 }
 0x455   : > { %v6416_v60 = vpop.f32.mrf.mxu0  ;;  %v8085_v19 = vpop.f32.mrf.mxu1 }
 0x456   : > { %6570 = vst [vmem:[%s11486_s26 + $0xb8] sm:$0xff] %v6538_v7  ;;  %v6536_v0 = vmax.f32 %v6504_v47, 0.0  ;;  %v6509_v36 = vadd.f32 %v11477_v58, %v6470_v15  ;;  %v6468_v34 = vadd.f32 %v6413_v3, %v6061_v6  ;;  %v6072_v59 = vadd.f32 %v8085_v19, %v11449_v9 }
 0x457   : > { %v8136_v38 = vpop.f32.mrf.mxu0  ;;  %v6063_v27 = vpop.f32.mrf.mxu1 }
 0x458   : > { %6568 = vst [vmem:[%s11486_s26 + $0xa8] sm:$0xff] %v6536_v0  ;;  %v6541_v28 = vmax.f32 %v6509_v36, 0.0  ;;  %v6507_v25 = vadd.f32 %v11477_v58, %v6468_v34  ;;  %v6471_v13 = vadd.f32 %v8133_v51, %v6072_v59  ;;  %v6064_v40 = vadd.f32 %v6063_v27, %v11443_v45 }
 0x459   : > { %v8088_v24 = vpop.f32.mrf.mxu1  ;;  %v6429_v22 = vpop.f32.mrf.mxu0 }
 0x45a   : > { %6573 = vst [vmem:[%s11486_s26 + $0xd0] sm:$0xff] %v6541_v28  ;;  %v6539_v9 = vmax.f32 %v6507_v25, 0.0  ;;  %v6510_v8 = vadd.f32 %v11477_v58, %v6471_v13  ;;  %v6469_v10 = vadd.f32 %v6416_v60, %v6064_v40  ;;  %v6085_v33 = vadd.f32 %v8088_v24, %v5924_v5 }
 0x45b   : > { %v6076_v48 = vpop.f32.mrf.mxu1  ;;  %v8137_v20 = vpop.f32.mrf.mxu0 }
 0x45c   : > { %6571 = vst [vmem:[%s11486_s26 + $0xc0] sm:$0xff] %v6539_v9  ;;  %v6542_v41 = vmax.f32 %v6510_v8, 0.0  ;;  %v6508_v21 = vadd.f32 %v11477_v58, %v6469_v10  ;;  %v6474_v45 = vadd.f32 %v8136_v38, %v6085_v33  ;;  %v6077_v49 = vadd.f32 %v6076_v48, %v11456_v52 }
 0x45d   : > { %v8089_v44 = vpop.f32.mrf.mxu1  ;;  %v6432_v52 = vpop.f32.mrf.mxu0 }
 0x45e   : > { %6574 = vst [vmem:[%s11486_s26 + $0xd8] sm:$0xff] %v6542_v41  ;;  %v6540_v23 = vmax.f32 %v6508_v21, 0.0  ;;  %v6513_v35 = vadd.f32 %v11477_v58, %v6474_v45  ;;  %v6472_v31 = vadd.f32 %v6429_v22, %v6077_v49  ;;  %v6088_v12 = vadd.f32 %v8089_v44, %v5927_v56 }
 0x45f   : > { %v6079_v16 = vpop.f32.mrf.mxu1 }
 0x460   : > { %6572 = vst [vmem:[%s11486_s26 + $0xc8] sm:$0xff] %v6540_v23  ;;  %v6545_v39 = vmax.f32 %v6513_v35, 0.0  ;;  %v6511_v2 = vadd.f32 %v11477_v58, %v6472_v31  ;;  %v6475_v43 = vadd.f32 %v8137_v20, %v6088_v12  ;;  %v6080_v4 = vadd.f32 %v6079_v16, %v11467_v14 }
 0x462   : > { %6577 = vst [vmem:[%s11486_s26 + $0xf0] sm:$0xff] %v6545_v39  ;;  %v6543_v57 = vmax.f32 %v6511_v2, 0.0  ;;  %v6514_v53 = vadd.f32 %v11477_v58, %v6475_v43  ;;  %v6473_v62 = vadd.f32 %v6432_v52, %v6080_v4 }
 0x464   : > { %6575 = vst [vmem:[%s11486_s26 + $0xe0] sm:$0xff] %v6543_v57  ;;  %v6546_v61 = vmax.f32 %v6514_v53, 0.0  ;;  %v6512_v26 = vadd.f32 %v11477_v58, %v6473_v62 }
 0x466   : > { %6578 = vst [vmem:[%s11486_s26 + $0xf8] sm:$0xff] %v6546_v61  ;;  %v6544_v42 = vmax.f32 %v6512_v26, 0.0 }
 0x468   : > { %6576 = vst [vmem:[%s11486_s26 + $0xe8] sm:$0xff] %v6544_v42 }
 0x469 PF: > { %s17_s24 = sadd.s32 1, %s8388_s24  }
 0x46a   : > { %p14_p4 = scmp.ge.s32.totalorder %s17_s24, 4  }
 0x46c   :  { %16 = sbr.rel (!%p14_p4) target bundleno = 1 (0x1), region = 82 }

</bundles_post_ra>
